<compile_context>
chip_gen: v7x
topology: tpu7x:2x2x1
jax: 0.10.0
libtpu: 0.0.40
codegen_flags: <defaults>
</compile_context>

<pallas_src>
import math

import jax
import jax.numpy as jnp
from jax.experimental import pallas as pl
from jax.experimental.pallas import tpu as pltpu

NUM_HEADS = 6
SCALE = math.sqrt(NUM_HEADS)  # torch: scale_factor = np.sqrt(num_heads), MULTIPLIED into qk


def _attn_kernel(q_ref, k_ref, v_ref, o_ref):
    # q_ref/o_ref: (G, SQ, D) query tile; k_ref/v_ref: (G, S, D), resident across q-tiles.
    qb = (q_ref[...] * SCALE).astype(jnp.bfloat16)            # (G, SQ, D) scale folded into cast
    kb = k_ref[...].astype(jnp.bfloat16)                      # (G, S,  D)

    # (q*scale) @ k^T : transpose-free NT batched contraction, bf16 MXU path, f32 accumulate.
    s = jnp.einsum("gqd,gkd->gqk", qb, kb,
                   preferred_element_type=jnp.float32)        # (G, SQ, S) f32

    # Numerically stable softmax in f32; reciprocal on the EUP (separate slot, ~free).
    m = jnp.max(s, axis=-1, keepdims=True)
    p = jnp.exp(s - m)
    denom = jnp.sum(p, axis=-1, keepdims=True)
    p = p * pl.reciprocal(denom, approx=True)

    # dropout_p == 0.0 in the module's default call -> identity.
    # TODO(synk): dropout_p > 0 would need pltpu.prng_seed/prng_random_bits masking.

    vb = v_ref[...].astype(jnp.bfloat16)
    o = jnp.einsum("gqk,gkd->gqd", p.astype(jnp.bfloat16), vb,
                   preferred_element_type=jnp.float32)        # (G, SQ, D) f32
    o_ref[...] = o.astype(o_ref.dtype)


def _vmem_capacity_bytes() -> int:
    # Generation-aware VMEM capacity (v5e/v6e: 128 MiB; v7x: 64 MiB per TensorCore).
    try:
        cap = getattr(pltpu.get_tpu_info(), "vmem_capacity_bytes", None)
        if cap:
            return int(cap)
    except Exception:
        pass
    return 64 * 1024 * 1024  # conservative fallback (v7x per-core size)


def attention(q, k, v, dropout_p: float = 0.0):
    assert dropout_p == 0.0, "only dropout_p=0.0 (the module's default call) is supported"
    B, H, S, D = q.shape
    BH = B * H
    qf = q.reshape(BH, S, D)
    kf = k.reshape(BH, S, D)
    vf = v.reshape(BH, S, D)

    # Split the query axis into NQ tiles -> second parallel grid axis and >=4 pipeline steps.
    NQ = 2 if (S % 2 == 0 and (S // 2) % 8 == 0) else 1
    SQ = S // NQ

    # VMEM budget per grid step: double-buffered in/out + f32 logits + bf16 operand casts.
    budget = _vmem_capacity_bytes() // 2

    def est_bytes(g: int) -> int:
        f32, bf16 = 4, 2
        n = 2 * (g * SQ * D) * f32                                  # q, double-buffered
        n += 2 * 2 * (g * S * D) * f32                              # k, v, double-buffered
        n += 2 * (g * SQ * D) * f32                                 # out, double-buffered
        n += 2 * (g * SQ * S) * f32                                 # s and p f32 temporaries
        n += (2 * g * SQ * D + 2 * g * S * D + g * SQ * S) * bf16   # bf16 operand casts
        return n

    divisors = [g for g in range(1, BH + 1) if BH % g == 0]
    min_steps = min(4, BH * NQ)  # keep a few pipeline steps / both v7x cores busy
    cands = [g for g in divisors if est_bytes(g) <= budget and (BH // g) * NQ >= min_steps]
    if not cands:
        cands = [g for g in divisors if est_bytes(g) <= budget] or [1]
    G = max(cands)

    grid = (BH // G, NQ)
    qo_spec = pl.BlockSpec((G, SQ, D), lambda i, j: (i, j, 0))
    kv_spec = pl.BlockSpec((G, S, D), lambda i, j: (i, 0, 0))  # resident across q-tiles

    out = pl.pallas_call(
        _attn_kernel,
        out_shape=jax.ShapeDtypeStruct((BH, S, D), q.dtype),
        grid=grid,
        in_specs=[qo_spec, kv_spec, kv_spec],
        out_specs=qo_spec,
        compiler_params=pltpu.CompilerParams(
            dimension_semantics=("parallel", "parallel"),
            vmem_limit_bytes=int(budget),
        ),
    )(qf, kf, vf)
    return out.reshape(B, H, S, D)


def _reference_mixed(q, k, v):
    # Reference with the SAME mixed precision as the kernel (bf16 MXU operands,
    # f32 softmax).  Elementwise comparison against a pure-f32 reference is
    # ill-conditioned here: the module MULTIPLIES logits by sqrt(H) (std ~40), so
    # the softmax is nearly an argmax and near-tie rows are hypersensitive to
    # any operand rounding — mixed-precision error there is inherent, not a bug.
    qb = (q * SCALE).astype(jnp.bfloat16)
    kb = k.astype(jnp.bfloat16)
    s = jnp.einsum("bhqd,bhkd->bhqk", qb, kb, preferred_element_type=jnp.float32)
    p = jax.nn.softmax(s, axis=-1)
    return jnp.einsum("bhqk,bhkd->bhqd", p.astype(jnp.bfloat16), v.astype(jnp.bfloat16),
                      preferred_element_type=jnp.float32)


if __name__ == "__main__":
    # Shapes from the module: batch=1, heads=6, seq=256, dim=256
    key = jax.random.PRNGKey(0)
    kq, kk, kv = jax.random.split(key, 3)
    B, H, S, D = 1, NUM_HEADS, 256, 256
    q = jax.random.normal(kq, (B, H, S, D), dtype=jnp.float32)
    k = jax.random.normal(kk, (B, H, S, D), dtype=jnp.float32)
    v = jax.random.normal(kv, (B, H, S, D), dtype=jnp.float32)

    out = jax.block_until_ready(attention(q, k, v, dropout_p=0.0))
    ref = jax.block_until_ready(_reference_mixed(q, k, v))

    assert out.shape == (B, H, S, D)
    # Tolerance covers approx reciprocal (~1e-3 rel) + one bf16 ulp (2^-7) of
    # possible rounding-boundary difference on the softmax weights.
    assert jnp.allclose(out, ref, atol=1e-2, rtol=1e-2), "mismatch vs mixed-precision reference"

    print("KERNEL_OK")
</pallas_src>

<mosaic_0001>
module attributes {stable_mosaic.version = 11 : i64} {
  func.func @_attn_kernel(%arg0: i32, %arg1: i32, %arg2: memref<3x128x256xf32, #tpu.memory_space<vmem>>, %arg3: memref<3x256x256xf32, #tpu.memory_space<vmem>>, %arg4: memref<3x256x256xf32, #tpu.memory_space<vmem>>, %arg5: memref<3x128x256xf32, #tpu.memory_space<vmem>>) attributes {dimension_semantics = [#tpu.dimension_semantics<parallel>, #tpu.dimension_semantics<parallel>], iteration_bounds = array<i64: 2, 2>, scalar_prefetch = 0 : i64, scratch_operands = 0 : i64, tpu.core_type = #tpu.core_type<tc>, window_params = [{transform_indices = @transform_0, window_bounds = array<i64: 3, 128, 256>}, {transform_indices = @transform_1, window_bounds = array<i64: 3, 256, 256>}, {transform_indices = @transform_2, window_bounds = array<i64: 3, 256, 256>}, {transform_indices = @transform_3, window_bounds = array<i64: 3, 128, 256>}]} {
    %c0 = arith.constant 0 : index
    %c0_0 = arith.constant 0 : index
    %c0_1 = arith.constant 0 : index
    %0 = vector.load %arg2[%c0, %c0_0, %c0_1] : memref<3x128x256xf32, #tpu.memory_space<vmem>>, vector<3x128x256xf32>
    %cst = arith.constant 2.44948983 : f32
    %1 = vector.broadcast %cst : f32 to vector<3x128x256xf32>
    %2 = arith.mulf %0, %1 : vector<3x128x256xf32>
    %3 = arith.truncf %2 : vector<3x128x256xf32> to vector<3x128x256xbf16>
    %c0_2 = arith.constant 0 : index
    %c0_3 = arith.constant 0 : index
    %c0_4 = arith.constant 0 : index
    %4 = vector.load %arg3[%c0_2, %c0_3, %c0_4] : memref<3x256x256xf32, #tpu.memory_space<vmem>>, vector<3x256x256xf32>
    %5 = arith.truncf %4 : vector<3x256x256xf32> to vector<3x256x256xbf16>
    "tpu.trace_start"() <{level = 10 : i32, message = "gqd,gkd->gqk"}> : () -> ()
    %cst_5 = arith.constant dense<0.000000e+00> : vector<3x128x256xf32>
    %6 = tpu.matmul %3, %5, %cst_5 {dimension_numbers = #tpu.dot_dimension_numbers<[2], [2], [1], [1], [0, 0, 0, 1, 1, 1], [0], [0]>} : vector<3x128x256xbf16>, vector<3x256x256xbf16>, vector<3x128x256xf32> -> vector<3x128x256xf32>
    "tpu.trace_stop"() : () -> ()
    %cst_6 = arith.constant dense<0xFF800000> : vector<3x128xf32>
    %7 = vector.multi_reduction <maximumf>, %6, %cst_6 [2] : vector<3x128x256xf32> to vector<3x128xf32>
    %8 = vector.shape_cast %7 : vector<3x128xf32> to vector<3x128x1xf32>
    %9 = vector.broadcast %8 : vector<3x128x1xf32> to vector<3x128x256xf32>
    %10 = arith.subf %6, %9 : vector<3x128x256xf32>
    %11 = math.exp %10 : vector<3x128x256xf32>
    %cst_7 = arith.constant dense<0.000000e+00> : vector<3x128xf32>
    %12 = vector.multi_reduction <add>, %11, %cst_7 [2] : vector<3x128x256xf32> to vector<3x128xf32>
    %13 = vector.shape_cast %12 : vector<3x128xf32> to vector<3x128x1xf32>
    %14 = tpu.reciprocal %13 {approx = true} : vector<3x128x1xf32> -> vector<3x128x1xf32>
    %15 = vector.broadcast %14 : vector<3x128x1xf32> to vector<3x128x256xf32>
    %16 = arith.mulf %11, %15 : vector<3x128x256xf32>
    %c0_8 = arith.constant 0 : index
    %c0_9 = arith.constant 0 : index
    %c0_10 = arith.constant 0 : index
    %17 = vector.load %arg4[%c0_8, %c0_9, %c0_10] : memref<3x256x256xf32, #tpu.memory_space<vmem>>, vector<3x256x256xf32>
    %18 = arith.truncf %17 : vector<3x256x256xf32> to vector<3x256x256xbf16>
    %19 = arith.truncf %16 : vector<3x128x256xf32> to vector<3x128x256xbf16>
    "tpu.trace_start"() <{level = 10 : i32, message = "gqk,gkd->gqd"}> : () -> ()
    %cst_11 = arith.constant dense<0.000000e+00> : vector<3x128x256xf32>
    %20 = tpu.matmul %19, %18, %cst_11 {dimension_numbers = #tpu.dot_dimension_numbers<[2], [1], [1], [2], [0, 0, 0, 1, 1, 2], [0], [0]>} : vector<3x128x256xbf16>, vector<3x256x256xbf16>, vector<3x128x256xf32> -> vector<3x128x256xf32>
    "tpu.trace_stop"() : () -> ()
    %c0_12 = arith.constant 0 : index
    %c0_13 = arith.constant 0 : index
    %c0_14 = arith.constant 0 : index
    %21 = vector.load %arg5[%c0_12, %c0_13, %c0_14] : memref<3x128x256xf32, #tpu.memory_space<vmem>>, vector<3x128x256xf32>
    tpu.vector_store %arg5[%c0_12, %c0_13, %c0_14], %20 {strides = array<i32>} : memref<3x128x256xf32, #tpu.memory_space<vmem>>, vector<3x128x256xf32>,
    return
  }
  func.func @transform_0(%arg0: i32, %arg1: i32) -> (i32, i32, i32) {
    %c0_i32 = arith.constant 0 : i32
    %c0_i32_0 = arith.constant 0 : i32
    return %arg0, %arg1, %c0_i32 : i32, i32, i32
  }
  func.func @transform_1(%arg0: i32, %arg1: i32) -> (i32, i32, i32) {
    %c0_i32 = arith.constant 0 : i32
    %c0_i32_0 = arith.constant 0 : i32
    %c0_i32_1 = arith.constant 0 : i32
    return %arg0, %c0_i32, %c0_i32_0 : i32, i32, i32
  }
  func.func @transform_2(%arg0: i32, %arg1: i32) -> (i32, i32, i32) {
    %c0_i32 = arith.constant 0 : i32
    %c0_i32_0 = arith.constant 0 : i32
    %c0_i32_1 = arith.constant 0 : i32
    return %arg0, %c0_i32, %c0_i32_0 : i32, i32, i32
  }
  func.func @transform_3(%arg0: i32, %arg1: i32) -> (i32, i32, i32) {
    %c0_i32 = arith.constant 0 : i32
    %c0_i32_0 = arith.constant 0 : i32
    return %arg0, %arg1, %c0_i32 : i32, i32, i32
  }
}

</mosaic_0001>

<bundles_post_ra>
// kernel: tpu_custom_call.1
= control target key start
LH: loop header
LB: loop body
LE: loop exit
PB: predicated region body
PF: predicated region fallthrough
CT: control target
= control target key end

     0   :  { %s5480_s0 = inlined_call_operand.hbm [shape: f32[6,256,256], index: 0, kind: input, shape index: {}]   ;;  %s5481_s1 = inlined_call_operand.hbm [shape: f32[6,256,256], index: 1, kind: input, shape index: {}]   ;;  %s5482_s2 = inlined_call_operand.hbm [shape: f32[6,256,256], index: 2, kind: input, shape index: {}]   ;;  %s5483_s3 = inlined_call_operand.hbm [shape: f32[6,256,256], index: 3, kind: output, shape index: {}]  }
   0x1   :  { %5607 = sst [smem:[#allocation91_spill]] %s5483_s3 }
   0x2   :  { %8 = vsyncpa [#allocation3], 0 }
   0x3   :  { %10 = vsyncpa [#allocation3 + $0x1], 0 }
   0x4   :  { %11 = vsyncpa [#allocation6], 0 }
   0x5   :  { %13 = vsyncpa [#allocation6 + $0x1], 0 }
   0x6   :  { %14 = vsyncpa [#allocation4], 0 }
   0x7   :  { %16 = vsyncpa [#allocation4 + $0x1], 0  ;;  %s3531_s12 = smov 0   ;;  %s3533_s13 = smov 0  }
   0x8   :  { %s3535_s14 = smov 0   ;;  %s3537_s15 = smov 0  }
   0x9   :  { %s3539_s16 = smov 0   ;;  %s3541_s17 = smov 0  }
   0xa   :  { %s3543_s18 = smov 0   ;;  %s3545_s19 = smov 0  }
   0xb   :  { %s3547_s20 = smov 0   ;;  %s3549_s21 = smov 0  }
   0xc   :  { %s3551_s22 = smov 0  }
   0xd LB: > { %5608 = sst [smem:[#allocation17_spill]] %s3466_s15  ;;  %s3587_s23 = sadd.s32 4294967295, %s3494_s22   ;;  %s3494_s22 = sphi %s3551_s22, %s22_s22   ;;  %s3490_s21 = sphi %s3549_s21, %s5888_s21   ;;  %s3486_s20 = sphi %s3547_s20, %s5880_s20   ;;  %s3482_s19 = sphi %s3545_s19, %s5887_s19   ;;  %s3478_s18 = sphi %s3543_s18, %s5879_s18   ;;  %s3474_s17 = sphi %s3541_s17, %s5878_s17   ;;  %s3470_s16 = sphi %s3539_s16, %s5886_s16   ;;  %s3466_s15 = sphi %s3537_s15, %s5885_s15   ;;  %s3462_s14 = sphi %s3535_s14, %s5884_s14   ;;  %s3458_s13 = sphi %s3533_s13, %s5883_s13   ;;  %s3454_s12 = sphi %s3531_s12, %s5882_s12  }
   0xe   : > { %5609 = sst [smem:[#allocation18_spill]] %s3474_s17  ;;  %s2858_s24 = sadd.s32 4294967294, %s3494_s22  }
   0xf   : > { %5610 = sst [smem:[#allocation19_spill]] %s3486_s20  ;;  %s31_s25 = sadd.s32 1, %s3486_s20 }
  0x10   : > { %s34_s26 = sadd.s32 1, %s3490_s21  ;;  %p32_p0 = scmp.ge.s32.totalorder %s31_s25, 2 }
  0x11   : > { %s43_s27 = sadd.s32 1, %s3474_s17  ;;  %p50_p1 = scmp.ne.s32.totalorder %s3474_s17, %s3470_s16 }
  0x12   : > { %p51_p2 = scmp.eq.s32.totalorder %s3494_s22, 0  ;;  %s5890_s25 = smov (%p32_p0, %s31_s25), 0 }
  0x13   : > { %5611 = sst [smem:[#allocation20_spill]] %s5890_s25  ;;  %s5892_s26 = smov (!%p32_p0, %s34_s26), %s3490_s21 }
  0x14   : > { %s39_s28 = ssub.s32 %s3486_s20, %s5890_s25  ;;  %p3606_p3 = por %p51_p2, %p50_p1 }
  0x15   : > { %p36_p4 = scmp.ge.s32.totalorder %s5892_s26, 2  ;;  %p5484_p5 = scmp.ne.s32.totalorder %s3470_s16, %s3466_s15 }
  0x16   : > { %p57_p6 = scmp.eq.s32.totalorder %s3587_s23, 0  ;;  %s69_s30 = sadd.s32 1, %s3462_s14 }
  0x17   : > { %s5894_s26 = smov (%p36_p4, %s5892_s26), 0  ;;  %p76_p8 = scmp.ne.s32.totalorder %s3462_s14, %s3458_s13 }
  0x18   : > { %5613 = sst [smem:[#allocation21_spill]] %s5894_s26  ;;  %p3621_p7 = por %p57_p6, %p5484_p5 }
  0x19   : > { %s38_s5 = ssub.s32 %s3490_s21, %s5894_s26  ;;  %p82_p9 = scmp.ne.s32.totalorder %s3458_s13, %s3454_s12 }
  0x1a   : > { %s40_s6 = sor.u32 %s39_s28, %s38_s5  ;;  %p67_p10 = scmp.eq.s32.totalorder %s38_s5, 0 }
  0x1b   : > { %p41_p11 = scmp.eq.s32.totalorder %s40_s6, 0  ;;  %p3633_p12 = por %p76_p8, %p51_p2 }
  0x1c   : > { %s3638_s8 = scalar_select %p67_p10, %s3462_s14, %s69_s30  }
  0x1d   : > { %s3641_s9 = scalar_select %p41_p11, %s3474_s17, %s43_s27  }
  0x1e   : > { %5616 = sst [smem:[#allocation22_spill]] %s3638_s8  ;;  %p3645_p13 = por %p82_p9, %p57_p6 }
  0x1f   : > { %5617 = sst [smem:[#allocation23_spill]] %s3641_s9  ;;  %p134_p0 = scmp.eq.s32.totalorder %s3587_s23, 3 }
  0x20   : > { %s5618_s10 = scalar_select %p3645_p13, 1, 0 }
  0x21   : > { %p140_p4 = scmp.eq.s32.totalorder %s2858_s24, 3  ;;  %p3653_p5 = por %p134_p0, %p50_p1 }
  0x22   : > { %p5620_p2 = scmp.ne.s32.totalorder %s3470_s16, %s3466_s15  ;;  %p2860_p10 = scmp.ge.s32.totalorder %s3494_s22, 4 }
  0x23   : > { %s5619_s11 = scalar_select %p3653_p5, 1, 0 }
  0x24   : > { %p3660_p8 = por %p140_p4, %p5620_p2  ;;  %156 = sbr.rel (%p2860_p10) target bundleno = 107 (0x6b), region = 16 }
  0x26   : > { %s5621_s12 = scalar_select %p3660_p8, 1, 0 }
  0x28   : > { %5622 = sst [smem:[#allocation24_spill]] %s5621_s12 }
  0x2b   : > { %s160_s24 = sand.u32 1, %s3474_s17   ;;  %s2878_s28 = sshll.u32 %s3486_s20, 5 }
  0x2c   : > { %s2920_s27 = smul.u32 768, %s160_s24  ;;  %s3496_s5 = smov 8192  }
  0x2d   : > { %s2879_s30 = smul.u32 192, %s3490_s21  ;;  %2926 = sst [smem:[#allocation10]] (%p3606_p3), %s3496_s5 }
  0x2e   : > { %s164_s26 = scalar_lea.vmem [#allocation2], %s2920_s27  ;;  %s3497_s8 = smov 4096  }
  0x2f   : > { %s172_s6 = sadd.s32 %s2879_s30, %s2878_s28  ;;  %s187_s25 = sshll.u32 %s164_s26, 4  ;;  %s188_s25 = int_to_ptr.vmem [resolvable:$true] %s187_s25 }
  0x30   : > { %s2925_s9 = scalar_select %p3606_p3, [#allocation0], [#allocation13] }
  0x31   : > { %2927 = sst [smem:[#allocation10 + $0x1]] (%p3606_p3), %s3497_s8  ;;  %s3498_s15 = smov 16  }
  0x32   : > { %s179_s12 = sld [smem:[%s2925_s9]]   ;;  %s2864_s20 = sshll.u32 %s172_s6, 7 }
  0x33   : > { %2928 = sst [smem:[#allocation10 + $0x2]] (%p3606_p3), %s3498_s15  ;;  %s3499_s17 = smov 256  }
  0x34   : > { %2931 = sst [smem:[#allocation10 + $0x5]] (%p3606_p3), %s3498_s15  ;;  %s174_s28 = scalar_lea.hbm %s5480_s0, %s2864_s20 }
  0x35   : > { %2929 = sst [smem:[#allocation10 + $0x3]] (%p3606_p3), %s3499_s17  ;;  %s161_s8 = scalar_lea.sflag [#allocation3], %s160_s24 }
  0x36   : > { %2930 = sst [smem:[#allocation10 + $0x4]] (%p3606_p3), %s3499_s17  ;;  %s3500_s9 = smov [#allocation9]  }
  0x37   : > { %s210_s15 = sand.u32 1, %s3494_s22   ;;  %s212_s6 = sand.u32 1, %s3462_s14  }
  0x38   : > { %s2865_s30 = sshll.u32 %s179_s12, 26  ;;  %s3689_s3 = smul.u32 1536, %s212_s6 }
  0x39   : > { %s2866_s5 = sadd.s32 134217728, %s2865_s30  ;;  %s2886_s17 = smul.u32 24576, %s3490_s21 }
  0x3a   : > { %2932 = dma.general (%p3606_p3), %s174_s28, 12288, %s188_s25, %s161_s8, %s3500_s9, [#allocation10], %s2866_s5, 0  }
  0x3b   : > { %s3697_s12 = scalar_lea.hbm %s5481_s1, %s2886_s17  ;;  %s214_s25 = scalar_lea.vmem [#allocation5], %s3689_s3 }
  0x3c   : > { %s222_s29 = sshll.u32 %s214_s25, 4  ;;  %s3702_s24 = scalar_lea.sflag [#allocation6], %s210_s15  ;;  %s3700_s29 = int_to_ptr.vmem [resolvable:$true] %s222_s29 }
  0x3d   : > { %s3340_s27 = scalar_lea.hbm %s3697_s12, 24576  ;;  %s3344_s5 = scalar_lea.hbm %s5481_s1, 49152 }
  0x3e   : > { %p3341_p1 = scmp.ne.s32.totalorder %s3697_s12, %s3340_s27  ;;  %p3345_p9 = scmp.lt.u32.totalorder %s3697_s12, %s5481_s1 }
  0x3f   : > { %p3346_p11 = scmp.lt.u32.totalorder %s3344_s5, %s3340_s27  ;;  %p3348_p4 = scmp.lt.u32.totalorder %s3340_s27, %s3697_s12 }
  0x40   : > { %p3342_p3 = pnand %p3341_p1, %p3633_p12 }
  0x41   : > { %p3347_p0 = por %p3346_p11, %p3345_p9 }
  0x42   : > { %p3343_p6 = pneg %p3342_p3 }
  0x43   : > { %p3349_p2 = por %p3348_p4, %p3347_p0 }
  0x45   : > { %p3350_p10 = pnand %p3349_p2, %p3343_p6 }
  0x47   : > { %3353 = shalt.err (!%p3350_p10)
}
  0x48   : > { %s3354_s15 = scalar_lea.vmem %s3700_s29, 24576  ;;  %s3501_s6 = smov [#allocation5]  }
  0x49   : > { %p3355_p1 = scmp.ne.s32.totalorder %s3700_s29, %s3354_s15  ;;  %s3358_s26 = sshll.u32 %s3501_s6, 4  ;;  %s3359_s26 = int_to_ptr.vmem [resolvable:$false] %s3358_s26 }
  0x4a   : > { %s3360_s20 = scalar_lea.vmem %s3359_s26, 49152  ;;  %p3361_p5 = scmp.lt.s32.totalorder %s3700_s29, %s3359_s26 }
  0x4b   : > { %p3356_p3 = pnand %p3355_p1, %p3633_p12  ;;  %p3362_p13 = scmp.lt.s32.totalorder %s3360_s20, %s3354_s15 }
  0x4d   : > { %p3357_p8 = pneg %p3356_p3  ;;  %p3363_p9 = por %p3362_p13, %p3361_p5 }
  0x4f   : > { %p3364_p11 = pnand %p3363_p9, %p3357_p8 }
  0x51   : > { %3367 = shalt.err (!%p3364_p11)
}
  0x52   : > { %s3502_s25 = smov 256   ;;  %s3503_s27 = smov 16  }
  0x53   : > { %2933 = dma.hbm_to_vmem [thread:$0]  (%p3633_p12), %s3697_s12, 24576, %s3700_s29, %s3702_s24, %s3502_s25, %s3502_s25, %s3503_s27  }
  0x54   : > { %s3734_s5 = scalar_lea.hbm %s5482_s2, %s2886_s17  ;;  %s236_s8 = scalar_lea.vmem [#allocation7], %s3689_s3 }
  0x55   : > { %s244_s9 = sshll.u32 %s236_s8, 4  ;;  %s3368_s15 = scalar_lea.hbm %s3734_s5, 24576  ;;  %s3737_s9 = int_to_ptr.vmem [resolvable:$true] %s244_s9 }
  0x56   : > { %p3369_p5 = scmp.ne.s32.totalorder %s3734_s5, %s3368_s15  ;;  %s3372_s6 = scalar_lea.hbm %s5482_s2, 49152 }
  0x57   : > { %p3373_p6 = scmp.lt.u32.totalorder %s3734_s5, %s5482_s2  ;;  %p3374_p0 = scmp.lt.u32.totalorder %s3372_s6, %s3368_s15 }
  0x58   : > { %p3370_p13 = pnand %p3369_p5, %p3633_p12  ;;  %p3376_p2 = scmp.lt.u32.totalorder %s3368_s15, %s3734_s5 }
  0x59   : > { %p3375_p4 = por %p3374_p0, %p3373_p6 }
  0x5a   : > { %p3371_p8 = pneg %p3370_p13 }
  0x5b   : > { %p3377_p10 = por %p3376_p2, %p3375_p4 }
  0x5d   : > { %p3378_p1 = pnand %p3377_p10, %p3371_p8 }
  0x5f   : > { %3381 = shalt.err (!%p3378_p1)
}
  0x60   : > { %s3382_s3 = scalar_lea.vmem %s3737_s9, 24576  ;;  %s3504_s20 = smov [#allocation7]  }
  0x61   : > { %p3383_p3 = scmp.ne.s32.totalorder %s3737_s9, %s3382_s3  ;;  %s3386_s28 = sshll.u32 %s3504_s20, 4  ;;  %s3387_s28 = int_to_ptr.vmem [resolvable:$false] %s3386_s28 }
  0x62   : > { %s3388_s30 = scalar_lea.vmem %s3387_s28, 49152  ;;  %p3389_p5 = scmp.lt.s32.totalorder %s3737_s9, %s3387_s28 }
  0x63   : > { %p3384_p9 = pnand %p3383_p3, %p3633_p12  ;;  %p3390_p13 = scmp.lt.s32.totalorder %s3388_s30, %s3382_s3 }
  0x65   : > { %p3385_p11 = pneg %p3384_p9  ;;  %p3391_p6 = por %p3390_p13, %p3389_p5 }
  0x67   : > { %p3392_p0 = pnand %p3391_p6, %p3385_p11 }
  0x69   : > { %3395 = shalt.err (!%p3392_p0)
}
  0x6a   : > { %2934 = dma.hbm_to_vmem [thread:$0]  (%p3633_p12), %s3734_s5, 24576, %s3737_s9, %s3702_s24, %s3502_s25, %s3502_s25, %s3503_s27  }
  0x6b PF: > { %p2871_p8 = scmp.ge.s32.totalorder %s3494_s22, 1  ;;  %p252_p4 = scmp.lt.s32.totalorder %s3494_s22, 5 }
  0x6d   : > { %p253_p2 = pnand %p2871_p8, %p252_p4 }
  0x6f   : > { %256 = sbr.rel (%p253_p2) target bundleno = 1244 (0x4dc), region = 32 }
  0x76   : > { %s3767_s8 = sand.u32 1, %s3470_s16  }
  0x77   : > { %s2923_s7 = smul.u32 768, %s3767_s8  ;;  %s259_s15 = scalar_lea.sflag [#allocation3], %s3767_s8 }
  0x79   : > { %s3773_s12 = scalar_lea.vmem [#allocation2], %s2923_s7 }
  0x7a   : > { %3441 = dma.done.wait (%p3621_p7), %s259_s15, 12288  }
  0x7b   : > { %3443 = vsyncadd (%p3621_p7), %s259_s15, 4294955008  ;;  %s267_s24 = sand.u32 1, %s3587_s23   ;;  %s269_s25 = sand.u32 1, %s3458_s13  }
  0x7c   : > { %s3781_s27 = smul.u32 1536, %s269_s25  ;;  %s268_s5 = scalar_lea.sflag [#allocation6], %s267_s24 }
  0x7d   : > { %p5623_p12 = scmp.ne.s32.totalorder %s5618_s10, 0 }
  0x7e   : > { %s3784_s9 = scalar_lea.vmem [#allocation5], %s3781_s27 }
  0x7f   : > { %3445 = dma.done.wait (%p5623_p12), %s268_s5, 49152  }
  0x80   : > { %3447 = vsyncadd (%p5623_p12), %s268_s5, 4294918144  ;;  %v560_v0 = vld [vmem:[%s3784_s9 + $0x8] sm:$0xff]  ;;  %v562_v1 = vld [vmem:[%s3784_s9 + $0x18] sm:$0xff]  ;;  %s4304_s23 = scalar_lea.vmem [#allocation7], %s3781_s27  ;;  %s5320_s4 = scalar_lea.vmem [#allocation8], %s2923_s7 }
  0x81   : > { %v559_v2 = vld [vmem:[%s3784_s9] sm:$0xff]  ;;  %v752_v3 = vpack.c.bf16 %v562_v1, %v560_v0  ;;  %v561_v4 = vld [vmem:[%s3784_s9 + $0x10] sm:$0xff]  ;;  %v564_v5 = vld [vmem:[%s3784_s9 + $0x28] sm:$0xff]  ;;  %s2678_s10 = scalar_lea.sflag [#allocation4], %s3767_s8 }
  0x82   : > { %v566_v6 = vld [vmem:[%s3784_s9 + $0x38] sm:$0xff]  ;;  %v751_v7 = vpack.c.bf16 %v561_v4, %v559_v2  ;;  %v563_v9 = vld [vmem:[%s3784_s9 + $0x20] sm:$0xff]  ;;  %v565_v10 = vld [vmem:[%s3784_s9 + $0x30] sm:$0xff] }
  0x83   : > { %v754_v8 = vpack.c.bf16 %v566_v6, %v564_v5  ;;  %847 = vmatprep.subr.bf16.mxu0 %v752_v3  ;;  %v568_v11 = vld [vmem:[%s3784_s9 + $0x48] sm:$0xff]  ;;  %v570_v12 = vld [vmem:[%s3784_s9 + $0x58] sm:$0xff]  ;;  %v623_v16 = vld [vmem:[%s3784_s9 + $0x200] sm:$0xff]  ;;  %v753_v18 = vpack.c.bf16 %v565_v10, %v563_v9 }
  0x84   : > { %848 = vmatpush1.bf16.xpose.msra.mxu0 %v751_v7  ;;  %v624_v13 = vld [vmem:[%s3784_s9 + $0x208] sm:$0xff]  ;;  %v626_v14 = vld [vmem:[%s3784_s9 + $0x218] sm:$0xff]  ;;  %v625_v17 = vld [vmem:[%s3784_s9 + $0x210] sm:$0xff]  ;;  %v756_v21 = vpack.c.bf16 %v570_v12, %v568_v11 }
  0x85   : > { %849 = vmatprep.subr.bf16.mxu0 %v754_v8  ;;  %v784_v15 = vpack.c.bf16 %v626_v14, %v624_v13  ;;  %v783_v19 = vpack.c.bf16 %v625_v17, %v623_v16  ;;  %v628_v20 = vld [vmem:[%s3784_s9 + $0x228] sm:$0xff]  ;;  %v630_v22 = vld [vmem:[%s3784_s9 + $0x238] sm:$0xff]  ;;  %v627_v24 = vld [vmem:[%s3784_s9 + $0x220] sm:$0xff] }
  0x86   : > { %v786_v23 = vpack.c.bf16 %v630_v22, %v628_v20  ;;  %v629_v25 = vld [vmem:[%s3784_s9 + $0x230] sm:$0xff]  ;;  %v632_v26 = vld [vmem:[%s3784_s9 + $0x248] sm:$0xff]  ;;  %v634_v27 = vld [vmem:[%s3784_s9 + $0x258] sm:$0xff] }
  0x87   : > { %960 = vmatprep.subr.bf16.mxu1 %v784_v15  ;;  %v567_v28 = vld [vmem:[%s3784_s9 + $0x40] sm:$0xff]  ;;  %v569_v29 = vld [vmem:[%s3784_s9 + $0x50] sm:$0xff]  ;;  %v572_v30 = vld [vmem:[%s3784_s9 + $0x68] sm:$0xff]  ;;  %v785_v32 = vpack.c.bf16 %v629_v25, %v627_v24  ;;  %v788_v33 = vpack.c.bf16 %v634_v27, %v632_v26 }
  0x88   : > { %961 = vmatpush1.bf16.xpose.msra.mxu1 %v783_v19  ;;  %v574_v31 = vld [vmem:[%s3784_s9 + $0x78] sm:$0xff]  ;;  %v755_v34 = vpack.c.bf16 %v569_v29, %v567_v28  ;;  %v631_v36 = vld [vmem:[%s3784_s9 + $0x240] sm:$0xff]  ;;  %v633_v37 = vld [vmem:[%s3784_s9 + $0x250] sm:$0xff] }
  0x89   : > { %962 = vmatprep.subr.bf16.mxu1 %v786_v23  ;;  %v758_v35 = vpack.c.bf16 %v574_v31, %v572_v30  ;;  %v636_v38 = vld [vmem:[%s3784_s9 + $0x268] sm:$0xff]  ;;  %v638_v39 = vld [vmem:[%s3784_s9 + $0x278] sm:$0xff]  ;;  %v571_v40 = vld [vmem:[%s3784_s9 + $0x60] sm:$0xff]  ;;  %v787_v44 = vpack.c.bf16 %v633_v37, %v631_v36 }
  0x8a   : > { %v573_v41 = vld [vmem:[%s3784_s9 + $0x70] sm:$0xff]  ;;  %v576_v42 = vld [vmem:[%s3784_s9 + $0x88] sm:$0xff]  ;;  %v578_v43 = vld [vmem:[%s3784_s9 + $0x98] sm:$0xff]  ;;  %v790_v45 = vpack.c.bf16 %v638_v39, %v636_v38 }
  0x8b   : > { %v757_v46 = vpack.c.bf16 %v573_v41, %v571_v40  ;;  %v760_v47 = vpack.c.bf16 %v578_v43, %v576_v42  ;;  %v635_v48 = vld [vmem:[%s3784_s9 + $0x260] sm:$0xff]  ;;  %v637_v49 = vld [vmem:[%s3784_s9 + $0x270] sm:$0xff]  ;;  %v640_v50 = vld [vmem:[%s3784_s9 + $0x288] sm:$0xff] }
  0x8c   : > { %850 = vmatpush1.bf16.xpose.msra.mxu0 %v753_v18  ;;  %v642_v51 = vld [vmem:[%s3784_s9 + $0x298] sm:$0xff]  ;;  %v575_v52 = vld [vmem:[%s3784_s9 + $0x80] sm:$0xff]  ;;  %v577_v53 = vld [vmem:[%s3784_s9 + $0x90] sm:$0xff]  ;;  %v789_v56 = vpack.c.bf16 %v637_v49, %v635_v48 }
  0x8d   : > { %851 = vmatprep.subr.bf16.mxu0 %v756_v21  ;;  %v580_v54 = vld [vmem:[%s3784_s9 + $0xa8] sm:$0xff]  ;;  %v582_v55 = vld [vmem:[%s3784_s9 + $0xb8] sm:$0xff]  ;;  %v792_v57 = vpack.c.bf16 %v642_v51, %v640_v50  ;;  %v759_v58 = vpack.c.bf16 %v577_v53, %v575_v52  ;;  %v639_v60 = vld [vmem:[%s3784_s9 + $0x280] sm:$0xff] }
  0x8e   : > { %v762_v59 = vpack.c.bf16 %v582_v55, %v580_v54  ;;  %v641_v61 = vld [vmem:[%s3784_s9 + $0x290] sm:$0xff]  ;;  %v579_v62 = vld [vmem:[%s3784_s9 + $0xa0] sm:$0xff]  ;;  %v644_v63 = vld [vmem:[%s3784_s9 + $0x2a8] sm:$0xff] }
  0x8f   : > { %v646_v0 = vld [vmem:[%s3784_s9 + $0x2b8] sm:$0xff]  ;;  %v581_v1 = vld [vmem:[%s3784_s9 + $0xb0] sm:$0xff]  ;;  %v320_v2 = vld [vmem:[%s3773_s12 + $0x8] sm:$0xff]  ;;  %v791_v6 = vpack.c.bf16 %v641_v61, %v639_v60 }
  0x90   : > { %963 = vmatpush1.bf16.xpose.msra.mxu1 %v785_v32  ;;  %v322_v3 = vld [vmem:[%s3773_s12 + $0x18] sm:$0xff]  ;;  %v584_v4 = vld [vmem:[%s3784_s9 + $0xc8] sm:$0xff]  ;;  %v416_v7 = vmul.f32 2.4494898, %v320_v2  ;;  %v794_v9 = vpack.c.bf16 %v646_v0, %v644_v63  ;;  %v761_v10 = vpack.c.bf16 %v581_v1, %v579_v62  ;;  %v643_v13 = vld [vmem:[%s3784_s9 + $0x2a0] sm:$0xff] }
  0x91   : > { %964 = vmatprep.subr.bf16.mxu1 %v788_v33  ;;  %v586_v5 = vld [vmem:[%s3784_s9 + $0xd8] sm:$0xff]  ;;  %v418_v8 = vmul.f32 2.4494898, %v322_v3  ;;  %v645_v14 = vld [vmem:[%s3784_s9 + $0x2b0] sm:$0xff]  ;;  %v648_v15 = vld [vmem:[%s3784_s9 + $0x2c8] sm:$0xff] }
  0x92   : > { %v764_v12 = vpack.c.bf16 %v586_v5, %v584_v4  ;;  %v650_v16 = vld [vmem:[%s3784_s9 + $0x2d8] sm:$0xff]  ;;  %v583_v17 = vld [vmem:[%s3784_s9 + $0xc0] sm:$0xff]  ;;  %v585_v18 = vld [vmem:[%s3784_s9 + $0xd0] sm:$0xff]  ;;  %v793_v21 = vpack.c.bf16 %v645_v14, %v643_v13 }
  0x93   : > { %v512_v11 = vpack.c.bf16 %v418_v8, %v416_v7  ;;  %v588_v19 = vld [vmem:[%s3784_s9 + $0xe8] sm:$0xff]  ;;  %v590_v20 = vld [vmem:[%s3784_s9 + $0xf8] sm:$0xff]  ;;  %v796_v22 = vpack.c.bf16 %v650_v16, %v648_v15  ;;  %v763_v23 = vpack.c.bf16 %v585_v18, %v583_v17  ;;  %v647_v25 = vld [vmem:[%s3784_s9 + $0x2c0] sm:$0xff] }
  0x94   : > { %852 = vmatpush1.bf16.xpose.msra.mxu0 %v755_v34  ;;  %v766_v24 = vpack.c.bf16 %v590_v20, %v588_v19  ;;  %v649_v26 = vld [vmem:[%s3784_s9 + $0x2d0] sm:$0xff]  ;;  %v652_v27 = vld [vmem:[%s3784_s9 + $0x2e8] sm:$0xff]  ;;  %v654_v28 = vld [vmem:[%s3784_s9 + $0x2f8] sm:$0xff] }
  0x95   : > { %853 = vmatprep.subr.bf16.mxu0 %v758_v35  ;;  %879 = vmatprep.mubr.bf16.mxu0 %v512_v11  ;;  %v587_v29 = vld [vmem:[%s3784_s9 + $0xe0] sm:$0xff]  ;;  %v589_v30 = vld [vmem:[%s3784_s9 + $0xf0] sm:$0xff]  ;;  %v592_v31 = vld [vmem:[%s3784_s9 + $0x108] sm:$0xff]  ;;  %v795_v33 = vpack.c.bf16 %v649_v26, %v647_v25  ;;  %v798_v34 = vpack.c.bf16 %v654_v28, %v652_v27 }
  0x96   : > { %v594_v32 = vld [vmem:[%s3784_s9 + $0x118] sm:$0xff]  ;;  %v765_v35 = vpack.c.bf16 %v589_v30, %v587_v29  ;;  %v352_v36 = vld [vmem:[%s3773_s12 + $0x108] sm:$0xff]  ;;  %v651_v41 = vld [vmem:[%s3784_s9 + $0x2e0] sm:$0xff] }
  0x97   : > { %v354_v37 = vld [vmem:[%s3773_s12 + $0x118] sm:$0xff]  ;;  %v768_v38 = vpack.c.bf16 %v594_v32, %v592_v31  ;;  %v448_v39 = vmul.f32 2.4494898, %v352_v36  ;;  %v653_v42 = vld [vmem:[%s3784_s9 + $0x2f0] sm:$0xff]  ;;  %v596_v48 = vld [vmem:[%s3784_s9 + $0x128] sm:$0xff] }
  0x98   : > { %965 = vmatpush1.bf16.xpose.msra.mxu1 %v787_v44  ;;  %v450_v40 = vmul.f32 2.4494898, %v354_v37  ;;  %v656_v44 = vld [vmem:[%s3784_s9 + $0x308] sm:$0xff]  ;;  %v598_v49 = vld [vmem:[%s3784_s9 + $0x138] sm:$0xff]  ;;  %v797_v50 = vpack.c.bf16 %v653_v42, %v651_v41  ;;  %v655_v54 = vld [vmem:[%s3784_s9 + $0x300] sm:$0xff] }
  0x99   : > { %966 = vmatprep.subr.bf16.mxu1 %v790_v45  ;;  %v658_v45 = vld [vmem:[%s3784_s9 + $0x318] sm:$0xff]  ;;  %v770_v53 = vpack.c.bf16 %v598_v49, %v596_v48  ;;  %v657_v55 = vld [vmem:[%s3784_s9 + $0x310] sm:$0xff]  ;;  %v600_v60 = vld [vmem:[%s3784_s9 + $0x148] sm:$0xff] }
  0x9a   : > { %v528_v43 = vpack.c.bf16 %v450_v40, %v448_v39  ;;  %v800_v51 = vpack.c.bf16 %v658_v45, %v656_v44  ;;  %v602_v61 = vld [vmem:[%s3784_s9 + $0x158] sm:$0xff]  ;;  %v799_v62 = vpack.c.bf16 %v657_v55, %v655_v54  ;;  %v659_v2 = vld [vmem:[%s3784_s9 + $0x320] sm:$0xff]  ;;  %v661_v3 = vld [vmem:[%s3784_s9 + $0x330] sm:$0xff] }
  0x9b   : > { %v772_v1 = vpack.c.bf16 %v602_v61, %v600_v60  ;;  %v664_v4 = vld [vmem:[%s3784_s9 + $0x348] sm:$0xff]  ;;  %v666_v5 = vld [vmem:[%s3784_s9 + $0x358] sm:$0xff]  ;;  %v601_v7 = vld [vmem:[%s3784_s9 + $0x150] sm:$0xff] }
  0x9c   : > { %854 = vmatpush1.bf16.xpose.msra.mxu0 %v757_v46  ;;  %v591_v46 = vld [vmem:[%s3784_s9 + $0x100] sm:$0xff]  ;;  %992 = vmatprep.mubr.bf16.mxu1 %v528_v43  ;;  %v604_v8 = vld [vmem:[%s3784_s9 + $0x168] sm:$0xff]  ;;  %v804_v11 = vpack.c.bf16 %v666_v5, %v664_v4  ;;  %v665_v15 = vld [vmem:[%s3784_s9 + $0x350] sm:$0xff] }
  0x9d   : > { %855 = vmatprep.subr.bf16.mxu0 %v760_v47  ;;  %v593_v47 = vld [vmem:[%s3784_s9 + $0x110] sm:$0xff]  ;;  %v663_v14 = vld [vmem:[%s3784_s9 + $0x340] sm:$0xff]  ;;  %v668_v16 = vld [vmem:[%s3784_s9 + $0x368] sm:$0xff] }
  0x9e   : > { %v767_v52 = vpack.c.bf16 %v593_v47, %v591_v46  ;;  %v670_v17 = vld [vmem:[%s3784_s9 + $0x378] sm:$0xff]  ;;  %v603_v18 = vld [vmem:[%s3784_s9 + $0x160] sm:$0xff]  ;;  %v605_v19 = vld [vmem:[%s3784_s9 + $0x170] sm:$0xff] }
  0x9f   : > { %v608_v20 = vld [vmem:[%s3784_s9 + $0x188] sm:$0xff]  ;;  %v667_v26 = vld [vmem:[%s3784_s9 + $0x360] sm:$0xff]  ;;  %v669_v27 = vld [vmem:[%s3784_s9 + $0x370] sm:$0xff] }
  0xa0   : > { %967 = vmatpush1.bf16.xpose.msra.mxu1 %v789_v56  ;;  %v660_v56 = vld [vmem:[%s3784_s9 + $0x328] sm:$0xff]  ;;  %v674_v29 = vld [vmem:[%s3784_s9 + $0x398] sm:$0xff]  ;;  %v607_v30 = vld [vmem:[%s3784_s9 + $0x180] sm:$0xff] }
  0xa1   : > { %968 = vmatprep.subr.bf16.mxu1 %v792_v57  ;;  %v662_v57 = vld [vmem:[%s3784_s9 + $0x338] sm:$0xff]  ;;  %v672_v28 = vld [vmem:[%s3784_s9 + $0x388] sm:$0xff]  ;;  %v609_v31 = vld [vmem:[%s3784_s9 + $0x190] sm:$0xff] }
  0xa2   : > { %v802_v63 = vpack.c.bf16 %v662_v57, %v660_v56  ;;  %v612_v32 = vld [vmem:[%s3784_s9 + $0x1a8] sm:$0xff]  ;;  %v775_v36 = vpack.c.bf16 %v609_v31, %v607_v30  ;;  %v673_v39 = vld [vmem:[%s3784_s9 + $0x390] sm:$0xff]  ;;  %v678_v41 = vld [vmem:[%s3784_s9 + $0x3b8] sm:$0xff] }
  0xa3   : > { %v676_v40 = vld [vmem:[%s3784_s9 + $0x3a8] sm:$0xff]  ;;  %v611_v42 = vld [vmem:[%s3784_s9 + $0x1a0] sm:$0xff]  ;;  %v613_v43 = vld [vmem:[%s3784_s9 + $0x1b0] sm:$0xff] }
  0xa4   : > { %856 = vmatpush1.bf16.xpose.msra.mxu0 %v759_v58  ;;  %v595_v58 = vld [vmem:[%s3784_s9 + $0x120] sm:$0xff]  ;;  %v616_v44 = vld [vmem:[%s3784_s9 + $0x1c8] sm:$0xff]  ;;  %v618_v45 = vld [vmem:[%s3784_s9 + $0x1d8] sm:$0xff]  ;;  %v810_v47 = vpack.c.bf16 %v678_v41, %v676_v40  ;;  %v777_v48 = vpack.c.bf16 %v613_v43, %v611_v42 }
  0xa5   : > { %857 = vmatprep.subr.bf16.mxu0 %v762_v59  ;;  %v597_v59 = vld [vmem:[%s3784_s9 + $0x130] sm:$0xff]  ;;  %v780_v49 = vpack.c.bf16 %v618_v45, %v616_v44  ;;  %v615_v54 = vld [vmem:[%s3784_s9 + $0x1c0] sm:$0xff]  ;;  %v620_v56 = vld [vmem:[%s3784_s9 + $0x1e8] sm:$0xff] }
  0xa6   : > { %v769_v0 = vpack.c.bf16 %v597_v59, %v595_v58  ;;  %v617_v55 = vld [vmem:[%s3784_s9 + $0x1d0] sm:$0xff]  ;;  %v622_v57 = vld [vmem:[%s3784_s9 + $0x1f8] sm:$0xff]  ;;  %v688_v4 = vld [vmem:[%s3784_s9 + $0x408] sm:$0xff] }
  0xa7   : > { %v779_v60 = vpack.c.bf16 %v617_v55, %v615_v54  ;;  %v782_v61 = vpack.c.bf16 %v622_v57, %v620_v56  ;;  %v690_v5 = vld [vmem:[%s3784_s9 + $0x418] sm:$0xff]  ;;  %v323_v31 = vld [vmem:[%s3773_s12 + $0x20] sm:$0xff]  ;;  %v360_v54 = vld [vmem:[%s3773_s12 + $0x148] sm:$0xff] }
  0xa8   : > { %969 = vmatpush1.bf16.xpose.msra.mxu1 %v791_v6  ;;  %v599_v6 = vld [vmem:[%s3784_s9 + $0x140] sm:$0xff]  ;;  %v419_v41 = vmul.f32 2.4494898, %v323_v31  ;;  %v362_v55 = vld [vmem:[%s3773_s12 + $0x158] sm:$0xff] }
  0xa9   : > { %970 = vmatprep.subr.bf16.mxu1 %v794_v9  ;;  %v606_v9 = vld [vmem:[%s3784_s9 + $0x178] sm:$0xff]  ;;  %v691_v45 = vld [vmem:[%s3784_s9 + $0x420] sm:$0xff] }
  0xaa   : > { %v774_v13 = vpack.c.bf16 %v606_v9, %v604_v8  ;;  %v319_v9 = vld [vmem:[%s3773_s12] sm:$0xff] }
  0xab   : > { %v327_v57 = vld [vmem:[%s3773_s12 + $0x40] sm:$0xff] }
  0xac   : > { %858 = vmatpush1.bf16.xpose.msra.mxu0 %v761_v10  ;;  %v801_v10 = vpack.c.bf16 %v661_v3, %v659_v2  ;;  %v619_v2 = vld [vmem:[%s3784_s9 + $0x1e0] sm:$0xff]  ;;  %v621_v3 = vld [vmem:[%s3784_s9 + $0x1f0] sm:$0xff] }
  0xad   : > { %859 = vmatprep.subr.bf16.mxu0 %v764_v12  ;;  %v771_v12 = vpack.c.bf16 %v601_v7, %v599_v6  ;;  %v781_v8 = vpack.c.bf16 %v621_v3, %v619_v2  ;;  %v458_v2 = vmul.f32 2.4494898, %v362_v55  ;;  %v423_v3 = vmul.f32 2.4494898, %v327_v57 }
  0xb0   : > { %971 = vmatpush1.bf16.xpose.msra.mxu1 %v793_v21  ;;  %v610_v21 = vld [vmem:[%s3784_s9 + $0x198] sm:$0xff] }
  0xb1   : > { %972 = vmatprep.subr.bf16.mxu1 %v796_v22  ;;  %v803_v22 = vpack.c.bf16 %v665_v15, %v663_v14  ;;  %v776_v25 = vpack.c.bf16 %v610_v21, %v608_v20  ;;  %v415_v14 = vmul.f32 2.4494898, %v319_v9  ;;  %v687_v20 = vld [vmem:[%s3784_s9 + $0x400] sm:$0xff]  ;;  %v689_v21 = vld [vmem:[%s3784_s9 + $0x410] sm:$0xff]  ;;  %v700_v9 = vld [vmem:[%s3784_s9 + $0x468] sm:$0xff] }
  0xb4   : > { %860 = vmatpush1.bf16.xpose.msra.mxu0 %v763_v23  ;;  %v806_v23 = vpack.c.bf16 %v670_v17, %v668_v16  ;;  %v683_v16 = vld [vmem:[%s3784_s9 + $0x3e0] sm:$0xff]  ;;  %v685_v17 = vld [vmem:[%s3784_s9 + $0x3f0] sm:$0xff] }
  0xb5   : > { %861 = vmatprep.subr.bf16.mxu0 %v766_v24  ;;  %v773_v24 = vpack.c.bf16 %v605_v19, %v603_v18 }
  0xb8   : > { %973 = vmatpush1.bf16.xpose.msra.mxu1 %v795_v33  ;;  %v614_v33 = vld [vmem:[%s3784_s9 + $0x1b8] sm:$0xff] }
  0xb9   : > { %974 = vmatprep.subr.bf16.mxu1 %v798_v34  ;;  %v805_v34 = vpack.c.bf16 %v669_v27, %v667_v26  ;;  %v778_v37 = vpack.c.bf16 %v614_v33, %v612_v32  ;;  %v353_v26 = vld [vmem:[%s3773_s12 + $0x110] sm:$0xff]  ;;  %v815_v33 = vpack.c.bf16 %v689_v21, %v687_v20 }
  0xba   : > { %v325_v32 = vld [vmem:[%s3773_s12 + $0x30] sm:$0xff] }
  0xbb   : > { %v421_v42 = vmul.f32 2.4494898, %v325_v32  ;;  %v333_v20 = vld [vmem:[%s3773_s12 + $0x70] sm:$0xff] }
  0xbc   : > { %862 = vmatpush1.bf16.xpose.msra.mxu0 %v765_v35  ;;  %v808_v35 = vpack.c.bf16 %v674_v29, %v672_v28  ;;  %v356_v28 = vld [vmem:[%s3773_s12 + $0x128] sm:$0xff]  ;;  %v358_v29 = vld [vmem:[%s3773_s12 + $0x138] sm:$0xff] }
  0xbd   : > { %863 = vmatprep.subr.bf16.mxu0 %v768_v38  ;;  %v671_v38 = vld [vmem:[%s3784_s9 + $0x380] sm:$0xff]  ;;  %v454_v40 = vmul.f32 2.4494898, %v358_v29 }
  0xbe   : > { %v807_v46 = vpack.c.bf16 %v673_v39, %v671_v38  ;;  %v449_v38 = vmul.f32 2.4494898, %v353_v26  ;;  %v452_v39 = vmul.f32 2.4494898, %v356_v28 }
  0xc0   : > { %975 = vmatpush1.bf16.xpose.msra.mxu1 %v797_v50  ;;  %v675_v50 = vld [vmem:[%s3784_s9 + $0x3a0] sm:$0xff] }
  0xc1   : > { %976 = vmatprep.subr.bf16.mxu1 %v800_v51  ;;  %v677_v51 = vld [vmem:[%s3784_s9 + $0x3b0] sm:$0xff] }
  0xc2   : > { %v809_v58 = vpack.c.bf16 %v677_v51, %v675_v50  ;;  %v530_v50 = vpack.c.bf16 %v454_v40, %v452_v39  ;;  %v355_v51 = vld [vmem:[%s3773_s12 + $0x120] sm:$0xff]  ;;  %v365_v40 = vld [vmem:[%s3773_s12 + $0x170] sm:$0xff] }
  0xc3   : > { %v363_v39 = vld [vmem:[%s3773_s12 + $0x160] sm:$0xff] }
  0xc4   : > { %864 = vmatpush1.bf16.xpose.msra.mxu0 %v767_v52  ;;  %v680_v52 = vld [vmem:[%s3784_s9 + $0x3c8] sm:$0xff] }
  0xc5   : > { %865 = vmatprep.subr.bf16.mxu0 %v770_v53  ;;  %v682_v53 = vld [vmem:[%s3784_s9 + $0x3d8] sm:$0xff] }
  0xc6   : > { %v812_v59 = vpack.c.bf16 %v682_v53, %v680_v52  ;;  %v357_v52 = vld [vmem:[%s3773_s12 + $0x130] sm:$0xff]  ;;  %v513_v53 = vpack.c.bf16 %v421_v42, %v419_v41  ;;  %v368_v42 = vld [vmem:[%s3773_s12 + $0x188] sm:$0xff] }
  0xc8   : > { %977 = vmatpush1.bf16.xpose.msra.mxu1 %v799_v62  ;;  %v679_v62 = vld [vmem:[%s3784_s9 + $0x3c0] sm:$0xff] }
  0xc9   : > { %978 = vmatprep.subr.bf16.mxu1 %v802_v63  ;;  %v681_v63 = vld [vmem:[%s3784_s9 + $0x3d0] sm:$0xff] }
  0xca   : > { %v811_v6 = vpack.c.bf16 %v681_v63, %v679_v62  ;;  %v451_v63 = vmul.f32 2.4494898, %v355_v51  ;;  %v459_v51 = vmul.f32 2.4494898, %v363_v39 }
  0xcc   : > { %866 = vmatpush1.bf16.xpose.msra.mxu0 %v769_v0  ;;  %v684_v0 = vld [vmem:[%s3784_s9 + $0x3e8] sm:$0xff] }
  0xcd   : > { %867 = vmatprep.subr.bf16.mxu0 %v772_v1  ;;  %v686_v1 = vld [vmem:[%s3784_s9 + $0x3f8] sm:$0xff] }
  0xce   : > { %v814_v7 = vpack.c.bf16 %v686_v1, %v684_v0  ;;  %v453_v0 = vmul.f32 2.4494898, %v357_v52  ;;  %v456_v1 = vmul.f32 2.4494898, %v360_v54  ;;  %v461_v52 = vmul.f32 2.4494898, %v365_v40 }
  0xd0   : > { %979 = vmatpush1.bf16.xpose.msra.mxu1 %v801_v10  ;;  %v321_v10 = vld [vmem:[%s3773_s12 + $0x10] sm:$0xff] }
  0xd1   : > { %980 = vmatprep.subr.bf16.mxu1 %v804_v11  ;;  %v324_v11 = vld [vmem:[%s3773_s12 + $0x28] sm:$0xff]  ;;  %v417_v15 = vmul.f32 2.4494898, %v321_v10  ;;  %v529_v10 = vpack.c.bf16 %v453_v0, %v451_v63  ;;  %v710_v63 = vld [vmem:[%s3784_s9 + $0x4b8] sm:$0xff] }
  0xd2   : > { %v420_v18 = vmul.f32 2.4494898, %v324_v11  ;;  %v702_v11 = vld [vmem:[%s3784_s9 + $0x478] sm:$0xff] }
  0xd3   : > { %v511_v27 = vpack.c.bf16 %v417_v15, %v415_v14  ;;  %v361_v14 = vld [vmem:[%s3773_s12 + $0x150] sm:$0xff] }
  0xd4   : > { %868 = vmatpush1.bf16.xpose.msra.mxu0 %v771_v12  ;;  %v326_v12 = vld [vmem:[%s3773_s12 + $0x38] sm:$0xff]  ;;  %v457_v26 = vmul.f32 2.4494898, %v361_v14 }
  0xd5   : > { %869 = vmatprep.subr.bf16.mxu0 %v774_v13  ;;  %v816_v13 = vpack.c.bf16 %v690_v5, %v688_v4  ;;  %v422_v19 = vmul.f32 2.4494898, %v326_v12  ;;  %v532_v12 = vpack.c.bf16 %v458_v2, %v456_v1  ;;  %v367_v1 = vld [vmem:[%s3773_s12 + $0x180] sm:$0xff]  ;;  %v369_v2 = vld [vmem:[%s3773_s12 + $0x190] sm:$0xff] }
  0xd6   : > { %v465_v14 = vmul.f32 2.4494898, %v369_v2  ;;  %v386_v2 = vld [vmem:[%s3773_s12 + $0x218] sm:$0xff] }
  0xd7   : > { %v514_v30 = vpack.c.bf16 %v422_v19, %v420_v18  ;;  %v331_v19 = vld [vmem:[%s3773_s12 + $0x60] sm:$0xff] }
  0xd8   : > { %981 = vmatpush1.bf16.xpose.msra.mxu1 %v803_v22  ;;  %v692_v22 = vld [vmem:[%s3784_s9 + $0x428] sm:$0xff]  ;;  %v427_v29 = vmul.f32 2.4494898, %v331_v19 }
  0xd9   : > { %982 = vmatprep.subr.bf16.mxu1 %v806_v23  ;;  %v694_v23 = vld [vmem:[%s3784_s9 + $0x438] sm:$0xff] }
  0xdc   : > { %870 = vmatpush1.bf16.xpose.msra.mxu0 %v773_v24  ;;  %v813_v24 = vpack.c.bf16 %v685_v17, %v683_v16  ;;  %v364_v16 = vld [vmem:[%s3773_s12 + $0x168] sm:$0xff]  ;;  %v366_v17 = vld [vmem:[%s3773_s12 + $0x178] sm:$0xff] }
  0xdd   : > { %871 = vmatprep.subr.bf16.mxu0 %v776_v25  ;;  %v351_v25 = vld [vmem:[%s3773_s12 + $0x100] sm:$0xff]  ;;  %v462_v28 = vmul.f32 2.4494898, %v366_v17 }
  0xe0   : > { %983 = vmatpush1.bf16.xpose.msra.mxu1 %v805_v34  ;;  %v328_v34 = vld [vmem:[%s3773_s12 + $0x48] sm:$0xff] }
  0xe1   : > { %984 = vmatprep.subr.bf16.mxu1 %v808_v35  ;;  %v330_v35 = vld [vmem:[%s3773_s12 + $0x58] sm:$0xff]  ;;  %v424_v43 = vmul.f32 2.4494898, %v328_v34  ;;  %v701_v34 = vld [vmem:[%s3784_s9 + $0x470] sm:$0xff] }
  0xe2   : > { %v426_v44 = vmul.f32 2.4494898, %v330_v35  ;;  %v704_v35 = vld [vmem:[%s3784_s9 + $0x488] sm:$0xff] }
  0xe4   : > { %872 = vmatpush1.bf16.xpose.msra.mxu0 %v775_v36  ;;  %v818_v36 = vpack.c.bf16 %v694_v23, %v692_v22  ;;  %v516_v56 = vpack.c.bf16 %v426_v44, %v424_v43  ;;  %v336_v22 = vld [vmem:[%s3773_s12 + $0x88] sm:$0xff]  ;;  %v338_v23 = vld [vmem:[%s3773_s12 + $0x98] sm:$0xff] }
  0xe5   : > { %873 = vmatprep.subr.bf16.mxu0 %v778_v37  ;;  %v447_v37 = vmul.f32 2.4494898, %v351_v25  ;;  %v432_v31 = vmul.f32 2.4494898, %v336_v22  ;;  %v434_v32 = vmul.f32 2.4494898, %v338_v23 }
  0xe6   : > { %v370_v43 = vld [vmem:[%s3773_s12 + $0x198] sm:$0xff]  ;;  %v709_v22 = vld [vmem:[%s3784_s9 + $0x4b0] sm:$0xff]  ;;  %v712_v23 = vld [vmem:[%s3784_s9 + $0x4c8] sm:$0xff] }
  0xe7   : > { %v520_v44 = vpack.c.bf16 %v434_v32, %v432_v31  ;;  %v466_v54 = vmul.f32 2.4494898, %v370_v43  ;;  %v378_v31 = vld [vmem:[%s3773_s12 + $0x1d8] sm:$0xff] }
  0xe8   : > { %985 = vmatpush1.bf16.xpose.msra.mxu1 %v807_v46  ;;  %v693_v46 = vld [vmem:[%s3784_s9 + $0x430] sm:$0xff] }
  0xe9   : > { %986 = vmatprep.subr.bf16.mxu1 %v810_v47  ;;  %v696_v47 = vld [vmem:[%s3784_s9 + $0x448] sm:$0xff] }
  0xec   : > { %874 = vmatpush1.bf16.xpose.msra.mxu0 %v777_v48  ;;  %v527_v48 = vpack.c.bf16 %v449_v38, %v447_v37  ;;  %v706_v37 = vld [vmem:[%s3784_s9 + $0x498] sm:$0xff] }
  0xed   : > { %875 = vmatprep.subr.bf16.mxu0 %v780_v49  ;;  %v698_v49 = vld [vmem:[%s3784_s9 + $0x458] sm:$0xff] }
  0xee   : > { %v820_v62 = vpack.c.bf16 %v698_v49, %v696_v47  ;;  %v342_v49 = vld [vmem:[%s3773_s12 + $0xb8] sm:$0xff] }
  0xf0   : > { %987 = vmatpush1.bf16.xpose.msra.mxu1 %v809_v58  ;;  %v329_v58 = vld [vmem:[%s3773_s12 + $0x50] sm:$0xff] }
  0xf1   : > { %988 = vmatprep.subr.bf16.mxu1 %v812_v59  ;;  %v817_v59 = vpack.c.bf16 %v693_v46, %v691_v45  ;;  %v425_v4 = vmul.f32 2.4494898, %v329_v58  ;;  %v335_v45 = vld [vmem:[%s3773_s12 + $0x80] sm:$0xff]  ;;  %v337_v46 = vld [vmem:[%s3773_s12 + $0x90] sm:$0xff]  ;;  %v438_v58 = vmul.f32 2.4494898, %v342_v49 }
  0xf2   : > { %v431_v55 = vmul.f32 2.4494898, %v335_v45  ;;  %v716_v49 = vld [vmem:[%s3784_s9 + $0x4e8] sm:$0xff] }
  0xf3   : > { %v515_v15 = vpack.c.bf16 %v425_v4, %v423_v3  ;;  %v372_v4 = vld [vmem:[%s3773_s12 + $0x1a8] sm:$0xff] }
  0xf4   : > { %876 = vmatpush1.bf16.xpose.msra.mxu0 %v779_v60  ;;  %v332_v60 = vld [vmem:[%s3773_s12 + $0x68] sm:$0xff] }
  0xf5   : > { %877 = vmatprep.subr.bf16.mxu0 %v782_v61  ;;  %v334_v61 = vld [vmem:[%s3773_s12 + $0x78] sm:$0xff]  ;;  %v428_v5 = vmul.f32 2.4494898, %v332_v60  ;;  %v705_v60 = vld [vmem:[%s3784_s9 + $0x490] sm:$0xff] }
  0xf8   : > { %989 = vmatpush1.bf16.xpose.msra.mxu1 %v811_v6  ;;  %v430_v6 = vmul.f32 2.4494898, %v334_v61  ;;  %v708_v61 = vld [vmem:[%s3784_s9 + $0x4a8] sm:$0xff] }
  0xf9   : > { %990 = vmatprep.subr.bf16.mxu1 %v814_v7  ;;  %v695_v7 = vld [vmem:[%s3784_s9 + $0x440] sm:$0xff] }
  0xfa   : > { %v518_v18 = vpack.c.bf16 %v430_v6, %v428_v5  ;;  %v374_v5 = vld [vmem:[%s3773_s12 + $0x1b8] sm:$0xff] }
  0xfc   : > { %878 = vmatpush1.bf16.xpose.msra.mxu0 %v781_v8  ;;  %v697_v8 = vld [vmem:[%s3784_s9 + $0x450] sm:$0xff] }
  0xfd   : > { %1073 = vmatprep.subr.bf16.mxu0 %v816_v13  ;;  %v359_v13 = vld [vmem:[%s3773_s12 + $0x140] sm:$0xff]  ;;  %v819_v21 = vpack.c.bf16 %v697_v8, %v695_v7  ;;  %v341_v8 = vld [vmem:[%s3773_s12 + $0xb0] sm:$0xff] }
  0xfe   : > { %v455_v25 = vmul.f32 2.4494898, %v359_v13  ;;  %v339_v7 = vld [vmem:[%s3773_s12 + $0xa0] sm:$0xff]  ;;  %v463_v13 = vmul.f32 2.4494898, %v367_v1  ;;  %v384_v1 = vld [vmem:[%s3773_s12 + $0x208] sm:$0xff] }
  0xff   : > { %v435_v17 = vmul.f32 2.4494898, %v339_v7  ;;  %v480_v7 = vmul.f32 2.4494898, %v384_v1 }
 0x100   : > { %991 = vmatpush1.bf16.xpose.msra.mxu1 %v813_v24  ;;  %v822_v24 = vpack.c.bf16 %v702_v11, %v700_v9  ;;  %v346_v11 = vld [vmem:[%s3773_s12 + $0xd8] sm:$0xff] }
 0x103   : > { %880 = vmatmul.mubr.bf16.vlgmr.msra.gmra.mrb[0].mxu0 %v511_v27  ;;  %v460_v27 = vmul.f32 2.4494898, %v364_v16  ;;  %v470_v16 = vmul.f32 2.4494898, %v374_v5 }
 0x104   : > { %889 = vmatprep.mubr.bf16.mxu0 %v514_v30  ;;  %1074 = vmatpush1.bf16.xpose.msra.mxu0 %v815_v33  ;;  %v429_v30 = vmul.f32 2.4494898, %v333_v20  ;;  %v699_v33 = vld [vmem:[%s3784_s9 + $0x460] sm:$0xff]  ;;  %v442_v20 = vmul.f32 2.4494898, %v346_v11  ;;  %v720_v11 = vld [vmem:[%s3784_s9 + $0x508] sm:$0xff] }
 0x105   : > { %1075 = vmatprep.subr.bf16.mxu0 %v818_v36  ;;  %v531_v36 = vpack.c.bf16 %v457_v26, %v455_v25  ;;  %v534_v38 = vpack.c.bf16 %v462_v28, %v460_v27  ;;  %v821_v47 = vpack.c.bf16 %v701_v34, %v699_v33  ;;  %v714_v25 = vld [vmem:[%s3784_s9 + $0x4d8] sm:$0xff]  ;;  %v371_v27 = vld [vmem:[%s3773_s12 + $0x1a0] sm:$0xff]  ;;  %v373_v28 = vld [vmem:[%s3773_s12 + $0x1b0] sm:$0xff] }
 0x106   : > { %v517_v41 = vpack.c.bf16 %v429_v30, %v427_v29  ;;  %v376_v30 = vld [vmem:[%s3773_s12 + $0x1c8] sm:$0xff]  ;;  %v343_v33 = vld [vmem:[%s3773_s12 + $0xc0] sm:$0xff]  ;;  %v345_v34 = vld [vmem:[%s3773_s12 + $0xd0] sm:$0xff]  ;;  %v467_v39 = vmul.f32 2.4494898, %v371_v27 }
 0x107   : > { %993 = vmatmul.mubr.bf16.vlgmr.msra.gmra.mrb[0].mxu1 %v527_v48  ;;  %v340_v48 = vld [vmem:[%s3773_s12 + $0xa8] sm:$0xff]  ;;  %v469_v40 = vmul.f32 2.4494898, %v373_v28  ;;  %v439_v43 = vmul.f32 2.4494898, %v343_v33  ;;  %v726_v27 = vld [vmem:[%s3784_s9 + $0x538] sm:$0xff] }
 0x108   : > { %1002 = vmatprep.mubr.bf16.mxu1 %v530_v50  ;;  %v824_v50 = vpack.c.bf16 %v706_v37, %v704_v35  ;;  %v436_v57 = vmul.f32 2.4494898, %v340_v48  ;;  %v350_v37 = vld [vmem:[%s3773_s12 + $0xf8] sm:$0xff]  ;;  %v713_v48 = vld [vmem:[%s3784_s9 + $0x4d0] sm:$0xff] }
 0x109   : > { %v730_v33 = vld [vmem:[%s3784_s9 + $0x558] sm:$0xff] }
 0x10a   : > { %v522_v6 = vpack.c.bf16 %v438_v58, %v436_v57  ;;  %v382_v57 = vld [vmem:[%s3773_s12 + $0x1f8] sm:$0xff] }
 0x10b   : > { %890 = vmatmul.mubr.bf16.gmra.mrb[4].mxu0 %v513_v53  ;;  %v464_v53 = vmul.f32 2.4494898, %v368_v42  ;;  %v474_v42 = vmul.f32 2.4494898, %v378_v31  ;;  %v725_v31 = vld [vmem:[%s3784_s9 + $0x530] sm:$0xff] }
 0x10c   : > { %899 = vmatprep.mubr.bf16.mxu0 %v516_v56  ;;  %1076 = vmatpush1.bf16.xpose.msra.mxu0 %v817_v59  ;;  %v433_v56 = vmul.f32 2.4494898, %v337_v46  ;;  %v703_v59 = vld [vmem:[%s3784_s9 + $0x480] sm:$0xff]  ;;  %v446_v46 = vmul.f32 2.4494898, %v350_v37  ;;  %v729_v37 = vld [vmem:[%s3784_s9 + $0x550] sm:$0xff] }
 0x10d   : > { %1077 = vmatprep.subr.bf16.mxu0 %v820_v62  ;;  %v533_v62 = vpack.c.bf16 %v461_v52, %v459_v51  ;;  %v536_v0 = vpack.c.bf16 %v466_v54, %v464_v53  ;;  %v823_v9 = vpack.c.bf16 %v705_v60, %v703_v59  ;;  %v718_v51 = vld [vmem:[%s3784_s9 + $0x4f8] sm:$0xff]  ;;  %v375_v53 = vld [vmem:[%s3773_s12 + $0x1c0] sm:$0xff]  ;;  %v377_v54 = vld [vmem:[%s3773_s12 + $0x1d0] sm:$0xff] }
 0x10e   : > { %v519_v3 = vpack.c.bf16 %v433_v56, %v431_v55  ;;  %v380_v56 = vld [vmem:[%s3773_s12 + $0x1e8] sm:$0xff]  ;;  %v347_v59 = vld [vmem:[%s3773_s12 + $0xe0] sm:$0xff]  ;;  %v349_v60 = vld [vmem:[%s3773_s12 + $0xf0] sm:$0xff] }
 0x10f   : > { %1003 = vmatmul.mubr.bf16.gmra.mrb[4].mxu1 %v529_v10  ;;  %v344_v10 = vld [vmem:[%s3773_s12 + $0xc8] sm:$0xff]  ;;  %v443_v5 = vmul.f32 2.4494898, %v347_v59 }
 0x110   : > { %1012 = vmatprep.mubr.bf16.mxu1 %v532_v12  ;;  %v826_v12 = vpack.c.bf16 %v710_v63, %v708_v61  ;;  %v440_v19 = vmul.f32 2.4494898, %v344_v10  ;;  %v471_v63 = vmul.f32 2.4494898, %v375_v53  ;;  %v717_v10 = vld [vmem:[%s3784_s9 + $0x4f0] sm:$0xff] }
 0x112   : > { %v524_v32 = vpack.c.bf16 %v442_v20, %v440_v19 }
 0x113   : > { %900 = vmatmul.mubr.bf16.gmra.mrb[8].mxu0 %v515_v15  ;;  %v468_v15 = vmul.f32 2.4494898, %v372_v4  ;;  %v478_v4 = vmul.f32 2.4494898, %v382_v57  ;;  %v746_v57 = vld [vmem:[%s3784_s9 + $0x5d8] sm:$0xff] }
 0x114   : > { %909 = vmatprep.mubr.bf16.mxu0 %v518_v18  ;;  %1078 = vmatpush1.bf16.xpose.msra.mxu0 %v819_v21  ;;  %v437_v18 = vmul.f32 2.4494898, %v341_v8  ;;  %v707_v21 = vld [vmem:[%s3784_s9 + $0x4a0] sm:$0xff]  ;;  %v482_v8 = vmul.f32 2.4494898, %v386_v2 }
 0x115   : > { %1079 = vmatprep.subr.bf16.mxu0 %v822_v24  ;;  %v535_v24 = vpack.c.bf16 %v465_v14, %v463_v13  ;;  %v538_v26 = vpack.c.bf16 %v470_v16, %v468_v15  ;;  %v825_v35 = vpack.c.bf16 %v709_v22, %v707_v21  ;;  %v722_v13 = vld [vmem:[%s3784_s9 + $0x518] sm:$0xff]  ;;  %v379_v15 = vld [vmem:[%s3773_s12 + $0x1e0] sm:$0xff]  ;;  %v381_v16 = vld [vmem:[%s3773_s12 + $0x1f0] sm:$0xff] }
 0x116   : > { %v521_v29 = vpack.c.bf16 %v437_v18, %v435_v17  ;;  %v544_v19 = vpack.c.bf16 %v482_v8, %v480_v7  ;;  %v832_v20 = vpack.c.bf16 %v722_v13, %v720_v11  ;;  %v475_v21 = vmul.f32 2.4494898, %v379_v15  ;;  %v747_v2 = vld [vmem:[%s3784_s9 + $0x5e0] sm:$0xff]  ;;  %v388_v7 = vld [vmem:[%s3773_s12 + $0x228] sm:$0xff]  ;;  %v390_v8 = vld [vmem:[%s3773_s12 + $0x238] sm:$0xff] }
 0x117   : > { %1013 = vmatmul.mubr.bf16.gmra.mrb[8].mxu1 %v531_v36  ;;  %v348_v36 = vld [vmem:[%s3773_s12 + $0xe8] sm:$0xff]  ;;  %v477_v22 = vmul.f32 2.4494898, %v381_v16  ;;  %v484_v11 = vmul.f32 2.4494898, %v388_v7  ;;  %v387_v15 = vld [vmem:[%s3773_s12 + $0x220] sm:$0xff] }
 0x118   : > { %1022 = vmatprep.mubr.bf16.mxu1 %v534_v38  ;;  %v828_v38 = vpack.c.bf16 %v714_v25, %v712_v23  ;;  %v444_v45 = vmul.f32 2.4494898, %v348_v36  ;;  %v719_v23 = vld [vmem:[%s3784_s9 + $0x500] sm:$0xff]  ;;  %v389_v16 = vld [vmem:[%s3773_s12 + $0x230] sm:$0xff] }
 0x119   : > { %v541_v25 = vpack.c.bf16 %v477_v22, %v475_v21  ;;  %v727_v36 = vld [vmem:[%s3784_s9 + $0x540] sm:$0xff] }
 0x11a   : > { %v526_v58 = vpack.c.bf16 %v446_v46, %v444_v45  ;;  %v738_v45 = vld [vmem:[%s3784_s9 + $0x598] sm:$0xff] }
 0x11b   : > { %910 = vmatmul.mubr.bf16.gmra.mrb[12].mxu0 %v517_v41  ;;  %v472_v41 = vmul.f32 2.4494898, %v376_v30  ;;  %v723_v30 = vld [vmem:[%s3784_s9 + $0x520] sm:$0xff] }
 0x11c   : > { %919 = vmatprep.mubr.bf16.mxu0 %v520_v44  ;;  %1080 = vmatpush1.bf16.xpose.msra.mxu0 %v821_v47  ;;  %v441_v44 = vmul.f32 2.4494898, %v345_v34  ;;  %v711_v47 = vld [vmem:[%s3784_s9 + $0x4c0] sm:$0xff]  ;;  %v833_v34 = vpack.c.bf16 %v725_v31, %v723_v30 }
 0x11d   : > { %1081 = vmatprep.subr.bf16.mxu0 %v824_v50  ;;  %v537_v50 = vpack.c.bf16 %v469_v40, %v467_v39  ;;  %v540_v52 = vpack.c.bf16 %v474_v42, %v472_v41  ;;  %v827_v61 = vpack.c.bf16 %v713_v48, %v711_v47  ;;  %v734_v39 = vld [vmem:[%s3784_s9 + $0x578] sm:$0xff]  ;;  %v835_v40 = vpack.c.bf16 %v729_v37, %v727_v36  ;;  %v731_v42 = vld [vmem:[%s3784_s9 + $0x560] sm:$0xff]  ;;  %v397_v36 = vld [vmem:[%s3773_s12 + $0x270] sm:$0xff] }
 0x11e   : > { %v523_v55 = vpack.c.bf16 %v441_v44, %v439_v43  ;;  %v733_v43 = vld [vmem:[%s3784_s9 + $0x570] sm:$0xff]  ;;  %v736_v44 = vld [vmem:[%s3784_s9 + $0x588] sm:$0xff]  ;;  %v735_v48 = vld [vmem:[%s3784_s9 + $0x580] sm:$0xff] }
 0x11f   : > { %1023 = vmatmul.mubr.bf16.gmra.mrb[12].mxu1 %v533_v62  ;;  %v830_v62 = vpack.c.bf16 %v718_v51, %v716_v49  ;;  %v837_v46 = vpack.c.bf16 %v733_v43, %v731_v42  ;;  %v840_v47 = vpack.c.bf16 %v738_v45, %v736_v44  ;;  %v737_v49 = vld [vmem:[%s3784_s9 + $0x590] sm:$0xff]  ;;  %v742_v51 = vld [vmem:[%s3784_s9 + $0x5b8] sm:$0xff]  ;;  %v400_v37 = vld [vmem:[%s3773_s12 + $0x288] sm:$0xff] }
 0x120   : > { %1032 = vmatprep.mubr.bf16.mxu1 %v536_v0  ;;  %v473_v0 = vmul.f32 2.4494898, %v377_v54  ;;  %v739_v54 = vld [vmem:[%s3784_s9 + $0x5a0] sm:$0xff] }
 0x121   : > { %v399_v45 = vld [vmem:[%s3773_s12 + $0x280] sm:$0xff] }
 0x123   : > { %920 = vmatmul.mubr.bf16.gmra.mrb[16].mxu0 %v519_v3  ;;  %v476_v3 = vmul.f32 2.4494898, %v380_v56  ;;  %v744_v56 = vld [vmem:[%s3784_s9 + $0x5c8] sm:$0xff] }
 0x124   : > { %929 = vmatprep.mubr.bf16.mxu0 %v522_v6  ;;  %1082 = vmatpush1.bf16.xpose.msra.mxu0 %v823_v9  ;;  %v445_v6 = vmul.f32 2.4494898, %v349_v60  ;;  %v715_v9 = vld [vmem:[%s3784_s9 + $0x4e0] sm:$0xff]  ;;  %v844_v59 = vpack.c.bf16 %v746_v57, %v744_v56  ;;  %v405_v56 = vld [vmem:[%s3773_s12 + $0x2b0] sm:$0xff]  ;;  %v408_v57 = vld [vmem:[%s3773_s12 + $0x2c8] sm:$0xff] }
 0x125   : > { %1083 = vmatprep.subr.bf16.mxu0 %v826_v12  ;;  %v539_v12 = vpack.c.bf16 %v473_v0, %v471_v63  ;;  %v542_v14 = vpack.c.bf16 %v478_v4, %v476_v3  ;;  %v829_v18 = vpack.c.bf16 %v717_v10, %v715_v9  ;;  %v743_v60 = vld [vmem:[%s3784_s9 + $0x5c0] sm:$0xff]  ;;  %v750_v63 = vld [vmem:[%s3784_s9 + $0x5f8] sm:$0xff]  ;;  %v749_v3 = vld [vmem:[%s3784_s9 + $0x5f0] sm:$0xff] }
 0x126   : > { %v525_v17 = vpack.c.bf16 %v445_v6, %v443_v5  ;;  %v845_v4 = vpack.c.bf16 %v749_v3, %v747_v2  ;;  %v383_v5 = vld [vmem:[%s3773_s12 + $0x200] sm:$0xff]  ;;  %v385_v6 = vld [vmem:[%s3773_s12 + $0x210] sm:$0xff]  ;;  %v412_v3 = vld [vmem:[%s3773_s12 + $0x2e8] sm:$0xff] }
 0x127   : > { %1033 = vmatmul.mubr.bf16.gmra.mrb[16].mxu1 %v535_v24  ;;  %v721_v24 = vld [vmem:[%s3784_s9 + $0x510] sm:$0xff]  ;;  %v479_v9 = vmul.f32 2.4494898, %v383_v5  ;;  %v481_v10 = vmul.f32 2.4494898, %v385_v6 }
 0x128   : > { %1042 = vmatprep.mubr.bf16.mxu1 %v538_v26  ;;  %v724_v26 = vld [vmem:[%s3784_s9 + $0x528] sm:$0xff]  ;;  %v831_v28 = vpack.c.bf16 %v721_v24, %v719_v23  ;;  %v409_v2 = vld [vmem:[%s3773_s12 + $0x2d0] sm:$0xff]  ;;  %v508_v7 = vmul.f32 2.4494898, %v412_v3 }
 0x129   : > { %v543_v13 = vpack.c.bf16 %v481_v10, %v479_v9  ;;  %v505_v6 = vmul.f32 2.4494898, %v409_v2 }
 0x12b   : > { %930 = vmatmul.mubr.bf16.gmra.mrb[20].mxu0 %v521_v29  ;;  %v834_v29 = vpack.c.bf16 %v726_v27, %v724_v26  ;;  %v393_v26 = vld [vmem:[%s3773_s12 + $0x250] sm:$0xff]  ;;  %v396_v27 = vld [vmem:[%s3773_s12 + $0x268] sm:$0xff] }
 0x12c   : > { %939 = vmatprep.mubr.bf16.mxu0 %v524_v32  ;;  %1084 = vmatpush1.bf16.xpose.msra.mxu0 %v825_v35  ;;  %v728_v32 = vld [vmem:[%s3784_s9 + $0x548] sm:$0xff]  ;;  %v489_v30 = vmul.f32 2.4494898, %v393_v26  ;;  %v492_v31 = vmul.f32 2.4494898, %v396_v27 }
 0x12d   : > { %1085 = vmatprep.subr.bf16.mxu0 %v828_v38  ;;  %v836_v35 = vpack.c.bf16 %v730_v33, %v728_v32  ;;  %v732_v38 = vld [vmem:[%s3784_s9 + $0x568] sm:$0xff] }
 0x12e   : > { %v838_v41 = vpack.c.bf16 %v734_v39, %v732_v38  ;;  %v402_v38 = vld [vmem:[%s3773_s12 + $0x298] sm:$0xff] }
 0x12f   : > { %1043 = vmatmul.mubr.bf16.gmra.mrb[20].mxu1 %v537_v50  ;;  %v740_v50 = vld [vmem:[%s3784_s9 + $0x5a8] sm:$0xff]  ;;  %v498_v42 = vmul.f32 2.4494898, %v402_v38 }
 0x130   : > { %1052 = vmatprep.mubr.bf16.mxu1 %v540_v52  ;;  %v839_v52 = vpack.c.bf16 %v737_v49, %v735_v48  ;;  %v842_v53 = vpack.c.bf16 %v742_v51, %v740_v50  ;;  %v406_v48 = vld [vmem:[%s3773_s12 + $0x2b8] sm:$0xff]  ;;  %v495_v49 = vmul.f32 2.4494898, %v399_v45 }
 0x133   : > { %940 = vmatmul.mubr.bf16.gmra.mrb[24].mxu0 %v523_v55  ;;  %v741_v55 = vld [vmem:[%s3784_s9 + $0x5b0] sm:$0xff] }
 0x134   : > { %949 = vmatprep.mubr.bf16.mxu0 %v526_v58  ;;  %1086 = vmatpush1.bf16.xpose.msra.mxu0 %v827_v61  ;;  %v841_v58 = vpack.c.bf16 %v741_v55, %v739_v54  ;;  %v745_v61 = vld [vmem:[%s3784_s9 + $0x5d0] sm:$0xff]  ;;  %v403_v55 = vld [vmem:[%s3773_s12 + $0x2a0] sm:$0xff] }
 0x135   : > { %1087 = vmatprep.subr.bf16.mxu0 %v830_v62  ;;  %v748_v62 = vld [vmem:[%s3784_s9 + $0x5e8] sm:$0xff]  ;;  %v843_v0 = vpack.c.bf16 %v745_v61, %v743_v60  ;;  %v501_v60 = vmul.f32 2.4494898, %v405_v56  ;;  %v504_v61 = vmul.f32 2.4494898, %v408_v57 }
 0x136   : > { %v846_v1 = vpack.c.bf16 %v750_v63, %v748_v62 }
 0x137   : > { %1053 = vmatmul.mubr.bf16.gmra.mrb[24].mxu1 %v539_v12  ;;  %v486_v12 = vmul.f32 2.4494898, %v390_v8 }
 0x138   : > { %1062 = vmatprep.mubr.bf16.mxu1 %v542_v14 }
 0x139   : > { %v546_v14 = vpack.c.bf16 %v486_v12, %v484_v11  ;;  %v411_v11 = vld [vmem:[%s3773_s12 + $0x2e0] sm:$0xff]  ;;  %v413_v12 = vld [vmem:[%s3773_s12 + $0x2f0] sm:$0xff] }
 0x13b   : > { %950 = vmatmul.mubr.bf16.gmra.mrb[28].mxu0 %v525_v17  ;;  %v392_v17 = vld [vmem:[%s3773_s12 + $0x248] sm:$0xff] }
 0x13c   : > { %1088 = vmatpush1.bf16.xpose.msra.mxu0 %v829_v18  ;;  %1105 = vmatprep.mubr.bf16.mxu0 %v544_v19  ;;  %v394_v18 = vld [vmem:[%s3773_s12 + $0x258] sm:$0xff]  ;;  %v483_v19 = vmul.f32 2.4494898, %v387_v15  ;;  %v488_v21 = vmul.f32 2.4494898, %v392_v17 }
 0x13d   : > { %1089 = vmatprep.subr.bf16.mxu0 %v832_v20  ;;  %v485_v20 = vmul.f32 2.4494898, %v389_v16  ;;  %v490_v22 = vmul.f32 2.4494898, %v394_v18 }
 0x13f   : > { %1063 = vmatmul.mubr.bf16.gmra.mrb[28].mxu1 %v541_v25  ;;  %v545_v23 = vpack.c.bf16 %v485_v20, %v483_v19  ;;  %v548_v24 = vpack.c.bf16 %v490_v22, %v488_v21  ;;  %v391_v25 = vld [vmem:[%s3773_s12 + $0x240] sm:$0xff] }
 0x144   : > { %1090 = vmatpush1.bf16.xpose.msra.mxu0 %v831_v28  ;;  %v398_v28 = vld [vmem:[%s3773_s12 + $0x278] sm:$0xff] }
 0x145   : > { %1091 = vmatprep.subr.bf16.mxu0 %v834_v29  ;;  %v487_v29 = vmul.f32 2.4494898, %v391_v25  ;;  %v494_v32 = vmul.f32 2.4494898, %v398_v28 }
 0x147   : > { %v547_v33 = vpack.c.bf16 %v489_v30, %v487_v29 }
 0x14c   : > { %1092 = vmatpush1.bf16.xpose.msra.mxu0 %v833_v34  ;;  %v550_v34 = vpack.c.bf16 %v494_v32, %v492_v31 }
 0x14d   : > { %1093 = vmatprep.subr.bf16.mxu0 %v836_v35  ;;  %v395_v35 = vld [vmem:[%s3773_s12 + $0x260] sm:$0xff] }
 0x14e   : > { %v491_v39 = vmul.f32 2.4494898, %v395_v35 }
 0x154   : > { %1094 = vmatpush1.bf16.xpose.msra.mxu0 %v835_v40  ;;  %v493_v40 = vmul.f32 2.4494898, %v397_v36 }
 0x155   : > { %1095 = vmatprep.subr.bf16.mxu0 %v838_v41  ;;  %v496_v41 = vmul.f32 2.4494898, %v400_v37 }
 0x156   : > { %v549_v43 = vpack.c.bf16 %v493_v40, %v491_v39 }
 0x157   : > { %v552_v44 = vpack.c.bf16 %v498_v42, %v496_v41 }
 0x15c   : > { %1096 = vmatpush1.bf16.xpose.msra.mxu0 %v837_v46  ;;  %v401_v46 = vld [vmem:[%s3773_s12 + $0x290] sm:$0xff] }
 0x15d   : > { %1097 = vmatprep.subr.bf16.mxu0 %v840_v47  ;;  %v404_v47 = vld [vmem:[%s3773_s12 + $0x2a8] sm:$0xff]  ;;  %v497_v50 = vmul.f32 2.4494898, %v401_v46 }
 0x15e   : > { %v500_v51 = vmul.f32 2.4494898, %v404_v47 }
 0x164   : > { %1098 = vmatpush1.bf16.xpose.msra.mxu0 %v839_v52  ;;  %v502_v52 = vmul.f32 2.4494898, %v406_v48 }
 0x165   : > { %1099 = vmatprep.subr.bf16.mxu0 %v842_v53  ;;  %v551_v53 = vpack.c.bf16 %v497_v50, %v495_v49 }
 0x166   : > { %v554_v54 = vpack.c.bf16 %v502_v52, %v500_v51 }
 0x16c   : > { %1100 = vmatpush1.bf16.xpose.msra.mxu0 %v841_v58  ;;  %v410_v58 = vld [vmem:[%s3773_s12 + $0x2d8] sm:$0xff] }
 0x16d   : > { %1101 = vmatprep.subr.bf16.mxu0 %v844_v59  ;;  %v499_v59 = vmul.f32 2.4494898, %v403_v55  ;;  %v506_v62 = vmul.f32 2.4494898, %v410_v58 }
 0x16f   : > { %v553_v63 = vpack.c.bf16 %v501_v60, %v499_v59 }
 0x174   : > { %1102 = vmatpush1.bf16.xpose.msra.mxu0 %v843_v0  ;;  %v556_v0 = vpack.c.bf16 %v506_v62, %v504_v61 }
 0x175   : > { %1103 = vmatprep.subr.bf16.mxu0 %v846_v1  ;;  %v407_v1 = vld [vmem:[%s3773_s12 + $0x2c0] sm:$0xff] }
 0x176   : > { %v503_v5 = vmul.f32 2.4494898, %v407_v1 }
 0x178   : > { %v555_v9 = vpack.c.bf16 %v505_v6, %v503_v5 }
 0x17c   : > { %1104 = vmatpush1.bf16.xpose.msra.mxu0 %v845_v4  ;;  %v414_v4 = vld [vmem:[%s3773_s12 + $0x2f8] sm:$0xff] }
 0x17d   : > { %v510_v8 = vmul.f32 2.4494898, %v414_v4 }
 0x17f   : > { %v558_v10 = vpack.c.bf16 %v510_v8, %v508_v7 }
 0x183   : > { %1106 = vmatmul.mubr.bf16.vlgmr.msra.gmra.mrb[32].mxu0 %v543_v13  ;;  %v507_v13 = vmul.f32 2.4494898, %v411_v11 }
 0x184   : > { %1115 = vmatprep.mubr.bf16.mxu0 %v546_v14  ;;  %v509_v14 = vmul.f32 2.4494898, %v413_v12 }
 0x186   : > { %v557_v15 = vpack.c.bf16 %v509_v14, %v507_v13 }
 0x18b   : > { %1116 = vmatmul.mubr.bf16.gmra.mrb[36].mxu0 %v545_v23 }
 0x18c   : > { %1125 = vmatprep.mubr.bf16.mxu0 %v548_v24 }
 0x193   : > { %1126 = vmatmul.mubr.bf16.gmra.mrb[40].mxu0 %v547_v33 }
 0x194   : > { %1135 = vmatprep.mubr.bf16.mxu0 %v550_v34 }
 0x19b   : > { %1136 = vmatmul.mubr.bf16.gmra.mrb[44].mxu0 %v549_v43 }
 0x19c   : > { %1145 = vmatprep.mubr.bf16.mxu0 %v552_v44 }
 0x1a3   : > { %1146 = vmatmul.mubr.bf16.gmra.mrb[48].mxu0 %v551_v53 }
 0x1a4   : > { %1155 = vmatprep.mubr.bf16.mxu0 %v554_v54 }
 0x1ab   : > { %1156 = vmatmul.mubr.bf16.gmra.mrb[52].mxu0 %v553_v63 }
 0x1ac   : > { %1165 = vmatprep.mubr.bf16.mxu0 %v556_v0 }
 0x1b3   : > { %1166 = vmatmul.mubr.bf16.gmra.mrb[56].mxu0 %v555_v9 }
 0x1b4   : > { %1175 = vmatprep.mubr.bf16.mxu0 %v558_v10 }
 0x1bb   : > { %1176 = vmatmul.mubr.bf16.gmra.mrb[60].mxu0 %v557_v15 }
 0x1d6   : > { %v4078_v16 = vpop.f32.mrb[0].mxu0 }
 0x1d7   : > { %v4080_v17 = vpop.f32.mrb[1].mxu0 }
 0x1d8   : > { %v4082_v18 = vpop.f32.mrb[2].mxu0  ;;  %v1186_v19 = vmax.f32 %v4078_v16, %v4080_v17 }
 0x1d9   : > { %v4086_v20 = vpop.f32.mrb[3].mxu0 }
 0x1da   : > { %1187 = vmax.xlane.f32.xlu0 %v1186_v19  ;;  %v1189_v21 = vmax.f32 %v4082_v18, %v4086_v20  ;;  %v4090_v22 = vpop.f32.mrb[0].mxu1 }
 0x1db   : > { %v4092_v23 = vpop.f32.mrb[1].mxu1 }
 0x1dc   : > { %v4096_v25 = vpop.f32.mrb[2].mxu1 }
 0x1dd   : > { %v4102_v28 = vpop.f32.mrb[3].mxu1 }
 0x1de   : > { %1190 = vmax.xlane.f32.xlu0 %v1189_v21  ;;  %v4094_v24 = vpop.f32.mrb[4].mxu0  ;;  %5624 = vst [vmem:[#allocation25_spill] sm:$0xff] %v4102_v28 }
 0x1df   : > { %v4100_v27 = vpop.f32.mrb[5].mxu0 }
 0x1e0   : > { %v4104_v29 = vpop.f32.mrb[6].mxu0  ;;  %v1192_v30 = vmax.f32 %v4094_v24, %v4100_v27 }
 0x1e1   : > { %v4110_v32 = vpop.f32.mrb[7].mxu0 }
 0x1e2   : > { %1193 = vmax.xlane.f32.xlu1 %v1192_v30  ;;  %v1195_v33 = vmax.f32 %v4104_v29, %v4110_v32  ;;  %v4114_v34 = vpop.f32.mrb[4].mxu1 }
 0x1e3   : > { %5625 = vst [vmem:[#allocation26_spill] sm:$0xff] %v4114_v34  ;;  %v4116_v35 = vpop.f32.mrb[5].mxu1 }
 0x1e4   : > { %5626 = vst [vmem:[#allocation27_spill] sm:$0xff] %v4116_v35  ;;  %v4120_v37 = vpop.f32.mrb[6].mxu1 }
 0x1e5   : > { %5627 = vst [vmem:[#allocation28_spill] sm:$0xff] %v4120_v37  ;;  %v4126_v40 = vpop.f32.mrb[7].mxu1 }
 0x1e6   : > { %1196 = vmax.xlane.f32.xlu1 %v1195_v33  ;;  %v4118_v36 = vpop.f32.mrb[8].mxu0  ;;  %5628 = vst [vmem:[#allocation29_spill] sm:$0xff] %v4126_v40 }
 0x1e7   : > { %v4124_v39 = vpop.f32.mrb[9].mxu0 }
 0x1e8   : > { %v4128_v41 = vpop.f32.mrb[10].mxu0  ;;  %v1198_v42 = vmax.f32 %v4118_v36, %v4124_v39 }
 0x1e9   : > { %v4134_v44 = vpop.f32.mrb[11].mxu0 }
 0x1ea   : > { %1199 = vmax.xlane.f32.xlu0 %v1198_v42  ;;  %v1201_v45 = vmax.f32 %v4128_v41, %v4134_v44  ;;  %v4138_v46 = vpop.f32.mrb[8].mxu1 }
 0x1eb   : > { %5629 = vst [vmem:[#allocation30_spill] sm:$0xff] %v4138_v46  ;;  %v4140_v47 = vpop.f32.mrb[9].mxu1 }
 0x1ec   : > { %1202 = vmax.xlane.f32.xlu1 %v1201_v45  ;;  %5630 = vst [vmem:[#allocation31_spill] sm:$0xff] %v4140_v47  ;;  %v4144_v49 = vpop.f32.mrb[10].mxu1 }
 0x1ed   : > { %5631 = vst [vmem:[#allocation32_spill] sm:$0xff] %v4144_v49  ;;  %v4150_v52 = vpop.f32.mrb[11].mxu1 }
 0x1ee   : > { %v4142_v48 = vpop.f32.mrb[12].mxu0  ;;  %5632 = vst [vmem:[#allocation33_spill] sm:$0xff] %v4150_v52 }
 0x1ef   : > { %v4148_v51 = vpop.f32.mrb[13].mxu0 }
 0x1f0   : > { %v4152_v53 = vpop.f32.mrb[14].mxu0  ;;  %v1204_v54 = vmax.f32 %v4142_v48, %v4148_v51 }
 0x1f1   : > { %v4158_v56 = vpop.f32.mrb[15].mxu0 }
 0x1f2   : > { %1205 = vmax.xlane.f32.xlu0 %v1204_v54  ;;  %v1207_v57 = vmax.f32 %v4152_v53, %v4158_v56  ;;  %v4162_v58 = vpop.f32.mrb[12].mxu1 }
 0x1f3   : > { %5633 = vst [vmem:[#allocation34_spill] sm:$0xff] %v4162_v58  ;;  %v4164_v59 = vpop.f32.mrb[13].mxu1 }
 0x1f4   : > { %1208 = vmax.xlane.f32.xlu1 %v1207_v57  ;;  %5634 = vst [vmem:[#allocation35_spill] sm:$0xff] %v4164_v59  ;;  %v4168_v61 = vpop.f32.mrb[14].mxu1 }
 0x1f5   : > { %5635 = vst [vmem:[#allocation36_spill] sm:$0xff] %v4168_v61  ;;  %v4174_v0 = vpop.f32.mrb[15].mxu1 }
 0x1f6   : > { %v4166_v60 = vpop.f32.mrb[16].mxu0  ;;  %5636 = vst [vmem:[#allocation37_spill] sm:$0xff] %v4174_v0  ;;  %v1255_v3 = vmax.f32 %v4168_v61, %v4174_v0  ;;  %v1917_v0 = vld [vmem:[%s4304_s23 + $0x58] sm:$0xff] }
 0x1f7   : > { %v4172_v63 = vpop.f32.mrb[17].mxu0 }
 0x1f8   : > { %v4176_v1 = vpop.f32.mrb[18].mxu0  ;;  %v1210_v2 = vmax.f32 %v4166_v60, %v4172_v63 }
 0x1f9   : > { %v4182_v4 = vpop.f32.mrb[19].mxu0 }
 0x1fa   : > { %1211 = vmax.xlane.f32.xlu0 %v1210_v2  ;;  %v1213_v5 = vmax.f32 %v4176_v1, %v4182_v4  ;;  %v4186_v6 = vpop.f32.mrb[16].mxu1 }
 0x1fb   : > { %5637 = vst [vmem:[#allocation38_spill] sm:$0xff] %v4186_v6  ;;  %v4188_v7 = vpop.f32.mrb[17].mxu1 }
 0x1fc   : > { %1214 = vmax.xlane.f32.xlu1 %v1213_v5  ;;  %5638 = vst [vmem:[#allocation39_spill] sm:$0xff] %v4188_v7  ;;  %v4192_v9 = vpop.f32.mrb[18].mxu1  ;;  %v1258_v10 = vmax.f32 %v4186_v6, %v4188_v7  ;;  %v5655_v6 = vmax.f32 %v4114_v34, %v4116_v35  ;;  %v1928_v35 = vld [vmem:[%s4304_s23 + $0xb0] sm:$0xff] }
 0x1fd   : > { %5639 = vst [vmem:[#allocation40_spill] sm:$0xff] %v4192_v9  ;;  %v4198_v12 = vpop.f32.mrb[19].mxu1 }
 0x1fe   : > { %v4190_v8 = vpop.f32.mrb[20].mxu0  ;;  %5640 = vst [vmem:[#allocation41_spill] sm:$0xff] %v4198_v12  ;;  %v1261_v15 = vmax.f32 %v4192_v9, %v4198_v12  ;;  %v5651_v9 = vmax.f32 %v4090_v22, %v4092_v23 }
 0x1ff   : > { %v4196_v11 = vpop.f32.mrb[21].mxu0 }
 0x200   : > { %v4200_v13 = vpop.f32.mrb[22].mxu0  ;;  %v1216_v14 = vmax.f32 %v4190_v8, %v4196_v11 }
 0x201   : > { %v4206_v19 = vpop.f32.mrb[23].mxu0 }
 0x202   : > { %1217 = vmax.xlane.f32.xlu0 %v1216_v14  ;;  %v1219_v21 = vmax.f32 %v4200_v13, %v4206_v19  ;;  %v4210_v30 = vpop.f32.mrb[20].mxu1 }
 0x203   : > { %5641 = vst [vmem:[#allocation42_spill] sm:$0xff] %v4210_v30  ;;  %v4212_v33 = vpop.f32.mrb[21].mxu1 }
 0x204   : > { %1220 = vmax.xlane.f32.xlu1 %v1219_v21  ;;  %5642 = vst [vmem:[#allocation43_spill] sm:$0xff] %v4212_v33  ;;  %v4216_v45 = vpop.f32.mrb[22].mxu1  ;;  %v1264_v54 = vmax.f32 %v4210_v30, %v4212_v33 }
 0x205   : > { %5643 = vst [vmem:[#allocation44_spill] sm:$0xff] %v4216_v45  ;;  %v4222_v2 = vpop.f32.mrb[23].mxu1 }
 0x206   : > { %v4214_v42 = vpop.f32.mrb[24].mxu0  ;;  %5644 = vst [vmem:[#allocation45_spill] sm:$0xff] %v4222_v2  ;;  %v1267_v21 = vmax.f32 %v4216_v45, %v4222_v2 }
 0x207   : > { %v4220_v57 = vpop.f32.mrb[25].mxu0 }
 0x208   : > { %v4224_v5 = vpop.f32.mrb[26].mxu0  ;;  %v1222_v14 = vmax.f32 %v4214_v42, %v4220_v57 }
 0x209   : > { %v4230_v62 = vpop.f32.mrb[27].mxu0 }
 0x20a   : > { %1223 = vmax.xlane.f32.xlu0 %v1222_v14  ;;  %v1225_v55 = vmax.f32 %v4224_v5, %v4230_v62  ;;  %v4234_v50 = vpop.f32.mrb[24].mxu1 }
 0x20b   : > { %5645 = vst [vmem:[#allocation46_spill] sm:$0xff] %v4234_v50  ;;  %v4236_v43 = vpop.f32.mrb[25].mxu1 }
 0x20c   : > { %1226 = vmax.xlane.f32.xlu1 %v1225_v55  ;;  %5646 = vst [vmem:[#allocation47_spill] sm:$0xff] %v4236_v43  ;;  %v4240_v31 = vpop.f32.mrb[26].mxu1  ;;  %v1270_v26 = vmax.f32 %v4234_v50, %v4236_v43 }
 0x20d   : > { %5647 = vst [vmem:[#allocation48_spill] sm:$0xff] %v4240_v31  ;;  %v4246_v2 = vpop.f32.mrb[27].mxu1 }
 0x20e   : > { %v4238_v38 = vpop.f32.mrb[28].mxu0  ;;  %5648 = vst [vmem:[#allocation49_spill] sm:$0xff] %v4246_v2  ;;  %v1273_v45 = vmax.f32 %v4240_v31, %v4246_v2 }
 0x20f   : > { %v4244_v33 = vpop.f32.mrb[29].mxu0 }
 0x210   : > { %v4248_v14 = vpop.f32.mrb[30].mxu0  ;;  %v1228_v55 = vmax.f32 %v4238_v38, %v4244_v33 }
 0x211   : > { %v4254_v30 = vpop.f32.mrb[31].mxu0 }
 0x212   : > { %1229 = vmax.xlane.f32.xlu0 %v1228_v55  ;;  %v1231_v12 = vmax.f32 %v4248_v14, %v4254_v30  ;;  %v4258_v43 = vpop.f32.mrb[28].mxu1  ;;  %v5654_v55 = vmax.f32 %v4096_v25, %v4102_v28  ;;  %v1931_v28 = vld [vmem:[%s4304_s23 + $0xc8] sm:$0xff] }
 0x213   : > { %5649 = vst [vmem:[#allocation50_spill] sm:$0xff] %v4258_v43  ;;  %v4260_v50 = vpop.f32.mrb[29].mxu1 }
 0x214   : > { %1232 = vmax.xlane.f32.xlu1 %v1231_v12  ;;  %5650 = vst [vmem:[#allocation51_spill] sm:$0xff] %v4260_v50  ;;  %v4265_v7 = vpop.f32.mrb[30].mxu1  ;;  %v1276_v2 = vmax.f32 %v4258_v43, %v4260_v50  ;;  %v5657_v50 = vmax.f32 %v4138_v46, %v4140_v47  ;;  %v5658_v43 = vmax.f32 %v4144_v49, %v4150_v52  ;;  %v1925_v49 = vld [vmem:[%s4304_s23 + $0x98] sm:$0xff] }
 0x215   : > { %5652 = vst [vmem:[#allocation52_spill] sm:$0xff] %v4265_v7  ;;  %v4269_v31 = vpop.f32.mrb[31].mxu1 }
 0x216   : > { %1235 = vmax.xlane.f32.xlu0 %v5651_v9  ;;  %5653 = vst [vmem:[#allocation53_spill] sm:$0xff] %v4269_v31  ;;  %v1279_v12 = vmax.f32 %v4265_v7, %v4269_v31  ;;  %v5656_v9 = vmax.f32 %v4120_v37, %v4126_v40  ;;  %v1912_v31 = vld [vmem:[%s4304_s23 + $0x30] sm:$0xff]  ;;  %v1915_v7 = vld [vmem:[%s4304_s23 + $0x48] sm:$0xff] }
 0x217   : > { %v1924_v37 = vld [vmem:[%s4304_s23 + $0x90] sm:$0xff] }
 0x218   : > { %1238 = vmax.xlane.f32.xlu1 %v5654_v55  ;;  %v5659_v55 = vmax.f32 %v4162_v58, %v4164_v59  ;;  %v1921_v58 = vld [vmem:[%s4304_s23 + $0x78] sm:$0xff] }
 0x21a   : > { %1241 = vmax.xlane.f32.xlu0 %v5655_v6 }
 0x21c   : > { %1244 = vmax.xlane.f32.xlu1 %v5656_v9 }
 0x21e   : > { %1247 = vmax.xlane.f32.xlu0 %v5657_v50 }
 0x220   : > { %1250 = vmax.xlane.f32.xlu1 %v5658_v43  ;;  %v1910_v43 = vld [vmem:[%s4304_s23 + $0x20] sm:$0xff] }
 0x221   : > { %v2100_v59 = vpack.c.bf16 %v1912_v31, %v1910_v43 }
 0x222   : > { %1253 = vmax.xlane.f32.xlu0 %v5659_v55 }
 0x224   : > { %1256 = vmax.xlane.f32.xlu1 %v1255_v3 }
 0x226   : > { %1259 = vmax.xlane.f32.xlu0 %v1258_v10  ;;  %v1909_v10 = vld [vmem:[%s4304_s23 + $0x18] sm:$0xff] }
 0x228   : > { %1262 = vmax.xlane.f32.xlu1 %v1261_v15  ;;  %v1906_v15 = vld [vmem:[%s4304_s23] sm:$0xff] }
 0x22a   : > { %1265 = vmax.xlane.f32.xlu0 %v1264_v54  ;;  %v1908_v54 = vld [vmem:[%s4304_s23 + $0x10] sm:$0xff] }
 0x22c   : > { %1268 = vmax.xlane.f32.xlu1 %v1267_v21  ;;  %v1913_v21 = vld [vmem:[%s4304_s23 + $0x38] sm:$0xff] }
 0x22e   : > { %1271 = vmax.xlane.f32.xlu0 %v1270_v26  ;;  %v1907_v26 = vld [vmem:[%s4304_s23 + $0x8] sm:$0xff] }
 0x230   : > { %1274 = vmax.xlane.f32.xlu1 %v1273_v45  ;;  %v2099_v45 = vpack.c.bf16 %v1909_v10, %v1907_v26  ;;  %v2103_v10 = vpack.c.bf16 %v1917_v0, %v1915_v7  ;;  %v1918_v7 = vld [vmem:[%s4304_s23 + $0x60] sm:$0xff] }
 0x232   : > { %1277 = vmax.xlane.f32.xlu0 %v1276_v2  ;;  %v1911_v2 = vld [vmem:[%s4304_s23 + $0x28] sm:$0xff]  ;;  %2242 = vmatprep.subr.bf16.mxu1 %v2099_v45 }
 0x233   : > { %v2101_v3 = vpack.c.bf16 %v1913_v21, %v1911_v2  ;;  %v1919_v21 = vld [vmem:[%s4304_s23 + $0x68] sm:$0xff] }
 0x234   : > { %1280 = vmax.xlane.f32.xlu1 %v1279_v12  ;;  %v2098_v12 = vpack.c.bf16 %v1908_v54, %v1906_v15  ;;  %v1914_v15 = vld [vmem:[%s4304_s23 + $0x40] sm:$0xff]  ;;  %v1916_v54 = vld [vmem:[%s4304_s23 + $0x50] sm:$0xff]  ;;  %v2105_v0 = vpack.c.bf16 %v1921_v58, %v1919_v21  ;;  %v1927_v21 = vld [vmem:[%s4304_s23 + $0xa8] sm:$0xff] }
 0x235   : > { %v2102_v43 = vpack.c.bf16 %v1916_v54, %v1914_v15 }
 0x236   : > { %2243 = vmatpush1.bf16.msra.mxu1 %v2098_v12  ;;  %v1923_v12 = vld [vmem:[%s4304_s23 + $0x88] sm:$0xff] }
 0x237   : > { %2244 = vmatprep.subr.bf16.mxu1 %v2101_v3  ;;  %v1920_v3 = vld [vmem:[%s4304_s23 + $0x70] sm:$0xff]  ;;  %v2107_v31 = vpack.c.bf16 %v1925_v49, %v1923_v12 }
 0x238   : > { %v2104_v47 = vpack.c.bf16 %v1920_v3, %v1918_v7 }
 0x23a   : > { %2245 = vmatpush1.bf16.msra.mxu1 %v2100_v59  ;;  %v1922_v59 = vld [vmem:[%s4304_s23 + $0x80] sm:$0xff] }
 0x23b   : > { %2246 = vmatprep.subr.bf16.mxu1 %v2103_v10 }
 0x23e   : > { %2247 = vmatpush1.bf16.msra.mxu1 %v2102_v43  ;;  %v1929_v43 = vld [vmem:[%s4304_s23 + $0xb8] sm:$0xff] }
 0x23f   : > { %2248 = vmatprep.subr.bf16.mxu1 %v2105_v0 }
 0x242   : > { %2249 = vmatpush1.bf16.msra.mxu1 %v2104_v47 }
 0x243   : > { %2250 = vmatprep.subr.bf16.mxu1 %v2107_v31 }
 0x256   : > { %v4291_v6 = vpop.f32.mrb[32].mxu0 }
 0x257   : > { %v4293_v50 = vpop.f32.mrb[33].mxu0 }
 0x258   : > { %v4295_v9 = vpop.f32.mrb[34].mxu0 }
 0x259   : > { %v4299_v55 = vpop.f32.mrb[35].mxu0 }
 0x25e   : > { %v4316_v61 = vpop.f32.mrb[36].mxu0 }
 0x25f   : > { %v4318_v26 = vpop.f32.mrb[37].mxu0 }
 0x260   : > { %v4322_v2 = vpop.f32.mrb[38].mxu0 }
 0x261   : > { %v4328_v52 = vpop.f32.mrb[39].mxu0 }
 0x266   : > { %v4336_v45 = vpop.f32.mrb[40].mxu0 }
 0x267   : > { %v1188_v46 = vpop.xlane.xlu0 %1187  ;;  %v4338_v40 = vpop.f32.mrb[41].mxu0 }
 0x268   : > { %v1330_v58 = vsub.f32 %v4078_v16, %v1188_v46  ;;  %v1331_v10 = vsub.f32 %v4080_v17, %v1188_v46  ;;  %v4344_v15 = vpop.f32.mrb[42].mxu0  ;;  %v2106_v16 = vpack.c.bf16 %v1924_v37, %v1922_v59  ;;  %v2109_v17 = vpack.c.bf16 %v1929_v43, %v1927_v21  ;;  %v1926_v46 = vld [vmem:[%s4304_s23 + $0xa0] sm:$0xff] }
 0x269   : > { %v4350_v7 = vpop.f32.mrb[43].mxu0  ;;  %v2108_v47 = vpack.c.bf16 %v1928_v35, %v1926_v46  ;;  %v1930_v43 = vld [vmem:[%s4304_s23 + $0xc0] sm:$0xff]  ;;  %v1935_v35 = vld [vmem:[%s4304_s23 + $0xe8] sm:$0xff] }
 0x26a   : > { %v1426_v49 = vmul.f32 1.442695, %v1330_v58  ;;  %v1428_v0 = vmul.f32 1.442695, %v1331_v10  ;;  %v1933_v58 = vld [vmem:[%s4304_s23 + $0xd8] sm:$0xff]  ;;  %2251 = vmatpush1.bf16.msra.mxu1 %v2106_v16 }
 0x26b   : > { %v1191_v12 = vpop.xlane.xlu0 %1190  ;;  %2252 = vmatprep.subr.bf16.mxu1 %v2109_v17  ;;  %v2111_v21 = vpack.c.bf16 %v1933_v58, %v1931_v28  ;;  %v1934_v58 = vld [vmem:[%s4304_s23 + $0xe0] sm:$0xff] }
 0x26c   : > { %3052 = vpow2.f32 %v1426_v49  ;;  %v1332_v54 = vsub.f32 %v4082_v18, %v1191_v12  ;;  %v1333_v34 = vsub.f32 %v4086_v20, %v1191_v12  ;;  %v1932_v18 = vld [vmem:[%s4304_s23 + $0xd0] sm:$0xff]  ;;  %v1939_v49 = vld [vmem:[%s4304_s23 + $0x108] sm:$0xff] }
 0x26d   : > { %3054 = vpow2.f32 %v1428_v0  ;;  %v1937_v0 = vld [vmem:[%s4304_s23 + $0xf8] sm:$0xff] }
 0x26e   : > { %v1430_v10 = vmul.f32 1.442695, %v1332_v54  ;;  %v1432_v3 = vmul.f32 1.442695, %v1333_v34  ;;  %v4360_v37 = vpop.f32.mrb[44].mxu0  ;;  %2253 = vmatpush1.bf16.msra.mxu1 %v2108_v47  ;;  %v2113_v46 = vpack.c.bf16 %v1937_v0, %v1935_v35  ;;  %v1938_v0 = vld [vmem:[%s4304_s23 + $0x100] sm:$0xff] }
 0x26f   : > { %v1194_v31 = vpop.xlane.xlu1 %1193  ;;  %v4362_v59 = vpop.f32.mrb[45].mxu0  ;;  %2254 = vmatprep.subr.bf16.mxu1 %v2111_v21 }
 0x270   : > { %5660 = vst [vmem:[#allocation54_spill] sm:$0xff] %v4362_v59  ;;  %3056 = vpow2.f32 %v1430_v10  ;;  %v1334_v20 = vsub.f32 %v4094_v24, %v1194_v31  ;;  %v1335_v54 = vsub.f32 %v4100_v27, %v1194_v31  ;;  %v4368_v34 = vpop.f32.mrb[46].mxu0  ;;  %v2110_v27 = vpack.c.bf16 %v1932_v18, %v1930_v43  ;;  %v1936_v10 = vld [vmem:[%s4304_s23 + $0xf0] sm:$0xff]  ;;  %v1941_v59 = vld [vmem:[%s4304_s23 + $0x118] sm:$0xff] }
 0x271   : > { %5661 = vst [vmem:[#allocation55_spill] sm:$0xff] %v4368_v34  ;;  %3058 = vpow2.f32 %v1432_v3  ;;  %v4374_v28 = vpop.f32.mrb[47].mxu0  ;;  %v2112_v21 = vpack.c.bf16 %v1936_v10, %v1934_v58  ;;  %v1943_v58 = vld [vmem:[%s4304_s23 + $0x128] sm:$0xff]  ;;  %v1945_v10 = vld [vmem:[%s4304_s23 + $0x138] sm:$0xff] }
 0x272   : > { %5662 = vst [vmem:[#allocation56_spill] sm:$0xff] %v4374_v28  ;;  %v1434_v16 = vmul.f32 1.442695, %v1334_v20  ;;  %v1436_v12 = vmul.f32 1.442695, %v1335_v54  ;;  %2255 = vmatpush1.bf16.msra.mxu1 %v2110_v27  ;;  %v1940_v27 = vld [vmem:[%s4304_s23 + $0x110] sm:$0xff] }
 0x273   : > { %v1197_v17 = vpop.xlane.xlu1 %1196  ;;  %2256 = vmatprep.subr.bf16.mxu1 %v2113_v46  ;;  %v1944_v28 = vld [vmem:[%s4304_s23 + $0x130] sm:$0xff]  ;;  %v1947_v34 = vld [vmem:[%s4304_s23 + $0x148] sm:$0xff] }
 0x274   : > { %3060 = vpow2.f32 %v1434_v16  ;;  %v1336_v31 = vsub.f32 %v4104_v29, %v1197_v17  ;;  %v1337_v3 = vsub.f32 %v4110_v32, %v1197_v17  ;;  %v2115_v32 = vpack.c.bf16 %v1941_v59, %v1939_v49 }
 0x275   : > { %3062 = vpow2.f32 %v1436_v12  ;;  %v2117_v59 = vpack.c.bf16 %v1945_v10, %v1943_v58 }
 0x276   : > { %v4384_v20 = vpop.eup %3052  ;;  %v1438_v54 = vmul.f32 1.442695, %v1336_v31  ;;  %v1440_v47 = vmul.f32 1.442695, %v1337_v3  ;;  %v4386_v43 = vpop.f32.mrb[48].mxu0  ;;  %2257 = vmatpush1.bf16.msra.mxu1 %v2112_v21 }
 0x277   : > { %5663 = vst [vmem:[#allocation57_spill] sm:$0xff] %v4384_v20  ;;  %v4388_v18 = vpop.eup %3054  ;;  %v1200_v29 = vpop.xlane.xlu0 %1199  ;;  %2258 = vmatprep.subr.bf16.mxu1 %v2115_v32  ;;  %v5666_v32 = vmax.f32 %v4291_v6, %v4293_v50 }
 0x278   : > { %5664 = vst [vmem:[#allocation58_spill] sm:$0xff] %v4388_v18  ;;  %v4390_v35 = vpop.f32.mrb[49].mxu0  ;;  %3064 = vpow2.f32 %v1438_v54  ;;  %v1338_v16 = vsub.f32 %v4118_v36, %v1200_v29  ;;  %v1339_v12 = vsub.f32 %v4124_v39, %v1200_v29  ;;  %v1618_v17 = vadd.f32 %v4388_v18, %v4384_v20  ;;  %v1942_v20 = vld [vmem:[%s4304_s23 + $0x120] sm:$0xff] }
 0x279   : > { %v4397_v31 = vpop.f32.mrb[50].mxu0  ;;  %3066 = vpow2.f32 %v1440_v47  ;;  %v1203_v3 = vpop.xlane.xlu1 %1202  ;;  %v2114_v18 = vpack.c.bf16 %v1940_v27, %v1938_v0  ;;  %v2116_v10 = vpack.c.bf16 %v1944_v28, %v1942_v20 }
 0x27a   : > { %v4402_v46 = vpop.f32.mrb[51].mxu0  ;;  %v4406_v36 = vpop.eup %3056  ;;  %v1442_v39 = vmul.f32 1.442695, %v1338_v16  ;;  %v1444_v49 = vmul.f32 1.442695, %v1339_v12  ;;  %v1340_v54 = vsub.f32 %v4128_v41, %v1203_v3  ;;  %v1341_v29 = vsub.f32 %v4134_v44, %v1203_v3  ;;  %1619 = vadd.xlane.f32.xlu0 %v1618_v17  ;;  %v1949_v44 = vld [vmem:[%s4304_s23 + $0x158] sm:$0xff] }
 0x27b   : > { %v4410_v47 = vpop.eup %3058  ;;  %2259 = vmatpush1.bf16.msra.mxu1 %v2114_v18  ;;  %v2119_v3 = vpack.c.bf16 %v1949_v44, %v1947_v34  ;;  %v5668_v18 = vmax.f32 %v4295_v9, %v4299_v55 }
 0x27c   : > { %3068 = vpow2.f32 %v1442_v39  ;;  %v1446_v16 = vmul.f32 1.442695, %v1340_v54  ;;  %v1448_v12 = vmul.f32 1.442695, %v1341_v29  ;;  %v1621_v41 = vadd.f32 %v4410_v47, %v4406_v36  ;;  %2260 = vmatprep.subr.bf16.mxu1 %v2117_v59 }
 0x27d   : > { %3070 = vpow2.f32 %v1444_v49 }
 0x27e   : > { %v4420_v21 = vpop.eup %3060  ;;  %3072 = vpow2.f32 %v1446_v16  ;;  %1622 = vadd.xlane.f32.xlu1 %v1621_v41  ;;  %1283 = vmax.xlane.f32.xlu0 %v5666_v32  ;;  %v4425_v0 = vpop.f32.mrb[52].mxu0  ;;  %v1948_v41 = vld [vmem:[%s4304_s23 + $0x150] sm:$0xff] }
 0x27f   : > { %5665 = vst [vmem:[#allocation59_spill] sm:$0xff] %v4420_v21  ;;  %v4427_v17 = vpop.eup %3062  ;;  %3074 = vpow2.f32 %v1448_v12  ;;  %v1206_v27 = vpop.xlane.xlu0 %1205  ;;  %v1946_v12 = vld [vmem:[%s4304_s23 + $0x140] sm:$0xff]  ;;  %2261 = vmatpush1.bf16.msra.mxu1 %v2116_v10 }
 0x280   : > { %v4429_v58 = vpop.f32.mrb[53].mxu0  ;;  %v1342_v39 = vsub.f32 %v4142_v48, %v1206_v27  ;;  %v1343_v49 = vsub.f32 %v4148_v51, %v1206_v27  ;;  %v1624_v54 = vadd.f32 %v4427_v17, %v4420_v21  ;;  %v2118_v27 = vpack.c.bf16 %v1948_v41, %v1946_v12  ;;  %2262 = vmatprep.subr.bf16.mxu1 %v2119_v3  ;;  %v1951_v12 = vld [vmem:[%s4304_s23 + $0x168] sm:$0xff]  ;;  %v1953_v41 = vld [vmem:[%s4304_s23 + $0x178] sm:$0xff] }
 0x281   : > { %v4435_v29 = vpop.f32.mrb[54].mxu0  ;;  %v1209_v32 = vpop.xlane.xlu1 %1208  ;;  %v2121_v3 = vpack.c.bf16 %v1953_v41, %v1951_v12 }
 0x282   : > { %v4441_v24 = vpop.f32.mrb[55].mxu0  ;;  %v4443_v28 = vpop.eup %3064  ;;  %v1450_v34 = vmul.f32 1.442695, %v1342_v39  ;;  %v1452_v48 = vmul.f32 1.442695, %v1343_v49  ;;  %v1344_v51 = vsub.f32 %v4152_v53, %v1209_v32  ;;  %v1345_v20 = vsub.f32 %v4158_v56, %v1209_v32  ;;  %1625 = vadd.xlane.f32.xlu0 %v1624_v54  ;;  %1286 = vmax.xlane.f32.xlu1 %v5668_v18 }
 0x283   : > { %5667 = vst [vmem:[#allocation60_spill] sm:$0xff] %v4443_v28  ;;  %v4450_v59 = vpop.eup %3066  ;;  %v5670_v54 = vmax.f32 %v4386_v43, %v4390_v35  ;;  %2263 = vmatpush1.bf16.msra.mxu1 %v2118_v27 }
 0x284   : > { %3076 = vpow2.f32 %v1450_v34  ;;  %v1454_v39 = vmul.f32 1.442695, %v1344_v51  ;;  %v1456_v49 = vmul.f32 1.442695, %v1345_v20  ;;  %v1627_v53 = vadd.f32 %v4450_v59, %v4443_v28  ;;  %v1952_v20 = vld [vmem:[%s4304_s23 + $0x170] sm:$0xff]  ;;  %2264 = vmatprep.subr.bf16.mxu1 %v2121_v3  ;;  %v1957_v28 = vld [vmem:[%s4304_s23 + $0x198] sm:$0xff] }
 0x285   : > { %3078 = vpow2.f32 %v1452_v48  ;;  %v1950_v48 = vld [vmem:[%s4304_s23 + $0x160] sm:$0xff] }
 0x286   : > { %v4456_v56 = vpop.eup %3068  ;;  %3080 = vpow2.f32 %v1454_v39  ;;  %1628 = vadd.xlane.f32.xlu1 %v1627_v53  ;;  %1307 = vmax.xlane.f32.xlu0 %v5670_v54  ;;  %v4461_v10 = vpop.f32.mrb[56].mxu0 }
 0x287   : > { %5669 = vst [vmem:[#allocation61_spill] sm:$0xff] %v4456_v56  ;;  %v4465_v32 = vpop.eup %3070  ;;  %3082 = vpow2.f32 %v1456_v49  ;;  %v1212_v34 = vpop.xlane.xlu0 %1211  ;;  %v1955_v49 = vld [vmem:[%s4304_s23 + $0x188] sm:$0xff] }
 0x288   : > { %5671 = vst [vmem:[#allocation62_spill] sm:$0xff] %v4465_v32  ;;  %v4467_v51 = vpop.f32.mrb[57].mxu0  ;;  %v4471_v18 = vpop.eup %3072  ;;  %v1346_v39 = vsub.f32 %v4166_v60, %v1212_v34  ;;  %v1347_v53 = vsub.f32 %v4172_v63, %v1212_v34  ;;  %v1630_v54 = vadd.f32 %v4465_v32, %v4456_v56  ;;  %v2120_v60 = vpack.c.bf16 %v1952_v20, %v1950_v48  ;;  %v1954_v20 = vld [vmem:[%s4304_s23 + $0x180] sm:$0xff] }
 0x289   : > { %5672 = vst [vmem:[#allocation63_spill] sm:$0xff] %v4471_v18  ;;  %v4477_v44 = vpop.f32.mrb[58].mxu0  ;;  %v4481_v27 = vpop.eup %3074  ;;  %v5674_v32 = vmax.f32 %v4397_v31, %v4402_v46  ;;  %v2123_v48 = vpack.c.bf16 %v1957_v28, %v1955_v49 }
 0x28a   : > { %5673 = vst [vmem:[#allocation64_spill] sm:$0xff] %v4481_v27  ;;  %v1215_v12 = vpop.xlane.xlu1 %1214  ;;  %v4483_v41 = vpop.f32.mrb[59].mxu0  ;;  %v1458_v16 = vmul.f32 1.442695, %v1346_v39  ;;  %v1460_v63 = vmul.f32 1.442695, %v1347_v53  ;;  %1631 = vadd.xlane.f32.xlu0 %v1630_v54  ;;  %v1633_v21 = vadd.f32 %v4481_v27, %v4471_v18  ;;  %2265 = vmatpush1.bf16.msra.mxu1 %v2120_v60  ;;  %v5676_v54 = vmax.f32 %v4316_v61, %v4318_v26 }
 0x28b   : > { %v1348_v34 = vsub.f32 %v4176_v1, %v1215_v12  ;;  %v1349_v56 = vsub.f32 %v4182_v4, %v1215_v12  ;;  %1310 = vmax.xlane.f32.xlu1 %v5674_v32  ;;  %v1956_v39 = vld [vmem:[%s4304_s23 + $0x190] sm:$0xff]  ;;  %2266 = vmatprep.subr.bf16.mxu1 %v2123_v48  ;;  %v1959_v12 = vld [vmem:[%s4304_s23 + $0x1a8] sm:$0xff]  ;;  %v1961_v60 = vld [vmem:[%s4304_s23 + $0x1b8] sm:$0xff] }
 0x28c   : > { %3084 = vpow2.f32 %v1458_v16  ;;  %v2122_v53 = vpack.c.bf16 %v1956_v39, %v1954_v20  ;;  %v5682_v39 = vmax.f32 %v4322_v2, %v4328_v52 }
 0x28d   : > { %v1462_v1 = vmul.f32 1.442695, %v1348_v34  ;;  %v1464_v4 = vmul.f32 1.442695, %v1349_v56  ;;  %3086 = vpow2.f32 %v1460_v63 }
 0x28e   : > { %v4498_v32 = vpop.eup %3076  ;;  %1289 = vmax.xlane.f32.xlu0 %v5676_v54  ;;  %v4503_v28 = vpop.f32.mrb[60].mxu0  ;;  %2267 = vmatpush1.bf16.msra.mxu1 %v2122_v53 }
 0x28f   : > { %5675 = vst [vmem:[#allocation65_spill] sm:$0xff] %v4498_v32  ;;  %3088 = vpow2.f32 %v1462_v1  ;;  %1634 = vadd.xlane.f32.xlu1 %v1633_v21  ;;  %v4505_v16 = vpop.eup %3078  ;;  %v1218_v49 = vpop.xlane.xlu0 %1217  ;;  %v1958_v1 = vld [vmem:[%s4304_s23 + $0x1a0] sm:$0xff] }
 0x290   : > { %5677 = vst [vmem:[#allocation66_spill] sm:$0xff] %v4505_v16  ;;  %3090 = vpow2.f32 %v1464_v4  ;;  %v4507_v56 = vpop.f32.mrb[61].mxu0  ;;  %v4511_v63 = vpop.eup %3080  ;;  %v1350_v34 = vsub.f32 %v4190_v8, %v1218_v49  ;;  %v1351_v48 = vsub.f32 %v4196_v11, %v1218_v49  ;;  %v1636_v21 = vadd.f32 %v4505_v16, %v4498_v32  ;;  %v1960_v4 = vld [vmem:[%s4304_s23 + $0x1b0] sm:$0xff] }
 0x291   : > { %5678 = vst [vmem:[#allocation67_spill] sm:$0xff] %v4507_v56  ;;  %5679 = vst [vmem:[#allocation68_spill] sm:$0xff] %v4511_v63  ;;  %v4517_v20 = vpop.f32.mrb[62].mxu0  ;;  %v4523_v53 = vpop.eup %3082  ;;  %v2125_v8 = vpack.c.bf16 %v1961_v60, %v1959_v12  ;;  %v2124_v18 = vpack.c.bf16 %v1960_v4, %v1958_v1  ;;  %v1963_v60 = vld [vmem:[%s4304_s23 + $0x1c8] sm:$0xff]  ;;  %v1964_v1 = vld [vmem:[%s4304_s23 + $0x1d0] sm:$0xff] }
 0x292   : > { %5680 = vst [vmem:[#allocation69_spill] sm:$0xff] %v4517_v20  ;;  %v1221_v54 = vpop.xlane.xlu1 %1220  ;;  %v4525_v3 = vpop.f32.mrb[63].mxu0  ;;  %v1466_v11 = vmul.f32 1.442695, %v1350_v34  ;;  %v1468_v49 = vmul.f32 1.442695, %v1351_v48  ;;  %1637 = vadd.xlane.f32.xlu0 %v1636_v21  ;;  %v1639_v27 = vadd.f32 %v4523_v53, %v4511_v63 }
 0x293   : > { %5681 = vst [vmem:[#allocation70_spill] sm:$0xff] %v4525_v3  ;;  %v1352_v32 = vsub.f32 %v4200_v13, %v1221_v54  ;;  %v1353_v16 = vsub.f32 %v4206_v19, %v1221_v54  ;;  %1292 = vmax.xlane.f32.xlu1 %v5682_v39  ;;  %2268 = vmatprep.subr.bf16.mxu1 %v2125_v8  ;;  %v1965_v34 = vld [vmem:[%s4304_s23 + $0x1d8] sm:$0xff]  ;;  %v1962_v21 = vld [vmem:[%s4304_s23 + $0x1c0] sm:$0xff] }
 0x294   : > { %3092 = vpow2.f32 %v1466_v11  ;;  %2269 = vmatpush1.bf16.msra.mxu1 %v2124_v18  ;;  %v2127_v19 = vpack.c.bf16 %v1965_v34, %v1963_v60  ;;  %v2126_v39 = vpack.c.bf16 %v1964_v1, %v1962_v21  ;;  %v5683_v54 = vmax.f32 %v4425_v0, %v4429_v58  ;;  %v1967_v18 = vld [vmem:[%s4304_s23 + $0x1e8] sm:$0xff]  ;;  %v1969_v8 = vld [vmem:[%s4304_s23 + $0x1f8] sm:$0xff]  ;;  %v1968_v21 = vld [vmem:[%s4304_s23 + $0x1f0] sm:$0xff] }
 0x295   : > { %v1470_v48 = vmul.f32 1.442695, %v1352_v32  ;;  %v1472_v13 = vmul.f32 1.442695, %v1353_v16  ;;  %3094 = vpow2.f32 %v1468_v49  ;;  %v2129_v34 = vpack.c.bf16 %v1969_v8, %v1967_v18  ;;  %v1973_v18 = vld [vmem:[%s4304_s23 + $0x218] sm:$0xff] }
 0x296   : > { %v4540_v4 = vpop.eup %3084  ;;  %1313 = vmax.xlane.f32.xlu0 %v5683_v54  ;;  %2270 = vmatprep.subr.bf16.mxu1 %v2127_v19 }
 0x297   : > { %3096 = vpow2.f32 %v1470_v48  ;;  %1640 = vadd.xlane.f32.xlu1 %v1639_v27  ;;  %v4545_v32 = vpop.eup %3086  ;;  %v1224_v16 = vpop.xlane.xlu0 %1223  ;;  %v1966_v48 = vld [vmem:[%s4304_s23 + $0x1e0] sm:$0xff] }
 0x298   : > { %3098 = vpow2.f32 %v1472_v13  ;;  %v1354_v49 = vsub.f32 %v4214_v42, %v1224_v16  ;;  %v1355_v60 = vsub.f32 %v4220_v57, %v1224_v16  ;;  %v1642_v27 = vadd.f32 %v4545_v32, %v4540_v4  ;;  %2271 = vmatpush1.bf16.msra.mxu1 %v2126_v39  ;;  %v1971_v16 = vld [vmem:[%s4304_s23 + $0x208] sm:$0xff] }
 0x299   : > { %v4549_v11 = vpop.eup %3088  ;;  %v1227_v19 = vpop.xlane.xlu1 %1226  ;;  %v2128_v1 = vpack.c.bf16 %v1968_v21, %v1966_v48  ;;  %v5684_v57 = vmax.f32 %v4435_v29, %v4441_v24  ;;  %2272 = vmatprep.subr.bf16.mxu1 %v2129_v34 }
 0x29a   : > { %v4557_v13 = vpop.eup %3090  ;;  %v1474_v54 = vmul.f32 1.442695, %v1354_v49  ;;  %v1476_v12 = vmul.f32 1.442695, %v1355_v60  ;;  %v1356_v63 = vsub.f32 %v4224_v5, %v1227_v19  ;;  %v1357_v42 = vsub.f32 %v4230_v62, %v1227_v19  ;;  %1643 = vadd.xlane.f32.xlu0 %v1642_v27 }
 0x29b   : > { %1316 = vmax.xlane.f32.xlu1 %v5684_v57  ;;  %v1645_v39 = vadd.f32 %v4557_v13, %v4549_v11  ;;  %v2131_v49 = vpack.c.bf16 %v1973_v18, %v1971_v16  ;;  %v5686_v62 = vmax.f32 %v4336_v45, %v4338_v40  ;;  %v5690_v16 = vmax.f32 %v4344_v15, %v4350_v7 }
 0x29c   : > { %3100 = vpow2.f32 %v1474_v54  ;;  %v1478_v8 = vmul.f32 1.442695, %v1356_v63  ;;  %v1480_v48 = vmul.f32 1.442695, %v1357_v42  ;;  %2273 = vmatpush1.bf16.msra.mxu1 %v2128_v1 }
 0x29d   : > { %3102 = vpow2.f32 %v1476_v12  ;;  %2355 = vmatprep.subr.bf16.mxu1 %v2131_v49 }
 0x29e   : > { %v4568_v5 = vpop.eup %3092  ;;  %3104 = vpow2.f32 %v1478_v8  ;;  %1295 = vmax.xlane.f32.xlu0 %v5686_v62 }
 0x29f   : > { %5685 = vst [vmem:[#allocation71_spill] sm:$0xff] %v4568_v5  ;;  %1646 = vadd.xlane.f32.xlu1 %v1645_v39  ;;  %v4573_v60 = vpop.eup %3094  ;;  %3106 = vpow2.f32 %v1480_v48  ;;  %v1230_v27 = vpop.xlane.xlu0 %1229 }
 0x2a0   : > { %5687 = vst [vmem:[#allocation72_spill] sm:$0xff] %v4573_v60  ;;  %v1358_v63 = vsub.f32 %v4238_v38, %v1230_v27  ;;  %v1359_v21 = vsub.f32 %v4244_v33, %v1230_v27  ;;  %v1648_v12 = vadd.f32 %v4573_v60, %v4568_v5  ;;  %v5692_v27 = vld [vmem:[#allocation25_spill] sm:$0xff] }
 0x2a1   : > { %v4575_v34 = vpop.eup %3096  ;;  %v1233_v1 = vpop.xlane.xlu1 %1232 }
 0x2a2   : > { %5688 = vst [vmem:[#allocation73_spill] sm:$0xff] %v4575_v34  ;;  %v4581_v19 = vpop.eup %3098  ;;  %v1482_v54 = vmul.f32 1.442695, %v1358_v63  ;;  %v1484_v42 = vmul.f32 1.442695, %v1359_v21  ;;  %v1360_v57 = vsub.f32 %v4248_v14, %v1233_v1  ;;  %v1361_v39 = vsub.f32 %v4254_v30, %v1233_v1  ;;  %1649 = vadd.xlane.f32.xlu0 %v1648_v12 }
 0x2a3   : > { %5689 = vst [vmem:[#allocation74_spill] sm:$0xff] %v4581_v19  ;;  %1298 = vmax.xlane.f32.xlu1 %v5690_v16  ;;  %v1236_v38 = vpop.xlane.xlu0 %1235  ;;  %v1651_v33 = vadd.f32 %v4581_v19, %v4575_v34  ;;  %v5693_v21 = vmax.f32 %v4461_v10, %v4467_v51  ;;  %v5698_v16 = vld [vmem:[#allocation27_spill] sm:$0xff]  ;;  %v5701_v34 = vmax.f32 %v4477_v44, %v4483_v41  ;;  %v5715_v19 = vld [vmem:[#allocation37_spill] sm:$0xff] }
 0x2a4   : > { %3108 = vpow2.f32 %v1482_v54  ;;  %v1486_v18 = vmul.f32 1.442695, %v1360_v57  ;;  %v1488_v8 = vmul.f32 1.442695, %v1361_v39  ;;  %v1362_v48 = vsub.f32 %v4090_v22, %v1236_v38 }
 0x2a5   : > { %3110 = vpow2.f32 %v1484_v42  ;;  %v1363_v49 = vsub.f32 %v4092_v23, %v1236_v38  ;;  %v1239_v14 = vpop.xlane.xlu1 %1238  ;;  %v5696_v42 = vld [vmem:[#allocation26_spill] sm:$0xff] }
 0x2a6   : > { %v4592_v62 = vpop.eup %3100  ;;  %3112 = vpow2.f32 %v1486_v18  ;;  %v1364_v30 = vsub.f32 %v4096_v25, %v1239_v14  ;;  %v1365_v63 = vsub.f32 %v5692_v27, %v1239_v14  ;;  %1319 = vmax.xlane.f32.xlu0 %v5693_v21  ;;  %v1490_v22 = vmul.f32 1.442695, %v1362_v48  ;;  %v5699_v27 = vld [vmem:[#allocation28_spill] sm:$0xff] }
 0x2a7   : > { %5691 = vst [vmem:[#allocation75_spill] sm:$0xff] %v4592_v62  ;;  %1652 = vadd.xlane.f32.xlu1 %v1651_v33  ;;  %v4599_v12 = vpop.eup %3102  ;;  %3114 = vpow2.f32 %v1488_v8  ;;  %v1242_v1 = vpop.xlane.xlu0 %1241  ;;  %v1492_v23 = vmul.f32 1.442695, %v1363_v49  ;;  %v5700_v8 = vld [vmem:[#allocation29_spill] sm:$0xff] }
 0x2a8   : > { %5694 = vst [vmem:[#allocation25_spill] sm:$0xff] %v4599_v12  ;;  %v4601_v54 = vpop.eup %3104  ;;  %v1366_v57 = vsub.f32 %v5696_v42, %v1242_v1  ;;  %v1494_v25 = vmul.f32 1.442695, %v1364_v30  ;;  %v1367_v38 = vsub.f32 %v5698_v16, %v1242_v1  ;;  %v1654_v18 = vadd.f32 %v4599_v12, %v4592_v62  ;;  %v5702_v1 = vld [vmem:[#allocation30_spill] sm:$0xff] }
 0x2a9   : > { %5695 = vst [vmem:[#allocation76_spill] sm:$0xff] %v4601_v54  ;;  %v4604_v39 = vpop.eup %3106  ;;  %v1245_v33 = vpop.xlane.xlu1 %1244  ;;  %v1496_v14 = vmul.f32 1.442695, %v1365_v63  ;;  %3116 = vpow2.f32 %v1490_v22  ;;  %v5705_v22 = vld [vmem:[#allocation32_spill] sm:$0xff] }
 0x2aa   : > { %5697 = vst [vmem:[#allocation26_spill] sm:$0xff] %v4604_v39  ;;  %v1368_v21 = vsub.f32 %v5699_v27, %v1245_v33  ;;  %v1369_v48 = vsub.f32 %v5700_v8, %v1245_v33  ;;  %v1498_v49 = vmul.f32 1.442695, %v1366_v57  ;;  %1655 = vadd.xlane.f32.xlu0 %v1654_v18  ;;  %3118 = vpow2.f32 %v1492_v23  ;;  %v5703_v27 = vld [vmem:[#allocation31_spill] sm:$0xff]  ;;  %v5706_v18 = vld [vmem:[#allocation33_spill] sm:$0xff] }
 0x2ab   : > { %1322 = vmax.xlane.f32.xlu1 %v5701_v34  ;;  %v1248_v42 = vpop.xlane.xlu0 %1247  ;;  %v1500_v30 = vmul.f32 1.442695, %v1367_v38  ;;  %v1657_v62 = vadd.f32 %v4604_v39, %v4601_v54  ;;  %3120 = vpow2.f32 %v1494_v25 }
 0x2ac   : > { %v1370_v16 = vsub.f32 %v5702_v1, %v1248_v42  ;;  %v1502_v63 = vmul.f32 1.442695, %v1368_v21  ;;  %v1371_v12 = vsub.f32 %v5703_v27, %v1248_v42  ;;  %3122 = vpow2.f32 %v1496_v14  ;;  %v5708_v1 = vld [vmem:[#allocation54_spill] sm:$0xff] }
 0x2ad   : > { %v1251_v33 = vpop.xlane.xlu1 %1250  ;;  %v1504_v34 = vmul.f32 1.442695, %v1369_v48  ;;  %3124 = vpow2.f32 %v1498_v49  ;;  %v5709_v25 = vmax.f32 %v4360_v37, %v5708_v1  ;;  %v5711_v14 = vld [vmem:[#allocation34_spill] sm:$0xff] }
 0x2ae   : > { %v4618_v8 = vpop.eup %3108  ;;  %v1372_v57 = vsub.f32 %v5705_v22, %v1251_v33  ;;  %v1373_v5 = vsub.f32 %v5706_v18, %v1251_v33  ;;  %v1506_v38 = vmul.f32 1.442695, %v1370_v16  ;;  %3126 = vpow2.f32 %v1500_v30  ;;  %v5716_v30 = vld [vmem:[#allocation55_spill] sm:$0xff] }
 0x2af   : > { %5704 = vst [vmem:[#allocation27_spill] sm:$0xff] %v4618_v8  ;;  %1658 = vadd.xlane.f32.xlu1 %v1657_v62  ;;  %v4622_v23 = vpop.eup %3110  ;;  %1301 = vmax.xlane.f32.xlu0 %v5709_v25  ;;  %v1254_v21 = vpop.xlane.xlu0 %1253  ;;  %v1508_v27 = vmul.f32 1.442695, %v1371_v12  ;;  %3128 = vpow2.f32 %v1502_v63  ;;  %v5713_v62 = vld [vmem:[#allocation35_spill] sm:$0xff]  ;;  %v5714_v25 = vld [vmem:[#allocation36_spill] sm:$0xff] }
 0x2b0   : > { %5707 = vst [vmem:[#allocation28_spill] sm:$0xff] %v4622_v23  ;;  %v4627_v42 = vpop.eup %3112  ;;  %v1374_v48 = vsub.f32 %v5711_v14, %v1254_v21  ;;  %v1510_v33 = vmul.f32 1.442695, %v1372_v57  ;;  %v1375_v22 = vsub.f32 %v5713_v62, %v1254_v21  ;;  %v1660_v49 = vadd.f32 %v4622_v23, %v4618_v8  ;;  %v5717_v12 = vld [vmem:[#allocation56_spill] sm:$0xff]  ;;  %v5719_v21 = vld [vmem:[#allocation38_spill] sm:$0xff] }
 0x2b1   : > { %5710 = vst [vmem:[#allocation29_spill] sm:$0xff] %v4627_v42  ;;  %v4630_v54 = vpop.eup %3114  ;;  %v1257_v18 = vpop.xlane.xlu1 %1256  ;;  %3130 = vpow2.f32 %v1504_v34  ;;  %v1512_v16 = vmul.f32 1.442695, %v1373_v5  ;;  %v5718_v1 = vmax.f32 %v5716_v30, %v5717_v12 }
 0x2b2   : > { %5712 = vst [vmem:[#allocation30_spill] sm:$0xff] %v4630_v54  ;;  %v1376_v39 = vsub.f32 %v5714_v25, %v1257_v18  ;;  %v1377_v60 = vsub.f32 %v5715_v19, %v1257_v18  ;;  %3132 = vpow2.f32 %v1506_v38  ;;  %v1514_v14 = vmul.f32 1.442695, %v1374_v48  ;;  %v5721_v19 = vld [vmem:[#allocation39_spill] sm:$0xff] }
 0x2b3   : > { %1304 = vmax.xlane.f32.xlu1 %v5718_v1  ;;  %1661 = vadd.xlane.f32.xlu0 %v1660_v49  ;;  %v1260_v63 = vpop.xlane.xlu0 %1259  ;;  %3134 = vpow2.f32 %v1508_v27  ;;  %v1516_v57 = vmul.f32 1.442695, %v1375_v22  ;;  %v1663_v34 = vadd.f32 %v4630_v54, %v4627_v42  ;;  %v4643_v5 = vpop.eup %3116  ;;  %v5723_v1 = vld [vmem:[#allocation40_spill] sm:$0xff]  ;;  %v5724_v27 = vld [vmem:[#allocation41_spill] sm:$0xff] }
 0x2b4   : > { %v1378_v62 = vsub.f32 %v5719_v21, %v1260_v63  ;;  %5720 = vst [vmem:[#allocation31_spill] sm:$0xff] %v4643_v5  ;;  %3136 = vpow2.f32 %v1510_v33  ;;  %v1518_v25 = vmul.f32 1.442695, %v1376_v39  ;;  %v1379_v18 = vsub.f32 %v5721_v19, %v1260_v63  ;;  %v4646_v23 = vpop.eup %3118  ;;  %v5731_v54 = vld [vmem:[#allocation44_spill] sm:$0xff] }
 0x2b5   : > { %v1263_v8 = vpop.xlane.xlu1 %1262  ;;  %5722 = vst [vmem:[#allocation32_spill] sm:$0xff] %v4646_v23  ;;  %3138 = vpow2.f32 %v1512_v16  ;;  %v1520_v38 = vmul.f32 1.442695, %v1377_v60  ;;  %v4650_v49 = vpop.eup %3120  ;;  %v5725_v33 = vmax.f32 %v4503_v28, %v4507_v56  ;;  %v5727_v16 = vld [vmem:[#allocation42_spill] sm:$0xff] }
 0x2b6   : > { %v1380_v48 = vsub.f32 %v5723_v1, %v1263_v8  ;;  %v1381_v22 = vsub.f32 %v5724_v27, %v1263_v8  ;;  %3140 = vpow2.f32 %v1514_v14  ;;  %v1522_v21 = vmul.f32 1.442695, %v1378_v62  ;;  %v4655_v63 = vpop.eup %3122 }
 0x2b7   : > { %1664 = vadd.xlane.f32.xlu1 %v1663_v34  ;;  %1325 = vmax.xlane.f32.xlu0 %v5725_v33  ;;  %v1266_v39 = vpop.xlane.xlu0 %1265  ;;  %5726 = vst [vmem:[#allocation33_spill] sm:$0xff] %v4655_v63  ;;  %3142 = vpow2.f32 %v1516_v57  ;;  %v1524_v19 = vmul.f32 1.442695, %v1379_v18  ;;  %v4658_v42 = vpop.eup %3124  ;;  %v5729_v34 = vld [vmem:[#allocation43_spill] sm:$0xff]  ;;  %v1666_v14 = vadd.f32 %v4646_v23, %v4643_v5  ;;  %v5732_v57 = vld [vmem:[#allocation45_spill] sm:$0xff] }
 0x2b8   : > { %v1382_v60 = vsub.f32 %v5727_v16, %v1266_v39  ;;  %5728 = vst [vmem:[#allocation34_spill] sm:$0xff] %v4658_v42  ;;  %3144 = vpow2.f32 %v1518_v25  ;;  %v1526_v8 = vmul.f32 1.442695, %v1380_v48  ;;  %v1383_v1 = vsub.f32 %v5729_v34, %v1266_v39  ;;  %v4663_v62 = vpop.eup %3126 }
 0x2b9   : > { %v1269_v27 = vpop.xlane.xlu1 %1268  ;;  %5730 = vst [vmem:[#allocation35_spill] sm:$0xff] %v4663_v62  ;;  %3146 = vpow2.f32 %v1520_v38  ;;  %v1528_v33 = vmul.f32 1.442695, %v1381_v22  ;;  %v5733_v16 = vmax.f32 %v4517_v20, %v4525_v3  ;;  %v4670_v25 = vpop.eup %3128  ;;  %v5736_v38 = vld [vmem:[#allocation46_spill] sm:$0xff] }
 0x2ba   : > { %v1384_v56 = vsub.f32 %v5731_v54, %v1269_v27  ;;  %v1385_v18 = vsub.f32 %v5732_v57, %v1269_v27  ;;  %5734 = vst [vmem:[#allocation36_spill] sm:$0xff] %v4670_v25  ;;  %3148 = vpow2.f32 %v1522_v21  ;;  %v1530_v48 = vmul.f32 1.442695, %v1382_v60 }
 0x2bb   : > { %1328 = vmax.xlane.f32.xlu1 %v5733_v16  ;;  %1667 = vadd.xlane.f32.xlu0 %v1666_v14  ;;  %v1272_v39 = vpop.xlane.xlu0 %1271  ;;  %v4672_v34 = vpop.eup %3130  ;;  %3150 = vpow2.f32 %v1524_v19  ;;  %v1532_v23 = vmul.f32 1.442695, %v1383_v1  ;;  %v1669_v54 = vadd.f32 %v4655_v63, %v4650_v49  ;;  %v5738_v16 = vld [vmem:[#allocation47_spill] sm:$0xff]  ;;  %v1672_v21 = vadd.f32 %v4663_v62, %v4658_v42  ;;  %v5739_v1 = vld [vmem:[#allocation48_spill] sm:$0xff]  ;;  %v5742_v42 = vld [vmem:[#allocation50_spill] sm:$0xff] }
 0x2bc   : > { %5735 = vst [vmem:[#allocation37_spill] sm:$0xff] %v4672_v34  ;;  %v1386_v22 = vsub.f32 %v5736_v38, %v1272_v39  ;;  %v4677_v27 = vpop.eup %3132  ;;  %3152 = vpow2.f32 %v1526_v8  ;;  %v1534_v57 = vmul.f32 1.442695, %v1384_v56  ;;  %v1387_v5 = vsub.f32 %v5738_v16, %v1272_v39  ;;  %v5740_v38 = vld [vmem:[#allocation49_spill] sm:$0xff] }
 0x2bd   : > { %5737 = vst [vmem:[#allocation55_spill] sm:$0xff] %v4677_v27  ;;  %v1275_v3 = vpop.xlane.xlu1 %1274  ;;  %v4682_v60 = vpop.eup %3134  ;;  %3154 = vpow2.f32 %v1528_v33  ;;  %v1536_v19 = vmul.f32 1.442695, %v1385_v18  ;;  %v1675_v33 = vadd.f32 %v4672_v34, %v4670_v25  ;;  %v5748_v34 = vld [vmem:[#allocation53_spill] sm:$0xff] }
 0x2be   : > { %v1388_v14 = vsub.f32 %v5739_v1, %v1275_v3  ;;  %v1389_v20 = vsub.f32 %v5740_v38, %v1275_v3  ;;  %v4686_v63 = vpop.eup %3136  ;;  %3156 = vpow2.f32 %v1530_v48  ;;  %v1538_v8 = vmul.f32 1.442695, %v1386_v22 }
 0x2bf   : > { %1670 = vadd.xlane.f32.xlu1 %v1669_v54  ;;  %5741 = vst [vmem:[#allocation56_spill] sm:$0xff] %v4686_v63  ;;  %1673 = vadd.xlane.f32.xlu0 %v1672_v21  ;;  %v1278_v56 = vpop.xlane.xlu0 %1277  ;;  %v4688_v39 = vpop.eup %3138  ;;  %3158 = vpow2.f32 %v1532_v23  ;;  %v1540_v16 = vmul.f32 1.442695, %v1387_v5  ;;  %v5744_v54 = vld [vmem:[#allocation51_spill] sm:$0xff]  ;;  %v1678_v48 = vadd.f32 %v4682_v60, %v4677_v27  ;;  %v5746_v5 = vld [vmem:[#allocation52_spill] sm:$0xff] }
 0x2c0   : > { %v1390_v62 = vsub.f32 %v5742_v42, %v1278_v56  ;;  %v4693_v18 = vpop.eup %3140  ;;  %3160 = vpow2.f32 %v1534_v57  ;;  %v1542_v3 = vmul.f32 1.442695, %v1388_v14  ;;  %v1391_v1 = vsub.f32 %v5744_v54, %v1278_v56 }
 0x2c1   : > { %5743 = vst [vmem:[#allocation38_spill] sm:$0xff] %v4693_v18  ;;  %v1281_v38 = vpop.xlane.xlu1 %1280  ;;  %v4698_v22 = vpop.eup %3142  ;;  %3162 = vpow2.f32 %v1536_v19  ;;  %v1544_v23 = vmul.f32 1.442695, %v1389_v20  ;;  %v1681_v54 = vadd.f32 %v4688_v39, %v4686_v63 }
 0x2c2   : > { %5745 = vst [vmem:[#allocation39_spill] sm:$0xff] %v4698_v22  ;;  %v1392_v21 = vsub.f32 %v5746_v5, %v1281_v38  ;;  %v4701_v42 = vpop.eup %3144  ;;  %3164 = vpow2.f32 %v1538_v8  ;;  %v1546_v25 = vmul.f32 1.442695, %v1390_v62  ;;  %v1393_v57 = vsub.f32 %v5748_v34, %v1281_v38 }
 0x2c3   : > { %1676 = vadd.xlane.f32.xlu1 %v1675_v33  ;;  %5747 = vst [vmem:[#allocation40_spill] sm:$0xff] %v4701_v42  ;;  %1679 = vadd.xlane.f32.xlu0 %v1678_v48  ;;  %v4704_v14 = vpop.eup %3146  ;;  %3166 = vpow2.f32 %v1540_v16  ;;  %v1548_v56 = vmul.f32 1.442695, %v1391_v1  ;;  %v1684_v20 = vadd.f32 %v4698_v22, %v4693_v18  ;;  %v4855_v22 = vld [vmem:[%s4304_s23 + $0x230] sm:$0xff] }
 0x2c4   : > { %5749 = vst [vmem:[#allocation41_spill] sm:$0xff] %v4704_v14  ;;  %v4708_v27 = vpop.eup %3148  ;;  %3168 = vpow2.f32 %v1542_v3  ;;  %v1550_v62 = vmul.f32 1.442695, %v1392_v21  ;;  %v1552_v8 = vmul.f32 1.442695, %v1393_v57  ;;  %v1687_v33 = vadd.f32 %v4704_v14, %v4701_v42 }
 0x2c5   : > { %5750 = vst [vmem:[#allocation42_spill] sm:$0xff] %v4708_v27  ;;  %v4712_v19 = vpop.eup %3150  ;;  %3170 = vpow2.f32 %v1544_v23 }
 0x2c6   : > { %5751 = vst [vmem:[#allocation43_spill] sm:$0xff] %v4712_v19  ;;  %v4714_v34 = vpop.eup %3152  ;;  %3172 = vpow2.f32 %v1546_v25  ;;  %v1690_v1 = vadd.f32 %v4712_v19, %v4708_v27  ;;  %v2049_v27 = vld [vmem:[%s4304_s23 + $0x478] sm:$0xff] }
 0x2c7   : > { %1682 = vadd.xlane.f32.xlu1 %v1681_v54  ;;  %5752 = vst [vmem:[#allocation44_spill] sm:$0xff] %v4714_v34  ;;  %1685 = vadd.xlane.f32.xlu0 %v1684_v20  ;;  %v4716_v16 = vpop.eup %3154  ;;  %3174 = vpow2.f32 %v1548_v56 }
 0x2c8   : > { %5753 = vst [vmem:[#allocation45_spill] sm:$0xff] %v4716_v16  ;;  %v4720_v3 = vpop.eup %3156  ;;  %3176 = vpow2.f32 %v1550_v62  ;;  %v1693_v23 = vadd.f32 %v4716_v16, %v4714_v34  ;;  %v2057_v16 = vld [vmem:[%s4304_s23 + $0x4b8] sm:$0xff] }
 0x2c9   : > { %5754 = vst [vmem:[#allocation46_spill] sm:$0xff] %v4720_v3  ;;  %v4724_v38 = vpop.eup %3158  ;;  %3178 = vpow2.f32 %v1552_v8 }
 0x2ca   : > { %5755 = vst [vmem:[#allocation47_spill] sm:$0xff] %v4724_v38  ;;  %v4726_v48 = vpop.eup %3160  ;;  %v1696_v21 = vadd.f32 %v4724_v38, %v4720_v3 }
 0x2cb   : > { %1688 = vadd.xlane.f32.xlu1 %v1687_v33  ;;  %5756 = vst [vmem:[#allocation48_spill] sm:$0xff] %v4726_v48  ;;  %1691 = vadd.xlane.f32.xlu0 %v1690_v1  ;;  %v4728_v25 = vpop.eup %3162 }
 0x2cc   : > { %5757 = vst [vmem:[#allocation49_spill] sm:$0xff] %v4728_v25  ;;  %v4732_v5 = vpop.eup %3164  ;;  %v1699_v20 = vadd.f32 %v4728_v25, %v4726_v48  ;;  %v2039_v48 = vld [vmem:[%s4304_s23 + $0x428] sm:$0xff] }
 0x2cd   : > { %5758 = vst [vmem:[#allocation50_spill] sm:$0xff] %v4732_v5  ;;  %v4736_v57 = vpop.eup %3166 }
 0x2ce   : > { %5759 = vst [vmem:[#allocation51_spill] sm:$0xff] %v4736_v57  ;;  %v4738_v56 = vpop.eup %3168  ;;  %v1702_v8 = vadd.f32 %v4736_v57, %v4732_v5 }
 0x2cf   : > { %1694 = vadd.xlane.f32.xlu1 %v1693_v23  ;;  %5760 = vst [vmem:[#allocation52_spill] sm:$0xff] %v4738_v56  ;;  %1697 = vadd.xlane.f32.xlu0 %v1696_v21  ;;  %v4740_v54 = vpop.eup %3170 }
 0x2d0   : > { %5761 = vst [vmem:[#allocation53_spill] sm:$0xff] %v4740_v54  ;;  %v4744_v62 = vpop.eup %3172  ;;  %v1705_v23 = vadd.f32 %v4740_v54, %v4738_v56  ;;  %v2034_v56 = vld [vmem:[%s4304_s23 + $0x400] sm:$0xff]  ;;  %v2036_v54 = vld [vmem:[%s4304_s23 + $0x410] sm:$0xff] }
 0x2d1   : > { %5762 = vst [vmem:[#allocation77_spill] sm:$0xff] %v4744_v62  ;;  %v4748_v33 = vpop.eup %3174 }
 0x2d2   : > { %5763 = vst [vmem:[#allocation78_spill] sm:$0xff] %v4748_v33  ;;  %v4750_v1 = vpop.eup %3176  ;;  %v1708_v3 = vadd.f32 %v4748_v33, %v4744_v62  ;;  %v4767_v62 = vpack.c.bf16 %v2036_v54, %v2034_v56  ;;  %v2043_v56 = vld [vmem:[%s4304_s23 + $0x448] sm:$0xff]  ;;  %v2045_v54 = vld [vmem:[%s4304_s23 + $0x458] sm:$0xff] }
 0x2d3   : > { %1700 = vadd.xlane.f32.xlu1 %v1699_v20  ;;  %1703 = vadd.xlane.f32.xlu0 %v1702_v8  ;;  %5764 = vst [vmem:[#allocation79_spill] sm:$0xff] %v4750_v1  ;;  %v4754_v21 = vpop.eup %3178  ;;  %v2035_v20 = vld [vmem:[%s4304_s23 + $0x408] sm:$0xff]  ;;  %v2037_v8 = vld [vmem:[%s4304_s23 + $0x418] sm:$0xff]  ;;  %v4782_v33 = vpack.c.bf16 %v2045_v54, %v2043_v56 }
 0x2d4   : > { %5765 = vst [vmem:[#allocation80_spill] sm:$0xff] %v4754_v21  ;;  %v1711_v5 = vadd.f32 %v4754_v21, %v4750_v1  ;;  %v4762_v57 = vpack.c.bf16 %v2037_v8, %v2035_v20  ;;  %v2040_v20 = vld [vmem:[%s4304_s23 + $0x430] sm:$0xff]  ;;  %v2042_v21 = vld [vmem:[%s4304_s23 + $0x440] sm:$0xff] }
 0x2d5   : > { %5767 = vst [vmem:[#allocation82_spill] sm:$0xff] %v4782_v33 }
 0x2d6   : > { %2468 = vmatprep.subr.bf16.mxu0 %v4762_v57 }
 0x2d7   : > { %1706 = vadd.xlane.f32.xlu1 %v1705_v23  ;;  %1709 = vadd.xlane.f32.xlu0 %v1708_v3  ;;  %v2041_v3 = vld [vmem:[%s4304_s23 + $0x438] sm:$0xff] }
 0x2d8   : > { %v4771_v23 = vpack.c.bf16 %v2041_v3, %v2039_v48  ;;  %2469 = vmatpush1.bf16.msra.mxu0 %v4767_v62  ;;  %v2044_v48 = vld [vmem:[%s4304_s23 + $0x450] sm:$0xff]  ;;  %v2047_v3 = vld [vmem:[%s4304_s23 + $0x468] sm:$0xff] }
 0x2d9   : > { %v4787_v38 = vpack.c.bf16 %v2044_v48, %v2042_v21  ;;  %v2048_v21 = vld [vmem:[%s4304_s23 + $0x470] sm:$0xff] }
 0x2da   : > { %2470 = vmatprep.subr.bf16.mxu0 %v4771_v23 }
 0x2db   : > { %1712 = vadd.xlane.f32.xlu1 %v1711_v5  ;;  %v2038_v5 = vld [vmem:[%s4304_s23 + $0x420] sm:$0xff]  ;;  %5768 = vst [vmem:[#allocation83_spill] sm:$0xff] %v4787_v38 }
 0x2dc   : > { %v4777_v8 = vpack.c.bf16 %v2040_v20, %v2038_v5  ;;  %v4791_v5 = vpack.c.bf16 %v2049_v27, %v2047_v3 }
 0x2de   : > { %5766 = vst [vmem:[#allocation81_spill] sm:$0xff] %v4777_v8  ;;  %2471 = vmatpush1.bf16.msra.mxu0 %v4777_v8  ;;  %5769 = vst [vmem:[#allocation84_spill] sm:$0xff] %v4791_v5  ;;  %v2071_v8 = vld [vmem:[%s4304_s23 + $0x528] sm:$0xff] }
 0x2df   : > { %2472 = vmatprep.subr.bf16.mxu0 %v4782_v33  ;;  %v2068_v33 = vld [vmem:[%s4304_s23 + $0x510] sm:$0xff] }
 0x2e2   : > { %2473 = vmatpush1.bf16.msra.mxu0 %v4787_v38  ;;  %v4873_v38 = vld [vmem:[%s4304_s23 + $0x258] sm:$0xff] }
 0x2e3   : > { %2474 = vmatprep.subr.bf16.mxu0 %v4791_v5 }
 0x307   : > { %v1620_v1 = vpop.xlane.xlu0 %1619 }
 0x308   : > { %3180 = vrcp.f32 %v1620_v1  ;;  %v2046_v1 = vld [vmem:[%s4304_s23 + $0x460] sm:$0xff] }
 0x309   : > { %v4799_v27 = vpack.c.bf16 %v2048_v21, %v2046_v1  ;;  %v2050_v1 = vld [vmem:[%s4304_s23 + $0x480] sm:$0xff] }
 0x30b   : > { %v1623_v20 = vpop.xlane.xlu1 %1622  ;;  %v1284_v25 = vpop.xlane.xlu0 %1283  ;;  %5770 = vst [vmem:[#allocation85_spill] sm:$0xff] %v4799_v27  ;;  %2475 = vmatpush1.bf16.msra.mxu0 %v4799_v27 }
 0x30c   : > { %3182 = vrcp.f32 %v1623_v20  ;;  %v1394_v56 = vsub.f32 %v4291_v6, %v1284_v25  ;;  %v1395_v54 = vsub.f32 %v4293_v50, %v1284_v25  ;;  %v2051_v6 = vld [vmem:[%s4304_s23 + $0x488] sm:$0xff]  ;;  %v2053_v50 = vld [vmem:[%s4304_s23 + $0x498] sm:$0xff] }
 0x30d   : > { %v4806_v18 = vpack.c.bf16 %v2053_v50, %v2051_v6  ;;  %v4824_v50 = vld [vmem:[%s4304_s23 + $0x228] sm:$0xff] }
 0x30e   : > { %v1554_v48 = vmul.f32 1.442695, %v1394_v56  ;;  %v1556_v3 = vmul.f32 1.442695, %v1395_v54  ;;  %v2052_v56 = vld [vmem:[%s4304_s23 + $0x490] sm:$0xff]  ;;  %v2055_v54 = vld [vmem:[%s4304_s23 + $0x4a8] sm:$0xff] }
 0x30f   : > { %v1626_v34 = vpop.xlane.xlu0 %1625  ;;  %v1287_v19 = vpop.xlane.xlu1 %1286  ;;  %5771 = vst [vmem:[#allocation86_spill] sm:$0xff] %v4806_v18  ;;  %v4811_v21 = vpack.c.bf16 %v2052_v56, %v2050_v1  ;;  %2476 = vmatprep.subr.bf16.mxu0 %v4806_v18  ;;  %v2054_v1 = vld [vmem:[%s4304_s23 + $0x4a0] sm:$0xff]  ;;  %v2056_v56 = vld [vmem:[%s4304_s23 + $0x4b0] sm:$0xff] }
 0x310   : > { %3184 = vpow2.f32 %v1554_v48  ;;  %v1396_v25 = vsub.f32 %v4295_v9, %v1287_v19  ;;  %v1397_v20 = vsub.f32 %v4299_v55, %v1287_v19  ;;  %v4815_v48 = vld [vmem:[%s4304_s23 + $0x200] sm:$0xff]  ;;  %v4818_v9 = vld [vmem:[%s4304_s23 + $0x210] sm:$0xff]  ;;  %v4821_v55 = vpack.c.bf16 %v2057_v16, %v2055_v54 }
 0x311   : > { %3186 = vpow2.f32 %v1556_v3  ;;  %5772 = vst [vmem:[#allocation87_spill] sm:$0xff] %v4811_v21  ;;  %v4827_v3 = vld [vmem:[%s4304_s23 + $0x238] sm:$0xff]  ;;  %2477 = vmatpush1.bf16.msra.mxu0 %v4811_v21  ;;  %v2130_v16 = vpack.c.bf16 %v4818_v9, %v4815_v48  ;;  %v4837_v54 = vpack.c.bf16 %v2056_v56, %v2054_v1  ;;  %v5776_v9 = vld [vmem:[#allocation58_spill] sm:$0xff]  ;;  %v2058_v56 = vld [vmem:[%s4304_s23 + $0x4c0] sm:$0xff] }
 0x312   : > { %3188 = vrcp.f32 %v1626_v34  ;;  %v1558_v42 = vmul.f32 1.442695, %v1396_v25  ;;  %v1560_v27 = vmul.f32 1.442695, %v1397_v20  ;;  %5773 = vst [vmem:[#allocation88_spill] sm:$0xff] %v4821_v55  ;;  %v3181_v34 = vpop.eup %3180  ;;  %2478 = vmatprep.subr.bf16.mxu0 %v4821_v55 }
 0x313   : > { %v1629_v19 = vpop.xlane.xlu1 %1628  ;;  %v1308_v6 = vpop.xlane.xlu0 %1307  ;;  %5774 = vst [vmem:[#allocation89_spill] sm:$0xff] %v4837_v54  ;;  %v1811_v1 = vmul.f32 %v3181_v34, %v5776_v9  ;;  %v2065_v9 = vld [vmem:[%s4304_s23 + $0x4f8] sm:$0xff] }
 0x314   : > { %3190 = vpow2.f32 %v1558_v42  ;;  %v1410_v25 = vsub.f32 %v4386_v43, %v1308_v6  ;;  %v1411_v20 = vsub.f32 %v4390_v35, %v1308_v6  ;;  %v5775_v6 = vld [vmem:[#allocation57_spill] sm:$0xff] }
 0x315   : > { %3192 = vpow2.f32 %v1560_v27  ;;  %v1810_v55 = vmul.f32 %v3181_v34, %v5775_v6  ;;  %2479 = vmatpush1.bf16.msra.mxu0 %v4837_v54  ;;  %v4852_v35 = vld [vmem:[%s4304_s23 + $0x220] sm:$0xff] }
 0x316   : > { %v3183_v21 = vpop.eup %3182  ;;  %3194 = vrcp.f32 %v1629_v19  ;;  %v1586_v42 = vmul.f32 1.442695, %v1410_v25  ;;  %v1588_v43 = vmul.f32 1.442695, %v1411_v20  ;;  %v2059_v25 = vld [vmem:[%s4304_s23 + $0x4c8] sm:$0xff]  ;;  %v2061_v20 = vld [vmem:[%s4304_s23 + $0x4d8] sm:$0xff] }
 0x317   : > { %v1812_v27 = vmul.f32 %v3183_v21, %v4406_v36  ;;  %v1632_v18 = vpop.xlane.xlu0 %1631  ;;  %v1813_v19 = vmul.f32 %v3183_v21, %v4410_v47  ;;  %v4857_v34 = vpack.c.bf16 %v2061_v20, %v2059_v25  ;;  %v2060_v47 = vld [vmem:[%s4304_s23 + $0x4d0] sm:$0xff]  ;;  %v2063_v21 = vld [vmem:[%s4304_s23 + $0x4e8] sm:$0xff] }
 0x318   : > { %v1311_v48 = vpop.xlane.xlu1 %1310  ;;  %3196 = vpow2.f32 %v1586_v42  ;;  %v4863_v42 = vld [vmem:[%s4304_s23 + $0x248] sm:$0xff]  ;;  %v4865_v5 = vpack.c.bf16 %v2060_v47, %v2058_v56  ;;  %v4882_v56 = vld [vmem:[%s4304_s23 + $0x240] sm:$0xff] }
 0x319   : > { %v1412_v36 = vsub.f32 %v4397_v31, %v1311_v48  ;;  %v1413_v6 = vsub.f32 %v4402_v46, %v1311_v48  ;;  %5777 = vst [vmem:[#allocation57_spill] sm:$0xff] %v4857_v34  ;;  %3198 = vpow2.f32 %v1588_v43  ;;  %v2195_v54 = vpack.c.bf16 %v1813_v19, %v1811_v1  ;;  %v2062_v31 = vld [vmem:[%s4304_s23 + $0x4e0] sm:$0xff]  ;;  %v2064_v46 = vld [vmem:[%s4304_s23 + $0x4f0] sm:$0xff]  ;;  %v2067_v48 = vld [vmem:[%s4304_s23 + $0x508] sm:$0xff]  ;;  %2480 = vmatprep.subr.bf16.mxu0 %v4857_v34 }
 0x31a   : > { %v2194_v14 = vpack.c.bf16 %v1812_v27, %v1810_v55  ;;  %5778 = vst [vmem:[#allocation58_spill] sm:$0xff] %v4865_v5  ;;  %v4870_v63 = vpop.eup %3184  ;;  %3200 = vrcp.f32 %v1632_v18  ;;  %v4876_v55 = vpack.c.bf16 %v2065_v9, %v2063_v21  ;;  %v2069_v43 = vld [vmem:[%s4304_s23 + $0x518] sm:$0xff]  ;;  %v4885_v18 = vld [vmem:[%s4304_s23 + $0x250] sm:$0xff]  ;;  %2481 = vmatpush1.bf16.msra.mxu0 %v4865_v5  ;;  %v2066_v47 = vld [vmem:[%s4304_s23 + $0x500] sm:$0xff] }
 0x31b   : > { %v1590_v25 = vmul.f32 1.442695, %v1412_v36  ;;  %v1592_v20 = vmul.f32 1.442695, %v1413_v6  ;;  %v4879_v27 = vpop.eup %3186  ;;  %2274 = vmatprep.mubr.bf16.mxu1 %v2195_v54  ;;  %v1290_v1 = vpop.xlane.xlu0 %1289  ;;  %v4888_v36 = vpack.c.bf16 %v2064_v46, %v2062_v31  ;;  %v4890_v6 = vpack.c.bf16 %v2069_v43, %v2067_v48  ;;  %v2073_v5 = vld [vmem:[%s4304_s23 + $0x538] sm:$0xff] }
 0x31c   : > { %v1635_v19 = vpop.xlane.xlu1 %1634  ;;  %v3189_v21 = vpop.eup %3188  ;;  %v1398_v54 = vsub.f32 %v4316_v61, %v1290_v1  ;;  %v1399_v9 = vsub.f32 %v4318_v26, %v1290_v1  ;;  %2275 = vmatmul.mubr.bf16.vlgmr.msra.gmra.mrb[32].mxu1 %v2194_v14  ;;  %v1714_v34 = vadd.f32 %v4879_v27, %v4870_v63  ;;  %2482 = vmatprep.subr.bf16.mxu0 %v4876_v55  ;;  %v1985_v43 = vld [vmem:[%s4304_s23 + $0x278] sm:$0xff] }
 0x31d   : > { %3202 = vpow2.f32 %v1590_v25  ;;  %2356 = vmatpush1.bf16.msra.mxu1 %v2130_v16  ;;  %v2132_v31 = vpack.c.bf16 %v4855_v22, %v4852_v35  ;;  %v5779_v14 = vpack.c.bf16 %v4827_v3, %v4824_v50  ;;  %v2135_v48 = vpack.c.bf16 %v4873_v38, %v4863_v42  ;;  %v2070_v3 = vld [vmem:[%s4304_s23 + $0x520] sm:$0xff] }
 0x31e   : > { %3204 = vpow2.f32 %v1592_v20  ;;  %v4903_v46 = vpop.eup %3190  ;;  %v1562_v61 = vmul.f32 1.442695, %v1398_v54  ;;  %v1564_v26 = vmul.f32 1.442695, %v1399_v9  ;;  %1715 = vadd.xlane.f32.xlu0 %v1714_v34  ;;  %v1815_v22 = vmul.f32 %v3189_v21, %v4427_v17  ;;  %v4916_v34 = vld [vmem:[%s4304_s23 + $0x268] sm:$0xff]  ;;  %2483 = vmatpush1.bf16.msra.mxu0 %v4888_v36  ;;  %v5782_v54 = vld [vmem:[#allocation60_spill] sm:$0xff] }
 0x31f   : > { %3206 = vrcp.f32 %v1635_v19  ;;  %2357 = vmatprep.subr.bf16.mxu1 %v5779_v14  ;;  %v4910_v25 = vpop.eup %3192  ;;  %v1638_v16 = vpop.xlane.xlu0 %1637  ;;  %v2134_v35 = vpack.c.bf16 %v4885_v18, %v4882_v56  ;;  %v4920_v50 = vpack.c.bf16 %v2068_v33, %v2066_v47  ;;  %v4922_v38 = vpack.c.bf16 %v2073_v5, %v2071_v8  ;;  %2484 = vmatprep.subr.bf16.mxu0 %v4890_v6  ;;  %v2072_v56 = vld [vmem:[%s4304_s23 + $0x530] sm:$0xff]  ;;  %v2075_v18 = vld [vmem:[%s4304_s23 + $0x548] sm:$0xff]  ;;  %v2077_v33 = vld [vmem:[%s4304_s23 + $0x558] sm:$0xff] }
 0x320   : > { %5780 = vst [vmem:[#allocation90_spill] sm:$0xff] %v4910_v25  ;;  %v1293_v20 = vpop.xlane.xlu1 %1292  ;;  %v3195_v42 = vpop.eup %3194  ;;  %3208 = vpow2.f32 %v1562_v61  ;;  %v1717_v19 = vadd.f32 %v4910_v25, %v4903_v46  ;;  %v5781_v5 = vld [vmem:[#allocation59_spill] sm:$0xff]  ;;  %v2137_v14 = vpack.c.bf16 %v1985_v43, %v4916_v34  ;;  %v1989_v25 = vld [vmem:[%s4304_s23 + $0x298] sm:$0xff]  ;;  %v4951_v34 = vpack.c.bf16 %v2077_v33, %v2075_v18 }
 0x321   : > { %v1400_v1 = vsub.f32 %v4322_v2, %v1293_v20  ;;  %v1401_v17 = vsub.f32 %v4328_v52, %v1293_v20  ;;  %3210 = vpow2.f32 %v1564_v26  ;;  %2358 = vmatpush1.bf16.msra.mxu1 %v2132_v31  ;;  %v1817_v8 = vmul.f32 %v3195_v42, %v4450_v59  ;;  %v1982_v26 = vld [vmem:[%s4304_s23 + $0x260] sm:$0xff]  ;;  %v1984_v31 = vld [vmem:[%s4304_s23 + $0x270] sm:$0xff] }
 0x322   : > { %v1814_v47 = vmul.f32 %v3189_v21, %v5781_v5  ;;  %v1816_v2 = vmul.f32 %v3195_v42, %v5782_v54  ;;  %v4936_v52 = vpop.eup %3196  ;;  %3212 = vrcp.f32 %v1638_v16  ;;  %1718 = vadd.xlane.f32.xlu1 %v1717_v19  ;;  %2359 = vmatprep.subr.bf16.mxu1 %v2135_v48  ;;  %v1987_v54 = vld [vmem:[%s4304_s23 + $0x288] sm:$0xff]  ;;  %v4946_v16 = vld [vmem:[%s4304_s23 + $0x280] sm:$0xff]  ;;  %v4949_v48 = vpack.c.bf16 %v2072_v56, %v2070_v3  ;;  %v4958_v19 = vld [vmem:[%s4304_s23 + $0x290] sm:$0xff] }
 0x323   : > { %v1566_v9 = vmul.f32 1.442695, %v1400_v1  ;;  %v1568_v61 = vmul.f32 1.442695, %v1401_v17  ;;  %v4941_v20 = vpop.eup %3198  ;;  %v2197_v59 = vpack.c.bf16 %v1817_v8, %v1815_v22  ;;  %v1314_v42 = vpop.xlane.xlu0 %1313  ;;  %2485 = vmatpush1.bf16.msra.mxu0 %v4920_v50  ;;  %v2074_v8 = vld [vmem:[%s4304_s23 + $0x540] sm:$0xff]  ;;  %v2136_v3 = vpack.c.bf16 %v1984_v31, %v1982_v26 }
 0x324   : > { %v1641_v21 = vpop.xlane.xlu1 %1640  ;;  %v2196_v5 = vpack.c.bf16 %v1816_v2, %v1814_v47  ;;  %v3201_v43 = vpop.eup %3200  ;;  %v1414_v1 = vsub.f32 %v4425_v0, %v1314_v42  ;;  %v1415_v22 = vsub.f32 %v4429_v58, %v1314_v42  ;;  %v1738_v17 = vadd.f32 %v4941_v20, %v4936_v52  ;;  %2486 = vmatprep.subr.bf16.mxu0 %v4922_v38  ;;  %v2076_v47 = vld [vmem:[%s4304_s23 + $0x550] sm:$0xff]  ;;  %v5784_v42 = vld [vmem:[#allocation62_spill] sm:$0xff] }
 0x325   : > { %3214 = vpow2.f32 %v1566_v9  ;;  %2284 = vmatprep.mubr.bf16.mxu1 %v2197_v59  ;;  %2360 = vmatpush1.bf16.msra.mxu1 %v2134_v35  ;;  %v2139_v58 = vpack.c.bf16 %v1989_v25, %v1987_v54  ;;  %v2138_v35 = vpack.c.bf16 %v4958_v19, %v4946_v16  ;;  %v4971_v26 = vpack.c.bf16 %v2076_v47, %v2074_v8  ;;  %v5785_v54 = vld [vmem:[#allocation64_spill] sm:$0xff] }
 0x326   : > { %3216 = vpow2.f32 %v1568_v61  ;;  %v1594_v18 = vmul.f32 1.442695, %v1414_v1  ;;  %v1596_v0 = vmul.f32 1.442695, %v1415_v22  ;;  %2285 = vmatmul.mubr.bf16.gmra.mrb[36].mxu1 %v2196_v5  ;;  %1739 = vadd.xlane.f32.xlu0 %v1738_v17  ;;  %v1819_v61 = vmul.f32 %v3201_v43, %v5784_v42  ;;  %v1993_v5 = vld [vmem:[%s4304_s23 + $0x2b8] sm:$0xff]  ;;  %v5786_v1 = vld [vmem:[#allocation61_spill] sm:$0xff] }
 0x327   : > { %v4963_v56 = vpop.eup %3202  ;;  %3218 = vrcp.f32 %v1641_v21  ;;  %v1644_v2 = vpop.xlane.xlu0 %1643  ;;  %2361 = vmatprep.subr.bf16.mxu1 %v2137_v14  ;;  %2487 = vmatpush1.bf16.msra.mxu0 %v4949_v48  ;;  %v1991_v21 = vld [vmem:[%s4304_s23 + $0x2a8] sm:$0xff]  ;;  %v1818_v22 = vmul.f32 %v3201_v43, %v5786_v1  ;;  %v5787_v17 = vld [vmem:[#allocation63_spill] sm:$0xff] }
 0x328   : > { %v4965_v33 = vpop.eup %3204  ;;  %v1317_v9 = vpop.xlane.xlu1 %1316  ;;  %3220 = vpow2.f32 %v1594_v18  ;;  %2488 = vmatprep.subr.bf16.mxu0 %v4951_v34  ;;  %v2141_v1 = vpack.c.bf16 %v1993_v5, %v1991_v21 }
 0x329   : > { %5783 = vst [vmem:[#allocation59_spill] sm:$0xff] %v4965_v33  ;;  %v3207_v31 = vpop.eup %3206  ;;  %v1416_v25 = vsub.f32 %v4435_v29, %v1317_v9  ;;  %v1417_v59 = vsub.f32 %v4441_v24, %v1317_v9  ;;  %v1741_v14 = vadd.f32 %v4965_v33, %v4963_v56  ;;  %3222 = vpow2.f32 %v1596_v0  ;;  %2362 = vmatpush1.bf16.msra.mxu1 %v2136_v3  ;;  %v1990_v29 = vld [vmem:[%s4304_s23 + $0x2a0] sm:$0xff]  ;;  %v1992_v24 = vld [vmem:[%s4304_s23 + $0x2b0] sm:$0xff]  ;;  %v4988_v0 = vld [vmem:[%s4304_s23 + $0x2c8] sm:$0xff] }
 0x32a   : > { %v1821_v16 = vmul.f32 %v3207_v31, %v5785_v54  ;;  %v1820_v19 = vmul.f32 %v3207_v31, %v5787_v17  ;;  %v4985_v8 = vpop.eup %3208  ;;  %3224 = vrcp.f32 %v1644_v2  ;;  %2363 = vmatprep.subr.bf16.mxu1 %v2139_v58  ;;  %v4991_v3 = vld [vmem:[%s4304_s23 + $0x2d8] sm:$0xff]  ;;  %v4996_v2 = vld [vmem:[%s4304_s23 + $0x2c0] sm:$0xff]  ;;  %v2140_v21 = vpack.c.bf16 %v1992_v24, %v1990_v29  ;;  %v5790_v24 = vld [vmem:[#allocation66_spill] sm:$0xff] }
 0x32b   : > { %5788 = vst [vmem:[#allocation60_spill] sm:$0xff] %v4985_v8  ;;  %v1598_v47 = vmul.f32 1.442695, %v1416_v25  ;;  %v1600_v18 = vmul.f32 1.442695, %v1417_v59  ;;  %1742 = vadd.xlane.f32.xlu1 %v1741_v14  ;;  %v4993_v43 = vpop.eup %3210  ;;  %v1296_v42 = vpop.xlane.xlu0 %1295  ;;  %2489 = vmatpush1.bf16.msra.mxu0 %v4971_v26  ;;  %v2079_v25 = vld [vmem:[%s4304_s23 + $0x568] sm:$0xff]  ;;  %v2143_v5 = vpack.c.bf16 %v4991_v3, %v4988_v0 }
 0x32c   : > { %v2199_v9 = vpack.c.bf16 %v1821_v16, %v1819_v61  ;;  %v1647_v31 = vpop.xlane.xlu1 %1646  ;;  %v2198_v54 = vpack.c.bf16 %v1820_v19, %v1818_v22  ;;  %v2081_v58 = vld [vmem:[%s4304_s23 + $0x578] sm:$0xff]  ;;  %v3213_v59 = vpop.eup %3212  ;;  %v1402_v14 = vsub.f32 %v4336_v45, %v1296_v42  ;;  %v1403_v17 = vsub.f32 %v4338_v40, %v1296_v42  ;;  %v5006_v16 = vld [vmem:[%s4304_s23 + $0x2d0] sm:$0xff]  ;;  %v2078_v33 = vld [vmem:[%s4304_s23 + $0x560] sm:$0xff] }
 0x32d   : > { %3226 = vpow2.f32 %v1598_v47  ;;  %v1720_v61 = vadd.f32 %v4993_v43, %v4985_v8  ;;  %v2080_v22 = vld [vmem:[%s4304_s23 + $0x570] sm:$0xff]  ;;  %2364 = vmatpush1.bf16.msra.mxu1 %v2138_v35  ;;  %v5012_v19 = vpack.c.bf16 %v2081_v58, %v2079_v25  ;;  %v1823_v0 = vmul.f32 %v3213_v59, %v5790_v24  ;;  %v5791_v3 = vld [vmem:[#allocation65_spill] sm:$0xff]  ;;  %v2089_v8 = vld [vmem:[%s4304_s23 + $0x5b8] sm:$0xff] }
 0x32e   : > { %3228 = vpow2.f32 %v1600_v18  ;;  %2294 = vmatprep.mubr.bf16.mxu1 %v2199_v9  ;;  %v1570_v40 = vmul.f32 1.442695, %v1402_v14  ;;  %v1572_v47 = vmul.f32 1.442695, %v1403_v17  ;;  %v5016_v42 = vpack.c.bf16 %v2080_v22, %v2078_v33  ;;  %2365 = vmatprep.subr.bf16.mxu1 %v2141_v1  ;;  %v2083_v33 = vld [vmem:[%s4304_s23 + $0x588] sm:$0xff]  ;;  %v2001_v17 = vld [vmem:[%s4304_s23 + $0x2f8] sm:$0xff] }
 0x32f   : > { %v5014_v45 = vpop.eup %3214  ;;  %3230 = vrcp.f32 %v1647_v31  ;;  %2295 = vmatmul.mubr.bf16.gmra.mrb[40].mxu1 %v2198_v54  ;;  %1721 = vadd.xlane.f32.xlu0 %v1720_v61  ;;  %v1650_v35 = vpop.xlane.xlu0 %1649  ;;  %v1822_v9 = vmul.f32 %v3213_v59, %v5791_v3  ;;  %v2142_v25 = vpack.c.bf16 %v5006_v16, %v4996_v2  ;;  %v5025_v31 = vld [vmem:[%s4304_s23 + $0x2e8] sm:$0xff]  ;;  %v2085_v54 = vld [vmem:[%s4304_s23 + $0x598] sm:$0xff]  ;;  %v2082_v2 = vld [vmem:[%s4304_s23 + $0x580] sm:$0xff] }
 0x330   : > { %5789 = vst [vmem:[#allocation62_spill] sm:$0xff] %v5014_v45  ;;  %v5018_v18 = vpop.eup %3216  ;;  %v1299_v29 = vpop.xlane.xlu1 %1298  ;;  %2490 = vmatprep.subr.bf16.mxu0 %v5012_v19  ;;  %3232 = vpow2.f32 %v1570_v40  ;;  %v2084_v61 = vld [vmem:[%s4304_s23 + $0x590] sm:$0xff]  ;;  %v5792_v22 = vld [vmem:[#allocation68_spill] sm:$0xff]  ;;  %v5041_v24 = vld [vmem:[%s4304_s23 + $0x2e0] sm:$0xff] }
 0x331   : > { %v3219_v58 = vpop.eup %3218  ;;  %v1404_v1 = vsub.f32 %v4344_v15, %v1299_v29  ;;  %v1405_v14 = vsub.f32 %v4350_v7, %v1299_v29  ;;  %v1723_v59 = vadd.f32 %v5018_v18, %v5014_v45  ;;  %2491 = vmatpush1.bf16.msra.mxu0 %v5016_v42  ;;  %3234 = vpow2.f32 %v1572_v47  ;;  %2366 = vmatpush1.bf16.msra.mxu1 %v2140_v21  ;;  %v5044_v15 = vld [vmem:[%s4304_s23 + $0x2f0] sm:$0xff]  ;;  %v5051_v21 = vld [vmem:[%s4304_s23 + $0x308] sm:$0xff] }
 0x332   : > { %v1825_v16 = vmul.f32 %v3219_v58, %v4523_v53  ;;  %v1824_v40 = vmul.f32 %v3219_v58, %v5792_v22  ;;  %v5046_v7 = vpack.c.bf16 %v2085_v54, %v2083_v33  ;;  %v5048_v29 = vpop.eup %3220  ;;  %2367 = vmatprep.subr.bf16.mxu1 %v2143_v5  ;;  %v5054_v53 = vld [vmem:[%s4304_s23 + $0x318] sm:$0xff]  ;;  %v5056_v47 = vpack.c.bf16 %v2084_v61, %v2082_v2  ;;  %v2087_v5 = vld [vmem:[%s4304_s23 + $0x5a8] sm:$0xff] }
 0x333   : > { %v1574_v3 = vmul.f32 1.442695, %v1404_v1  ;;  %v1576_v45 = vmul.f32 1.442695, %v1405_v14  ;;  %1724 = vadd.xlane.f32.xlu1 %v1723_v59  ;;  %v5058_v58 = vpop.eup %3222  ;;  %3236 = vrcp.f32 %v1650_v35  ;;  %v1320_v1 = vpop.xlane.xlu0 %1319  ;;  %v2145_v14 = vpack.c.bf16 %v2001_v17, %v5025_v31  ;;  %v5062_v59 = vld [vmem:[%s4304_s23 + $0x300] sm:$0xff]  ;;  %v2088_v31 = vld [vmem:[%s4304_s23 + $0x5b0] sm:$0xff] }
 0x334   : > { %v2201_v33 = vpack.c.bf16 %v1825_v16, %v1823_v0  ;;  %v1653_v54 = vpop.xlane.xlu1 %1652  ;;  %v2200_v22 = vpack.c.bf16 %v1824_v40, %v1822_v9  ;;  %2492 = vmatprep.subr.bf16.mxu0 %v5046_v7  ;;  %v3225_v2 = vpop.eup %3224  ;;  %v1418_v61 = vsub.f32 %v4461_v10, %v1320_v1  ;;  %v1419_v35 = vsub.f32 %v4467_v51, %v1320_v1  ;;  %v5072_v16 = vld [vmem:[%s4304_s23 + $0x310] sm:$0xff]  ;;  %v2086_v9 = vld [vmem:[%s4304_s23 + $0x5a0] sm:$0xff] }
 0x335   : > { %3238 = vpow2.f32 %v1574_v3  ;;  %v1744_v0 = vadd.f32 %v5058_v58, %v5048_v29  ;;  %2493 = vmatpush1.bf16.msra.mxu0 %v5056_v47  ;;  %2368 = vmatpush1.bf16.msra.mxu1 %v2142_v25  ;;  %v2144_v17 = vpack.c.bf16 %v5044_v15, %v5041_v24  ;;  %v2147_v10 = vpack.c.bf16 %v5054_v53, %v5051_v21  ;;  %v5094_v53 = vld [vmem:[%s4304_s23 + $0x328] sm:$0xff] }
 0x336   : > { %3240 = vpow2.f32 %v1576_v45  ;;  %2304 = vmatprep.mubr.bf16.mxu1 %v2201_v33  ;;  %v5081_v51 = vpack.c.bf16 %v2089_v8, %v2087_v5  ;;  %v1602_v3 = vmul.f32 1.442695, %v1418_v61  ;;  %v1604_v1 = vmul.f32 1.442695, %v1419_v35  ;;  %2369 = vmatprep.subr.bf16.mxu1 %v2145_v14  ;;  %v2091_v33 = vld [vmem:[%s4304_s23 + $0x5c8] sm:$0xff]  ;;  %v2092_v61 = vld [vmem:[%s4304_s23 + $0x5d0] sm:$0xff] }
 0x337   : > { %v5083_v40 = vpop.eup %3226  ;;  %3242 = vrcp.f32 %v1653_v54  ;;  %2305 = vmatmul.mubr.bf16.gmra.mrb[44].mxu1 %v2200_v22  ;;  %1745 = vadd.xlane.f32.xlu0 %v1744_v0  ;;  %v5085_v45 = vpack.c.bf16 %v2088_v31, %v2086_v9  ;;  %v1827_v8 = vmul.f32 %v3225_v2, %v4545_v32  ;;  %v1826_v15 = vmul.f32 %v3225_v2, %v4540_v4  ;;  %v2093_v54 = vld [vmem:[%s4304_s23 + $0x5d8] sm:$0xff]  ;;  %v1656_v14 = vpop.xlane.xlu0 %1655 }
 0x338   : > { %5793 = vst [vmem:[#allocation64_spill] sm:$0xff] %v5083_v40  ;;  %v5087_v25 = vpop.eup %3228  ;;  %v1323_v24 = vpop.xlane.xlu1 %1322  ;;  %v2146_v21 = vpack.c.bf16 %v5072_v16, %v5062_v59  ;;  %2494 = vmatprep.subr.bf16.mxu0 %v5081_v51  ;;  %3244 = vpow2.f32 %v1602_v3  ;;  %v2009_v2 = vld [vmem:[%s4304_s23 + $0x338] sm:$0xff]  ;;  %v2090_v59 = vld [vmem:[%s4304_s23 + $0x5c0] sm:$0xff] }
 0x339   : > { %v3231_v22 = vpop.eup %3230  ;;  %v1420_v5 = vsub.f32 %v4477_v44, %v1323_v24  ;;  %v1421_v32 = vsub.f32 %v4483_v41, %v1323_v24  ;;  %v1747_v4 = vadd.f32 %v5087_v25, %v5083_v40  ;;  %2495 = vmatpush1.bf16.msra.mxu0 %v5085_v45  ;;  %3246 = vpow2.f32 %v1604_v1  ;;  %2370 = vmatpush1.bf16.msra.mxu1 %v2144_v17  ;;  %v2006_v16 = vld [vmem:[%s4304_s23 + $0x320] sm:$0xff]  ;;  %v2008_v44 = vld [vmem:[%s4304_s23 + $0x330] sm:$0xff]  ;;  %v2011_v24 = vld [vmem:[%s4304_s23 + $0x348] sm:$0xff] }
 0x33a   : > { %v1829_v35 = vmul.f32 %v3231_v22, %v4557_v13  ;;  %v1828_v0 = vmul.f32 %v3231_v22, %v4549_v11  ;;  %v5111_v41 = vpack.c.bf16 %v2093_v54, %v2091_v33  ;;  %v5113_v9 = vpop.eup %3232  ;;  %2371 = vmatprep.subr.bf16.mxu1 %v2147_v10  ;;  %v2013_v17 = vld [vmem:[%s4304_s23 + $0x358] sm:$0xff]  ;;  %v5117_v1 = vpack.c.bf16 %v2092_v61, %v2090_v59  ;;  %v2095_v10 = vld [vmem:[%s4304_s23 + $0x5e8] sm:$0xff]  ;;  %v5131_v61 = vld [vmem:[%s4304_s23 + $0x350] sm:$0xff] }
 0x33b   : > { %5794 = vst [vmem:[#allocation61_spill] sm:$0xff] %v5113_v9  ;;  %v1606_v31 = vmul.f32 1.442695, %v1420_v5  ;;  %v1608_v3 = vmul.f32 1.442695, %v1421_v32  ;;  %1748 = vadd.xlane.f32.xlu1 %v1747_v4  ;;  %v5119_v13 = vpop.eup %3234  ;;  %3248 = vrcp.f32 %v1656_v14  ;;  %v2149_v22 = vpack.c.bf16 %v2009_v2, %v5094_v53  ;;  %v5123_v5 = vld [vmem:[%s4304_s23 + $0x340] sm:$0xff] }
 0x33c   : > { %5795 = vst [vmem:[#allocation63_spill] sm:$0xff] %v5119_v13  ;;  %v2203_v11 = vpack.c.bf16 %v1829_v35, %v1827_v8  ;;  %v1659_v33 = vpop.xlane.xlu1 %1658  ;;  %v2202_v54 = vpack.c.bf16 %v1828_v0, %v1826_v15  ;;  %2496 = vmatprep.subr.bf16.mxu0 %v5111_v41  ;;  %v2097_v32 = vld [vmem:[%s4304_s23 + $0x5f8] sm:$0xff]  ;;  %v1302_v4 = vpop.xlane.xlu0 %1301  ;;  %v1726_v59 = vadd.f32 %v5119_v13, %v5113_v9  ;;  %v2094_v15 = vld [vmem:[%s4304_s23 + $0x5e0] sm:$0xff]  ;;  %v2096_v14 = vld [vmem:[%s4304_s23 + $0x5f0] sm:$0xff] }
 0x33d   : > { %3250 = vpow2.f32 %v1606_v31  ;;  %2497 = vmatpush1.bf16.msra.mxu0 %v5117_v1  ;;  %v5134_v8 = vpack.c.bf16 %v2097_v32, %v2095_v10  ;;  %v3237_v53 = vpop.eup %3236  ;;  %v1406_v2 = vsub.f32 %v4360_v37, %v1302_v4  ;;  %v5796_v35 = vld [vmem:[#allocation54_spill] sm:$0xff]  ;;  %2372 = vmatpush1.bf16.msra.mxu1 %v2146_v21  ;;  %v2148_v31 = vpack.c.bf16 %v2008_v44, %v2006_v16 }
 0x33e   : > { %3252 = vpow2.f32 %v1608_v3  ;;  %2314 = vmatprep.mubr.bf16.mxu1 %v2203_v11  ;;  %v1407_v0 = vsub.f32 %v5796_v35, %v1302_v4  ;;  %1727 = vadd.xlane.f32.xlu0 %v1726_v59  ;;  %v2151_v9 = vpack.c.bf16 %v2013_v17, %v2011_v24  ;;  %v5142_v10 = vpack.c.bf16 %v2096_v14, %v2094_v15  ;;  %v2015_v4 = vld [vmem:[%s4304_s23 + $0x368] sm:$0xff]  ;;  %v2014_v35 = vld [vmem:[%s4304_s23 + $0x360] sm:$0xff] }
 0x33f   : > { %v5140_v40 = vpop.eup %3238  ;;  %3254 = vrcp.f32 %v1659_v33  ;;  %2315 = vmatmul.mubr.bf16.gmra.mrb[48].mxu1 %v2202_v54  ;;  %v1578_v3 = vmul.f32 1.442695, %v1406_v2  ;;  %2373 = vmatprep.subr.bf16.mxu1 %v2149_v22  ;;  %v2150_v37 = vpack.c.bf16 %v5131_v61, %v5123_v5  ;;  %v5798_v33 = vld [vmem:[#allocation72_spill] sm:$0xff]  ;;  %v5799_v5 = vld [vmem:[#allocation74_spill] sm:$0xff]  ;;  %v5800_v61 = vld [vmem:[#allocation71_spill] sm:$0xff] }
 0x340   : > { %5797 = vst [vmem:[#allocation66_spill] sm:$0xff] %v5140_v40  ;;  %v5144_v32 = vpop.eup %3240  ;;  %v1580_v11 = vmul.f32 1.442695, %v1407_v0  ;;  %v1305_v13 = vpop.xlane.xlu1 %1304  ;;  %2498 = vmatprep.subr.bf16.mxu0 %v5134_v8  ;;  %v1831_v54 = vmul.f32 %v3237_v53, %v5798_v33  ;;  %v2017_v22 = vld [vmem:[%s4304_s23 + $0x378] sm:$0xff]  ;;  %v1830_v15 = vmul.f32 %v3237_v53, %v5800_v61  ;;  %v2016_v0 = vld [vmem:[%s4304_s23 + $0x370] sm:$0xff] }
 0x341   : > { %v3243_v21 = vpop.eup %3242  ;;  %v1662_v16 = vpop.xlane.xlu0 %1661  ;;  %v1408_v44 = vsub.f32 %v5716_v30, %v1305_v13  ;;  %v1409_v24 = vsub.f32 %v5717_v12, %v1305_v13  ;;  %v1729_v17 = vadd.f32 %v5144_v32, %v5140_v40  ;;  %2499 = vmatpush1.bf16.msra.mxu0 %v5142_v10  ;;  %3256 = vpow2.f32 %v1578_v3  ;;  %2374 = vmatpush1.bf16.msra.mxu1 %v2148_v31  ;;  %v5801_v30 = vld [vmem:[#allocation73_spill] sm:$0xff]  ;;  %v2021_v61 = vld [vmem:[%s4304_s23 + $0x398] sm:$0xff] }
 0x342   : > { %v1833_v59 = vmul.f32 %v3243_v21, %v5799_v5  ;;  %v1832_v12 = vmul.f32 %v3243_v21, %v5801_v30  ;;  %v5160_v13 = vpop.eup %3244  ;;  %3258 = vpow2.f32 %v1580_v11  ;;  %2375 = vmatprep.subr.bf16.mxu1 %v2151_v9  ;;  %v2153_v5 = vpack.c.bf16 %v2017_v22, %v2015_v4  ;;  %v2019_v21 = vld [vmem:[%s4304_s23 + $0x388] sm:$0xff] }
 0x343   : > { %5802 = vst [vmem:[#allocation65_spill] sm:$0xff] %v5160_v13  ;;  %v1582_v14 = vmul.f32 1.442695, %v1408_v44  ;;  %v1584_v2 = vmul.f32 1.442695, %v1409_v24  ;;  %1730 = vadd.xlane.f32.xlu1 %v1729_v17  ;;  %v5164_v31 = vpop.eup %3246  ;;  %3260 = vrcp.f32 %v1662_v16  ;;  %v2018_v44 = vld [vmem:[%s4304_s23 + $0x380] sm:$0xff]  ;;  %v2152_v4 = vpack.c.bf16 %v2016_v0, %v2014_v35 }
 0x344   : > { %5803 = vst [vmem:[#allocation68_spill] sm:$0xff] %v5164_v31  ;;  %v2205_v3 = vpack.c.bf16 %v1833_v59, %v1831_v54  ;;  %v1665_v53 = vpop.xlane.xlu1 %1664  ;;  %v2204_v33 = vpack.c.bf16 %v1832_v12, %v1830_v15  ;;  %v1750_v11 = vadd.f32 %v5164_v31, %v5160_v13  ;;  %v2020_v24 = vld [vmem:[%s4304_s23 + $0x390] sm:$0xff]  ;;  %v2155_v59 = vpack.c.bf16 %v2021_v61, %v2019_v21  ;;  %v2023_v13 = vld [vmem:[%s4304_s23 + $0x3a8] sm:$0xff] }
 0x345   : > { %3262 = vpow2.f32 %v1582_v14  ;;  %v1326_v30 = vpop.xlane.xlu0 %1325  ;;  %v3249_v17 = vpop.eup %3248  ;;  %v5804_v16 = vld [vmem:[#allocation67_spill] sm:$0xff]  ;;  %2376 = vmatpush1.bf16.msra.mxu1 %v2150_v37  ;;  %v5807_v35 = vld [vmem:[#allocation70_spill] sm:$0xff] }
 0x346   : > { %3264 = vpow2.f32 %v1584_v2  ;;  %2324 = vmatprep.mubr.bf16.mxu1 %v2205_v3  ;;  %v1422_v9 = vsub.f32 %v4503_v28, %v1326_v30  ;;  %v1423_v54 = vsub.f32 %v5804_v16, %v1326_v30  ;;  %1751 = vadd.xlane.f32.xlu0 %v1750_v11  ;;  %v2154_v3 = vpack.c.bf16 %v2020_v24, %v2018_v44  ;;  %v2025_v28 = vld [vmem:[%s4304_s23 + $0x3b8] sm:$0xff]  ;;  %v5806_v30 = vld [vmem:[#allocation69_spill] sm:$0xff]  ;;  %v5809_v61 = vld [vmem:[#allocation26_spill] sm:$0xff] }
 0x347   : > { %v5174_v22 = vpop.eup %3250  ;;  %3266 = vrcp.f32 %v1665_v53  ;;  %2325 = vmatmul.mubr.bf16.gmra.mrb[52].mxu1 %v2204_v33  ;;  %2377 = vmatprep.subr.bf16.mxu1 %v2153_v5  ;;  %v5808_v33 = vld [vmem:[#allocation25_spill] sm:$0xff]  ;;  %v5810_v11 = vld [vmem:[#allocation75_spill] sm:$0xff]  ;;  %v5811_v24 = vld [vmem:[#allocation76_spill] sm:$0xff] }
 0x348   : > { %5805 = vst [vmem:[#allocation54_spill] sm:$0xff] %v5174_v22  ;;  %v5176_v15 = vpop.eup %3252  ;;  %v1610_v12 = vmul.f32 1.442695, %v1422_v9  ;;  %v1612_v14 = vmul.f32 1.442695, %v1423_v54  ;;  %v1329_v2 = vpop.xlane.xlu1 %1328  ;;  %v1835_v21 = vmul.f32 %v3249_v17, %v5808_v33  ;;  %v1834_v44 = vmul.f32 %v3249_v17, %v5810_v11  ;;  %v2027_v17 = vld [vmem:[%s4304_s23 + $0x3c8] sm:$0xff] }
 0x349   : > { %v3255_v31 = vpop.eup %3254  ;;  %v1668_v40 = vpop.xlane.xlu0 %1667  ;;  %v1424_v37 = vsub.f32 %v5806_v30, %v1329_v2  ;;  %v1425_v0 = vsub.f32 %v5807_v35, %v1329_v2  ;;  %v1753_v53 = vadd.f32 %v5176_v15, %v5174_v22  ;;  %2378 = vmatpush1.bf16.msra.mxu1 %v2152_v4  ;;  %v2157_v2 = vpack.c.bf16 %v2025_v28, %v2023_v13  ;;  %v2022_v30 = vld [vmem:[%s4304_s23 + $0x3a0] sm:$0xff]  ;;  %v2024_v35 = vld [vmem:[%s4304_s23 + $0x3b0] sm:$0xff] }
 0x34a   : > { %3268 = vpow2.f32 %v1610_v12  ;;  %v1837_v5 = vmul.f32 %v3255_v31, %v5809_v61  ;;  %v1836_v9 = vmul.f32 %v3255_v31, %v5811_v24  ;;  %2379 = vmatprep.subr.bf16.mxu1 %v2155_v59  ;;  %v2029_v61 = vld [vmem:[%s4304_s23 + $0x3d8] sm:$0xff]  ;;  %v2026_v59 = vld [vmem:[%s4304_s23 + $0x3c0] sm:$0xff]  ;;  %v2028_v28 = vld [vmem:[%s4304_s23 + $0x3d0] sm:$0xff] }
 0x34b   : > { %3270 = vpow2.f32 %v1612_v14  ;;  %v1614_v16 = vmul.f32 1.442695, %v1424_v37  ;;  %v1616_v54 = vmul.f32 1.442695, %v1425_v0  ;;  %1754 = vadd.xlane.f32.xlu1 %v1753_v53  ;;  %v5190_v22 = vpop.eup %3256  ;;  %v2159_v0 = vpack.c.bf16 %v2029_v61, %v2027_v17  ;;  %v2030_v61 = vld [vmem:[%s4304_s23 + $0x3e0] sm:$0xff] }
 0x34c   : > { %5812 = vst [vmem:[#allocation72_spill] sm:$0xff] %v5190_v22  ;;  %3272 = vrcp.f32 %v1668_v40  ;;  %v2207_v4 = vpack.c.bf16 %v1837_v5, %v1835_v21  ;;  %v1671_v12 = vpop.xlane.xlu1 %1670  ;;  %v2206_v33 = vpack.c.bf16 %v1836_v9, %v1834_v44  ;;  %v5194_v11 = vpop.eup %3258  ;;  %v2156_v40 = vpack.c.bf16 %v2024_v35, %v2022_v30  ;;  %v2033_v5 = vld [vmem:[%s4304_s23 + $0x3f8] sm:$0xff]  ;;  %v5816_v35 = vld [vmem:[#allocation27_spill] sm:$0xff] }
 0x34d   : > { %3274 = vpow2.f32 %v1614_v16  ;;  %v1674_v31 = vpop.xlane.xlu0 %1673  ;;  %v3261_v14 = vpop.eup %3260  ;;  %2380 = vmatpush1.bf16.msra.mxu1 %v2154_v3  ;;  %v1732_v13 = vadd.f32 %v5194_v11, %v5190_v22  ;;  %v2031_v3 = vld [vmem:[%s4304_s23 + $0x3e8] sm:$0xff]  ;;  %v2158_v9 = vpack.c.bf16 %v2028_v28, %v2026_v59  ;;  %v5814_v16 = vld [vmem:[#allocation28_spill] sm:$0xff] }
 0x34e   : > { %3276 = vpow2.f32 %v1616_v54  ;;  %2334 = vmatprep.mubr.bf16.mxu1 %v2207_v4  ;;  %2381 = vmatprep.subr.bf16.mxu1 %v2157_v2  ;;  %v1839_v54 = vmul.f32 %v3261_v14, %v5814_v16  ;;  %v5815_v2 = vld [vmem:[#allocation30_spill] sm:$0xff]  ;;  %v1838_v4 = vmul.f32 %v3261_v14, %v5816_v35  ;;  %v2161_v17 = vpack.c.bf16 %v2033_v5, %v2031_v3  ;;  %v5819_v35 = vld [vmem:[#allocation32_spill] sm:$0xff] }
 0x34f   : > { %v5200_v37 = vpop.eup %3262  ;;  %3278 = vrcp.f32 %v1674_v31  ;;  %2335 = vmatmul.mubr.bf16.gmra.mrb[56].mxu1 %v2206_v33  ;;  %1733 = vadd.xlane.f32.xlu0 %v1732_v13  ;;  %v2032_v31 = vld [vmem:[%s4304_s23 + $0x3f0] sm:$0xff] }
 0x350   : > { %5813 = vst [vmem:[#allocation74_spill] sm:$0xff] %v5200_v37  ;;  %v5202_v53 = vpop.eup %3264  ;;  %3280 = vrcp.f32 %v1671_v12  ;;  %v1677_v21 = vpop.xlane.xlu1 %1676  ;;  %v5817_v12 = vld [vmem:[#allocation29_spill] sm:$0xff] }
 0x351   : > { %v3267_v44 = vpop.eup %3266  ;;  %3282 = vrcp.f32 %v1677_v21  ;;  %v1735_v24 = vadd.f32 %v5202_v53, %v5200_v37  ;;  %2382 = vmatpush1.bf16.msra.mxu1 %v2156_v40  ;;  %v1680_v40 = vpop.xlane.xlu0 %1679 }
 0x352   : > { %v1841_v30 = vmul.f32 %v3267_v44, %v5815_v2  ;;  %v1840_v33 = vmul.f32 %v3267_v44, %v5817_v12  ;;  %2383 = vmatprep.subr.bf16.mxu1 %v2159_v0  ;;  %v2160_v44 = vpack.c.bf16 %v2032_v31, %v2030_v61  ;;  %v5822_v61 = vld [vmem:[#allocation37_spill] sm:$0xff] }
 0x353   : > { %1736 = vadd.xlane.f32.xlu1 %v1735_v24 }
 0x354   : > { %v5214_v13 = vpop.eup %3268  ;;  %v2209_v21 = vpack.c.bf16 %v1841_v30, %v1839_v54  ;;  %v1683_v22 = vpop.xlane.xlu1 %1682  ;;  %v2208_v37 = vpack.c.bf16 %v1840_v33, %v1838_v4  ;;  %v5818_v54 = vld [vmem:[#allocation31_spill] sm:$0xff]  ;;  %v5820_v4 = vld [vmem:[#allocation33_spill] sm:$0xff] }
 0x355   : > { %v5216_v59 = vpop.eup %3270  ;;  %3284 = vrcp.f32 %v1683_v22  ;;  %2384 = vmatpush1.bf16.msra.mxu1 %v2158_v9  ;;  %v5821_v33 = vld [vmem:[#allocation35_spill] sm:$0xff] }
 0x356   : > { %v3273_v28 = vpop.eup %3272  ;;  %2344 = vmatprep.mubr.bf16.mxu1 %v2209_v21  ;;  %v1756_v14 = vadd.f32 %v5216_v59, %v5214_v13  ;;  %2385 = vmatprep.subr.bf16.mxu1 %v2161_v17  ;;  %3286 = vrcp.f32 %v1680_v40  ;;  %v1686_v21 = vpop.xlane.xlu0 %1685 }
 0x357   : > { %v5220_v0 = vpop.eup %3274  ;;  %2345 = vmatmul.mubr.bf16.gmra.mrb[60].mxu1 %v2208_v37  ;;  %v1842_v22 = vmul.f32 %v3273_v28, %v5818_v54  ;;  %v1843_v37 = vmul.f32 %v3273_v28, %v5819_v35  ;;  %v5823_v28 = vld [vmem:[#allocation36_spill] sm:$0xff]  ;;  %v5824_v35 = vld [vmem:[#allocation34_spill] sm:$0xff] }
 0x358   : > { %v5222_v3 = vpop.eup %3276  ;;  %1757 = vadd.xlane.f32.xlu0 %v1756_v14  ;;  %v1689_v30 = vpop.xlane.xlu1 %1688 }
 0x359   : > { %v3279_v5 = vpop.eup %3278  ;;  %v1759_v24 = vadd.f32 %v5222_v3, %v5220_v0  ;;  %2386 = vmatpush1.bf16.msra.mxu1 %v2160_v44  ;;  %3288 = vrcp.f32 %v1689_v30  ;;  %v5825_v30 = vld [vmem:[#allocation81_spill] sm:$0xff] }
 0x35a   : > { %v3281_v16 = vpop.eup %3280  ;;  %2888 = vmatprep.subr.bf16.mxu1 %v4762_v57  ;;  %v1847_v17 = vmul.f32 %v3279_v5, %v5821_v33  ;;  %3290 = vrcp.f32 %v1686_v21  ;;  %v5831_v21 = vld [vmem:[#allocation55_spill] sm:$0xff] }
 0x35b   : > { %v3283_v9 = vpop.eup %3282  ;;  %v1844_v2 = vmul.f32 %v3281_v16, %v4650_v49  ;;  %1760 = vadd.xlane.f32.xlu1 %v1759_v24  ;;  %v1845_v12 = vmul.f32 %v3281_v16, %v5820_v4 }
 0x35c   : > { %v1849_v31 = vmul.f32 %v3283_v9, %v5822_v61  ;;  %v1848_v24 = vmul.f32 %v3283_v9, %v5823_v28  ;;  %v1695_v57 = vpop.xlane.xlu1 %1694 }
 0x35d   : > { %v2211_v40 = vpack.c.bf16 %v1845_v12, %v1843_v37  ;;  %v2210_v14 = vpack.c.bf16 %v1844_v2, %v1842_v22  ;;  %v1846_v37 = vmul.f32 %v3279_v5, %v5824_v35  ;;  %v1692_v22 = vpop.xlane.xlu0 %1691  ;;  %3292 = vrcp.f32 %v1695_v57  ;;  %v5826_v12 = vld [vmem:[#allocation82_spill] sm:$0xff]  ;;  %v5829_v5 = vld [vmem:[#allocation84_spill] sm:$0xff] }
 0x35e   : > { %v2213_v44 = vpack.c.bf16 %v1849_v31, %v1847_v17  ;;  %3294 = vrcp.f32 %v1692_v22 }
 0x35f   : > { %2387 = vmatprep.mubr.bf16.mxu1 %v2211_v40  ;;  %v3285_v54 = vpop.eup %3284  ;;  %v2212_v4 = vpack.c.bf16 %v1848_v24, %v1846_v37  ;;  %v5833_v24 = vld [vmem:[#allocation85_spill] sm:$0xff] }
 0x360   : > { %2388 = vmatmul.mubr.bf16.vlgmr.msra.gmra.mrb[64].mxu1 %v2210_v14  ;;  %v3287_v49 = vpop.eup %3286  ;;  %v1853_v16 = vmul.f32 %v3285_v54, %v4688_v39  ;;  %v5828_v39 = vld [vmem:[#allocation56_spill] sm:$0xff]  ;;  %v1701_v61 = vpop.xlane.xlu1 %1700 }
 0x361   : > { %2397 = vmatprep.mubr.bf16.mxu1 %v2213_v44  ;;  %2904 = vmatpush1.bf16.msra.mxu1 %v4767_v62  ;;  %v1851_v2 = vmul.f32 %v3287_v49, %v4682_v60  ;;  %v1852_v17 = vmul.f32 %v3285_v54, %v5828_v39  ;;  %v5830_v60 = vld [vmem:[#allocation41_spill] sm:$0xff]  ;;  %v1850_v40 = vmul.f32 %v3287_v49, %v5831_v21  ;;  %v1698_v14 = vpop.xlane.xlu0 %1697  ;;  %v5832_v44 = vld [vmem:[#allocation39_spill] sm:$0xff]  ;;  %3296 = vrcp.f32 %v1701_v61  ;;  %v5837_v49 = vld [vmem:[#allocation88_spill] sm:$0xff] }
 0x362   : > { %2889 = vmatprep.subr.bf16.mxu1 %v4771_v23  ;;  %v5827_v23 = vld [vmem:[#allocation83_spill] sm:$0xff]  ;;  %3298 = vrcp.f32 %v1698_v14  ;;  %v5842_v21 = vld [vmem:[#allocation57_spill] sm:$0xff] }
 0x363   : > { %v2215_v62 = vpack.c.bf16 %v1853_v16, %v1851_v2  ;;  %v3289_v33 = vpop.eup %3288  ;;  %v2214_v57 = vpack.c.bf16 %v1852_v17, %v1850_v40  ;;  %v5834_v16 = vld [vmem:[#allocation86_spill] sm:$0xff]  ;;  %v5835_v54 = vld [vmem:[#allocation87_spill] sm:$0xff]  ;;  %v5836_v2 = vld [vmem:[#allocation40_spill] sm:$0xff] }
 0x364   : > { %v3291_v9 = vpop.eup %3290  ;;  %v1857_v31 = vmul.f32 %v3289_v33, %v5830_v60  ;;  %v5841_v60 = vld [vmem:[#allocation89_spill] sm:$0xff] }
 0x365   : > { %2905 = vmatpush1.bf16.msra.mxu1 %v5825_v30  ;;  %v1855_v28 = vmul.f32 %v3291_v9, %v5832_v44  ;;  %v1856_v30 = vmul.f32 %v3289_v33, %v5836_v2  ;;  %v1704_v17 = vpop.xlane.xlu0 %1703  ;;  %v5843_v33 = vld [vmem:[#allocation58_spill] sm:$0xff] }
 0x366   : > { %2890 = vmatprep.subr.bf16.mxu1 %v5826_v12  ;;  %v5838_v12 = vld [vmem:[#allocation45_spill] sm:$0xff] }
 0x367   : > { %v2217_v35 = vpack.c.bf16 %v1857_v31, %v1855_v28  ;;  %v3293_v37 = vpop.eup %3292  ;;  %v5844_v28 = vld [vmem:[#allocation44_spill] sm:$0xff] }
 0x368   : > { %2398 = vmatmul.mubr.bf16.gmra.mrb[68].mxu1 %v2212_v4  ;;  %v3295_v22 = vpop.eup %3294  ;;  %v1707_v4 = vpop.xlane.xlu1 %1706 }
 0x369   : > { %2407 = vmatprep.mubr.bf16.mxu1 %v2215_v62  ;;  %2906 = vmatpush1.bf16.msra.mxu1 %v5827_v23  ;;  %v1861_v62 = vmul.f32 %v3293_v37, %v5838_v12  ;;  %v5839_v23 = vld [vmem:[#allocation38_spill] sm:$0xff]  ;;  %3300 = vrcp.f32 %v1707_v4  ;;  %v1710_v2 = vpop.xlane.xlu0 %1709 }
 0x36a   : > { %2891 = vmatprep.subr.bf16.mxu1 %v5829_v5  ;;  %v1854_v39 = vmul.f32 %v3291_v9, %v5839_v23  ;;  %v5840_v5 = vld [vmem:[#allocation43_spill] sm:$0xff]  ;;  %3302 = vrcp.f32 %v1704_v17  ;;  %v5850_v17 = vld [vmem:[#allocation46_spill] sm:$0xff] }
 0x36b   : > { %v1859_v61 = vmul.f32 %v3295_v22, %v5840_v5  ;;  %v3297_v14 = vpop.eup %3296  ;;  %v5851_v5 = vld [vmem:[#allocation51_spill] sm:$0xff] }
 0x36c   : > { %v2216_v31 = vpack.c.bf16 %v1856_v30, %v1854_v39  ;;  %v3299_v44 = vpop.eup %3298  ;;  %v1713_v9 = vpop.xlane.xlu1 %1712  ;;  %v5847_v30 = vld [vmem:[#allocation47_spill] sm:$0xff] }
 0x36d   : > { %2907 = vmatpush1.bf16.msra.mxu1 %v5833_v24  ;;  %v2219_v40 = vpack.c.bf16 %v1861_v62, %v1859_v61  ;;  %v1860_v24 = vmul.f32 %v3293_v37, %v5844_v28  ;;  %3304 = vrcp.f32 %v1713_v9  ;;  %v5848_v37 = vld [vmem:[#allocation48_spill] sm:$0xff]  ;;  %v5855_v28 = vld [vmem:[#allocation78_spill] sm:$0xff] }
 0x36e   : > { %2892 = vmatprep.subr.bf16.mxu1 %v5834_v16  ;;  %3306 = vrcp.f32 %v1710_v2  ;;  %v1864_v23 = vmul.f32 %v3297_v14, %v5848_v37 }
 0x370   : > { %2408 = vmatmul.mubr.bf16.gmra.mrb[72].mxu1 %v2214_v57  ;;  %v5845_v57 = vld [vmem:[#allocation49_spill] sm:$0xff] }
 0x371   : > { %2417 = vmatprep.mubr.bf16.mxu1 %v2217_v35  ;;  %2908 = vmatpush1.bf16.msra.mxu1 %v5835_v54  ;;  %v1865_v16 = vmul.f32 %v3297_v14, %v5845_v57  ;;  %v5846_v35 = vld [vmem:[#allocation42_spill] sm:$0xff] }
 0x372   : > { %2893 = vmatprep.subr.bf16.mxu1 %v5837_v49  ;;  %v1858_v54 = vmul.f32 %v3295_v22, %v5846_v35  ;;  %v1863_v49 = vmul.f32 %v3299_v44, %v5847_v30  ;;  %v5849_v22 = vld [vmem:[#allocation53_spill] sm:$0xff] }
 0x373   : > { %v3301_v62 = vpop.eup %3300 }
 0x374   : > { %v2218_v4 = vpack.c.bf16 %v1860_v24, %v1858_v54  ;;  %v2221_v12 = vpack.c.bf16 %v1865_v16, %v1863_v49  ;;  %v1869_v39 = vmul.f32 %v3301_v62, %v5849_v22 }
 0x375   : > { %2909 = vmatpush1.bf16.msra.mxu1 %v5841_v60 }
 0x376   : > { %2894 = vmatprep.subr.bf16.mxu1 %v5842_v21  ;;  %v5852_v21 = vld [vmem:[#allocation52_spill] sm:$0xff] }
 0x378   : > { %2418 = vmatmul.mubr.bf16.gmra.mrb[76].mxu1 %v2216_v31 }
 0x379   : > { %2427 = vmatprep.mubr.bf16.mxu1 %v2219_v40  ;;  %2910 = vmatpush1.bf16.msra.mxu1 %v5843_v33  ;;  %v5853_v40 = vld [vmem:[#allocation80_spill] sm:$0xff]  ;;  %v5854_v33 = vld [vmem:[#allocation50_spill] sm:$0xff] }
 0x37a   : > { %2895 = vmatprep.subr.bf16.mxu1 %v4876_v55  ;;  %v3303_v55 = vpop.eup %3302 }
 0x37b   : > { %v1867_v61 = vmul.f32 %v3303_v55, %v5851_v5  ;;  %v3305_v31 = vpop.eup %3304 }
 0x37c   : > { %v1873_v14 = vmul.f32 %v3305_v31, %v5853_v40 }
 0x37d   : > { %2911 = vmatpush1.bf16.msra.mxu1 %v4888_v36  ;;  %v1862_v36 = vmul.f32 %v3299_v44, %v5850_v17  ;;  %v2223_v60 = vpack.c.bf16 %v1869_v39, %v1867_v61  ;;  %v1866_v44 = vmul.f32 %v3303_v55, %v5854_v33 }
 0x37e   : > { %2896 = vmatprep.subr.bf16.mxu1 %v4890_v6 }
 0x37f   : > { %v2220_v6 = vpack.c.bf16 %v1864_v23, %v1862_v36  ;;  %v5859_v23 = vld [vmem:[#allocation59_spill] sm:$0xff] }
 0x380   : > { %2428 = vmatmul.mubr.bf16.gmra.mrb[80].mxu1 %v2218_v4 }
 0x381   : > { %2437 = vmatprep.mubr.bf16.mxu1 %v2221_v12  ;;  %2912 = vmatpush1.bf16.msra.mxu1 %v4920_v50  ;;  %v3307_v50 = vpop.eup %3306 }
 0x382   : > { %2897 = vmatprep.subr.bf16.mxu1 %v4922_v38  ;;  %v1868_v38 = vmul.f32 %v3301_v62, %v5852_v21 }
 0x385   : > { %2913 = vmatpush1.bf16.msra.mxu1 %v4949_v48  ;;  %v1871_v48 = vmul.f32 %v3307_v50, %v5855_v28  ;;  %v5862_v28 = vld [vmem:[#allocation64_spill] sm:$0xff] }
 0x386   : > { %2898 = vmatprep.subr.bf16.mxu1 %v4951_v34  ;;  %v2222_v34 = vpack.c.bf16 %v1868_v38, %v1866_v44 }
 0x387   : > { %v2225_v24 = vpack.c.bf16 %v1873_v14, %v1871_v48 }
 0x388   : > { %2438 = vmatmul.mubr.bf16.gmra.mrb[84].mxu1 %v2220_v6 }
 0x389   : > { %2447 = vmatprep.mubr.bf16.mxu1 %v2223_v60  ;;  %2914 = vmatpush1.bf16.msra.mxu1 %v4971_v26  ;;  %v5856_v26 = vld [vmem:[#allocation79_spill] sm:$0xff] }
 0x38a   : > { %2899 = vmatprep.subr.bf16.mxu1 %v5012_v19  ;;  %v1872_v9 = vmul.f32 %v3305_v31, %v5856_v26  ;;  %v5857_v19 = vld [vmem:[#allocation77_spill] sm:$0xff]  ;;  %v5861_v31 = vld [vmem:[#allocation62_spill] sm:$0xff] }
 0x38b   : > { %v1870_v57 = vmul.f32 %v3307_v50, %v5857_v19 }
 0x38d   : > { %2915 = vmatpush1.bf16.msra.mxu1 %v5016_v42  ;;  %v2224_v16 = vpack.c.bf16 %v1872_v9, %v1870_v57  ;;  %v5863_v57 = vld [vmem:[#allocation63_spill] sm:$0xff] }
 0x38e   : > { %2900 = vmatprep.subr.bf16.mxu1 %v5046_v7 }
 0x390   : > { %2448 = vmatmul.mubr.bf16.gmra.mrb[88].mxu1 %v2222_v34 }
 0x391   : > { %2457 = vmatprep.mubr.bf16.mxu1 %v2225_v24  ;;  %2916 = vmatpush1.bf16.msra.mxu1 %v5056_v47 }
 0x392   : > { %2901 = vmatprep.subr.bf16.mxu1 %v5081_v51 }
 0x395   : > { %2917 = vmatpush1.bf16.msra.mxu1 %v5085_v45 }
 0x396   : > { %2902 = vmatprep.subr.bf16.mxu1 %v5111_v41 }
 0x398   : > { %2458 = vmatmul.mubr.bf16.gmra.mrb[92].mxu1 %v2224_v16 }
 0x399   : > { %2918 = vmatpush1.bf16.msra.mxu1 %v5117_v1 }
 0x39a   : > { %2903 = vmatprep.subr.bf16.mxu1 %v5134_v8  ;;  %v5858_v8 = vld [vmem:[#allocation90_spill] sm:$0xff] }
 0x39d   : > { %2919 = vmatpush1.bf16.msra.mxu1 %v5142_v10 }
 0x3ab   : > { %v1716_v42 = vpop.xlane.xlu0 %1715 }
 0x3ac   : > { %3308 = vrcp.f32 %v1716_v42 }
 0x3af   : > { %v1719_v7 = vpop.xlane.xlu1 %1718 }
 0x3b0   : > { %3310 = vrcp.f32 %v1719_v7 }
 0x3b3   : > { %v1740_v47 = vpop.xlane.xlu0 %1739 }
 0x3b4   : > { %3312 = vrcp.f32 %v1740_v47 }
 0x3b6   : > { %v3309_v35 = vpop.eup %3308 }
 0x3b7   : > { %v1874_v54 = vmul.f32 %v3309_v35, %v4870_v63  ;;  %v1875_v1 = vmul.f32 %v3309_v35, %v4879_v27 }
 0x3b8   : > { %v1743_v51 = vpop.xlane.xlu1 %1742 }
 0x3b9   : > { %3314 = vrcp.f32 %v1743_v51 }
 0x3ba   : > { %v3311_v45 = vpop.eup %3310 }
 0x3bb   : > { %v1876_v41 = vmul.f32 %v3311_v45, %v4903_v46  ;;  %v1877_v30 = vmul.f32 %v3311_v45, %v5858_v8 }
 0x3bc   : > { %v1722_v2 = vpop.xlane.xlu0 %1721 }
 0x3bd   : > { %v2227_v10 = vpack.c.bf16 %v1877_v30, %v1875_v1  ;;  %v2226_v49 = vpack.c.bf16 %v1876_v41, %v1874_v54  ;;  %3316 = vrcp.f32 %v1722_v2  ;;  %v5866_v2 = vld [vmem:[#allocation68_spill] sm:$0xff]  ;;  %v5867_v30 = vld [vmem:[#allocation65_spill] sm:$0xff] }
 0x3be   : > { %v3313_v12 = vpop.eup %3312 }
 0x3bf   : > { %2500 = vmatprep.mubr.bf16.mxu0 %v2227_v10  ;;  %v1890_v55 = vmul.f32 %v3313_v12, %v4936_v52  ;;  %v1891_v46 = vmul.f32 %v3313_v12, %v4941_v20  ;;  %v5868_v10 = vld [vmem:[#allocation54_spill] sm:$0xff] }
 0x3c0   : > { %v1725_v4 = vpop.xlane.xlu1 %1724  ;;  %2501 = vmatmul.mubr.bf16.vlgmr.msra.gmra.mrb[64].mxu0 %v2226_v49 }
 0x3c1   : > { %3318 = vrcp.f32 %v1725_v4 }
 0x3c3   : > { %v3315_v62 = vpop.eup %3314 }
 0x3c4   : > { %v1892_v63 = vmul.f32 %v3315_v62, %v4963_v56  ;;  %v1746_v37 = vpop.xlane.xlu0 %1745  ;;  %v1893_v27 = vmul.f32 %v3315_v62, %v5859_v23  ;;  %v5860_v56 = vld [vmem:[#allocation60_spill] sm:$0xff] }
 0x3c5   : > { %3320 = vrcp.f32 %v1746_v37 }
 0x3c6   : > { %v2235_v22 = vpack.c.bf16 %v1893_v27, %v1891_v46  ;;  %v2234_v39 = vpack.c.bf16 %v1892_v63, %v1890_v55 }
 0x3c7   : > { %v3317_v36 = vpop.eup %3316 }
 0x3c8   : > { %2540 = vmatprep.mubr.bf16.mxu1 %v2235_v22  ;;  %v1749_v17 = vpop.xlane.xlu1 %1748  ;;  %v1879_v6 = vmul.f32 %v3317_v36, %v4993_v43  ;;  %v1878_v60 = vmul.f32 %v3317_v36, %v5860_v56  ;;  %v5870_v22 = vld [vmem:[#allocation74_spill] sm:$0xff] }
 0x3c9   : > { %3322 = vrcp.f32 %v1749_v17  ;;  %2541 = vmatmul.mubr.bf16.vlgmr.msra.gmra.mrb[96].mxu1 %v2234_v39 }
 0x3cb   : > { %v3319_v5 = vpop.eup %3318  ;;  %v1728_v61 = vpop.xlane.xlu0 %1727 }
 0x3cc   : > { %v1881_v52 = vmul.f32 %v3319_v5, %v5018_v18  ;;  %v1880_v20 = vmul.f32 %v3319_v5, %v5861_v31  ;;  %3324 = vrcp.f32 %v1728_v61 }
 0x3ce   : > { %v2229_v50 = vpack.c.bf16 %v1881_v52, %v1879_v6  ;;  %v2228_v21 = vpack.c.bf16 %v1880_v20, %v1878_v60 }
 0x3cf   : > { %v3321_v40 = vpop.eup %3320 }
 0x3d0   : > { %2510 = vmatprep.mubr.bf16.mxu0 %v2229_v50  ;;  %v1731_v38 = vpop.xlane.xlu1 %1730  ;;  %v1895_v44 = vmul.f32 %v3321_v40, %v5058_v58  ;;  %v1894_v18 = vmul.f32 %v3321_v40, %v5048_v29  ;;  %v5864_v58 = vld [vmem:[#allocation61_spill] sm:$0xff] }
 0x3d1   : > { %3326 = vrcp.f32 %v1731_v38  ;;  %2511 = vmatmul.mubr.bf16.gmra.mrb[68].mxu0 %v2228_v21 }
 0x3d3   : > { %v3323_v14 = vpop.eup %3322  ;;  %v1752_v33 = vpop.xlane.xlu0 %1751 }
 0x3d4   : > { %v1897_v43 = vmul.f32 %v3323_v14, %v5087_v25  ;;  %v1896_v48 = vmul.f32 %v3323_v14, %v5862_v28  ;;  %3328 = vrcp.f32 %v1752_v33  ;;  %v5865_v25 = vld [vmem:[#allocation66_spill] sm:$0xff] }
 0x3d6   : > { %v2237_v34 = vpack.c.bf16 %v1897_v43, %v1895_v44  ;;  %v2236_v24 = vpack.c.bf16 %v1896_v48, %v1894_v18  ;;  %v3325_v9 = vpop.eup %3324 }
 0x3d7   : > { %v1883_v16 = vmul.f32 %v3325_v9, %v5863_v57  ;;  %v1882_v7 = vmul.f32 %v3325_v9, %v5864_v58 }
 0x3d8   : > { %2550 = vmatprep.mubr.bf16.mxu1 %v2237_v34  ;;  %v1755_v26 = vpop.xlane.xlu1 %1754 }
 0x3d9   : > { %3330 = vrcp.f32 %v1755_v26  ;;  %2551 = vmatmul.mubr.bf16.gmra.mrb[100].mxu1 %v2236_v24 }
 0x3db   : > { %v3327_v19 = vpop.eup %3326 }
 0x3dc   : > { %v1885_v42 = vmul.f32 %v3327_v19, %v5144_v32  ;;  %v1884_v47 = vmul.f32 %v3327_v19, %v5865_v25  ;;  %v1734_v29 = vpop.xlane.xlu0 %1733 }
 0x3dd   : > { %3332 = vrcp.f32 %v1734_v29 }
 0x3de   : > { %v2231_v51 = vpack.c.bf16 %v1885_v42, %v1883_v16  ;;  %v2230_v35 = vpack.c.bf16 %v1884_v47, %v1882_v7  ;;  %v3329_v54 = vpop.eup %3328 }
 0x3df   : > { %v1899_v1 = vmul.f32 %v3329_v54, %v5866_v2  ;;  %v1898_v32 = vmul.f32 %v3329_v54, %v5867_v30 }
 0x3e0   : > { %2520 = vmatprep.mubr.bf16.mxu0 %v2231_v51  ;;  %v1737_v45 = vpop.xlane.xlu1 %1736 }
 0x3e1   : > { %3334 = vrcp.f32 %v1737_v45  ;;  %2521 = vmatmul.mubr.bf16.gmra.mrb[72].mxu0 %v2230_v35 }
 0x3e3   : > { %v3331_v41 = vpop.eup %3330 }
 0x3e4   : > { %v1901_v8 = vmul.f32 %v3331_v41, %v5176_v15  ;;  %v1900_v49 = vmul.f32 %v3331_v41, %v5868_v10  ;;  %v5869_v15 = vld [vmem:[#allocation72_spill] sm:$0xff] }
 0x3e5   : > { %v1758_v4 = vpop.xlane.xlu0 %1757 }
 0x3e6   : > { %v2239_v12 = vpack.c.bf16 %v1901_v8, %v1899_v1  ;;  %v2238_v62 = vpack.c.bf16 %v1900_v49, %v1898_v32  ;;  %3336 = vrcp.f32 %v1758_v4 }
 0x3e7   : > { %v3333_v63 = vpop.eup %3332 }
 0x3e8   : > { %2560 = vmatprep.mubr.bf16.mxu1 %v2239_v12  ;;  %v1761_v55 = vpop.xlane.xlu1 %1760  ;;  %v1887_v46 = vmul.f32 %v3333_v63, %v5194_v11  ;;  %v1886_v27 = vmul.f32 %v3333_v63, %v5869_v15 }
 0x3e9   : > { %3338 = vrcp.f32 %v1761_v55  ;;  %2561 = vmatmul.mubr.bf16.gmra.mrb[104].mxu1 %v2238_v62 }
 0x3eb   : > { %v3335_v37 = vpop.eup %3334 }
 0x3ec   : > { %v1889_v23 = vmul.f32 %v3335_v37, %v5202_v53  ;;  %v1888_v39 = vmul.f32 %v3335_v37, %v5870_v22 }
 0x3ee   : > { %v2233_v17 = vpack.c.bf16 %v1889_v23, %v1887_v46  ;;  %v2232_v36 = vpack.c.bf16 %v1888_v39, %v1886_v27 }
 0x3ef   : > { %v2276_v5 = vpop.f32.mrb[32].mxu1 }
 0x3f0   : > { %2530 = vmatprep.mubr.bf16.mxu0 %v2233_v17  ;;  %v3337_v61 = vpop.eup %3336  ;;  %2581 = vst [vmem:[%s5320_s4] sm:$0xff] %v2276_v5  ;;  %v2278_v11 = vpop.f32.mrb[33].mxu1 }
 0x3f1   : > { %2531 = vmatmul.mubr.bf16.gmra.mrb[76].mxu0 %v2232_v36  ;;  %2582 = vst [vmem:[%s5320_s4 + $0x8] sm:$0xff] %v2278_v11  ;;  %v2280_v53 = vpop.f32.mrb[34].mxu1  ;;  %v1903_v56 = vmul.f32 %v3337_v61, %v5216_v59  ;;  %v1902_v31 = vmul.f32 %v3337_v61, %v5214_v13 }
 0x3f2   : > { %2583 = vst [vmem:[%s5320_s4 + $0x10] sm:$0xff] %v2280_v53  ;;  %v2282_v52 = vpop.f32.mrb[35].mxu1 }
 0x3f3   : > { %v3339_v6 = vpop.eup %3338  ;;  %2584 = vst [vmem:[%s5320_s4 + $0x18] sm:$0xff] %v2282_v52 }
 0x3f4   : > { %v1905_v60 = vmul.f32 %v3339_v6, %v5222_v3  ;;  %v1904_v20 = vmul.f32 %v3339_v6, %v5220_v0 }
 0x3f6   : > { %v2241_v50 = vpack.c.bf16 %v1905_v60, %v1903_v56  ;;  %v2240_v21 = vpack.c.bf16 %v1904_v20, %v1902_v31 }
 0x3f8   : > { %2570 = vmatprep.mubr.bf16.mxu1 %v2241_v50 }
 0x3f9   : > { %2571 = vmatmul.mubr.bf16.gmra.mrb[108].mxu1 %v2240_v21  ;;  %v2286_v38 = vpop.f32.mrb[36].mxu1 }
 0x3fa   : > { %2585 = vst [vmem:[%s5320_s4 + $0x20] sm:$0xff] %v2286_v38  ;;  %v2288_v40 = vpop.f32.mrb[37].mxu1 }
 0x3fb   : > { %2586 = vst [vmem:[%s5320_s4 + $0x28] sm:$0xff] %v2288_v40  ;;  %v2290_v59 = vpop.f32.mrb[38].mxu1 }
 0x3fc   : > { %2587 = vst [vmem:[%s5320_s4 + $0x30] sm:$0xff] %v2290_v59  ;;  %v2292_v3 = vpop.f32.mrb[39].mxu1 }
 0x3fd   : > { %2588 = vst [vmem:[%s5320_s4 + $0x38] sm:$0xff] %v2292_v3 }
 0x402   : > { %v2296_v13 = vpop.f32.mrb[40].mxu1 }
 0x403   : > { %2589 = vst [vmem:[%s5320_s4 + $0x40] sm:$0xff] %v2296_v13  ;;  %v2298_v0 = vpop.f32.mrb[41].mxu1 }
 0x404   : > { %2590 = vst [vmem:[%s5320_s4 + $0x48] sm:$0xff] %v2298_v0  ;;  %v2300_v14 = vpop.f32.mrb[42].mxu1 }
 0x405   : > { %2591 = vst [vmem:[%s5320_s4 + $0x50] sm:$0xff] %v2300_v14  ;;  %v2302_v33 = vpop.f32.mrb[43].mxu1 }
 0x406   : > { %2592 = vst [vmem:[%s5320_s4 + $0x58] sm:$0xff] %v2302_v33 }
 0x40a   : > { %v2306_v44 = vpop.f32.mrb[44].mxu1 }
 0x40b   : > { %2593 = vst [vmem:[%s5320_s4 + $0x60] sm:$0xff] %v2306_v44  ;;  %v2308_v43 = vpop.f32.mrb[45].mxu1 }
 0x40c   : > { %2594 = vst [vmem:[%s5320_s4 + $0x68] sm:$0xff] %v2308_v43  ;;  %v2310_v18 = vpop.f32.mrb[46].mxu1 }
 0x40d   : > { %2595 = vst [vmem:[%s5320_s4 + $0x70] sm:$0xff] %v2310_v18  ;;  %v2312_v28 = vpop.f32.mrb[47].mxu1 }
 0x40e   : > { %2596 = vst [vmem:[%s5320_s4 + $0x78] sm:$0xff] %v2312_v28 }
 0x412   : > { %v2316_v48 = vpop.f32.mrb[48].mxu1 }
 0x413   : > { %2597 = vst [vmem:[%s5320_s4 + $0x80] sm:$0xff] %v2316_v48  ;;  %v2318_v34 = vpop.f32.mrb[49].mxu1 }
 0x414   : > { %2598 = vst [vmem:[%s5320_s4 + $0x88] sm:$0xff] %v2318_v34  ;;  %v2320_v24 = vpop.f32.mrb[50].mxu1 }
 0x415   : > { %2599 = vst [vmem:[%s5320_s4 + $0x90] sm:$0xff] %v2320_v24  ;;  %v2322_v26 = vpop.f32.mrb[51].mxu1 }
 0x416   : > { %2600 = vst [vmem:[%s5320_s4 + $0x98] sm:$0xff] %v2322_v26 }
 0x41a   : > { %v2326_v9 = vpop.f32.mrb[52].mxu1 }
 0x41b   : > { %2601 = vst [vmem:[%s5320_s4 + $0xa0] sm:$0xff] %v2326_v9  ;;  %v2328_v19 = vpop.f32.mrb[53].mxu1 }
 0x41c   : > { %2602 = vst [vmem:[%s5320_s4 + $0xa8] sm:$0xff] %v2328_v19  ;;  %v2330_v57 = vpop.f32.mrb[54].mxu1 }
 0x41d   : > { %2603 = vst [vmem:[%s5320_s4 + $0xb0] sm:$0xff] %v2330_v57  ;;  %v2332_v16 = vpop.f32.mrb[55].mxu1 }
 0x41e   : > { %2604 = vst [vmem:[%s5320_s4 + $0xb8] sm:$0xff] %v2332_v16 }
 0x422   : > { %v2336_v42 = vpop.f32.mrb[56].mxu1 }
 0x423   : > { %2605 = vst [vmem:[%s5320_s4 + $0xc0] sm:$0xff] %v2336_v42  ;;  %v2338_v58 = vpop.f32.mrb[57].mxu1 }
 0x424   : > { %2606 = vst [vmem:[%s5320_s4 + $0xc8] sm:$0xff] %v2338_v58  ;;  %v2340_v7 = vpop.f32.mrb[58].mxu1 }
 0x425   : > { %2607 = vst [vmem:[%s5320_s4 + $0xd0] sm:$0xff] %v2340_v7  ;;  %v2342_v25 = vpop.f32.mrb[59].mxu1 }
 0x426   : > { %2608 = vst [vmem:[%s5320_s4 + $0xd8] sm:$0xff] %v2342_v25 }
 0x42a   : > { %v2346_v47 = vpop.f32.mrb[60].mxu1 }
 0x42b   : > { %2609 = vst [vmem:[%s5320_s4 + $0xe0] sm:$0xff] %v2346_v47  ;;  %v2348_v29 = vpop.f32.mrb[61].mxu1 }
 0x42c   : > { %2610 = vst [vmem:[%s5320_s4 + $0xe8] sm:$0xff] %v2348_v29  ;;  %v2350_v51 = vpop.f32.mrb[62].mxu1 }
 0x42d   : > { %2611 = vst [vmem:[%s5320_s4 + $0xf0] sm:$0xff] %v2350_v51  ;;  %v2352_v35 = vpop.f32.mrb[63].mxu1 }
 0x42e   : > { %2612 = vst [vmem:[%s5320_s4 + $0xf8] sm:$0xff] %v2352_v35 }
 0x433   : > { %v2389_v45 = vpop.f32.mrb[64].mxu1 }
 0x434   : > { %2613 = vst [vmem:[%s5320_s4 + $0x100] sm:$0xff] %v2389_v45  ;;  %v2391_v54 = vpop.f32.mrb[65].mxu1 }
 0x435   : > { %2614 = vst [vmem:[%s5320_s4 + $0x108] sm:$0xff] %v2391_v54  ;;  %v2393_v41 = vpop.f32.mrb[66].mxu1 }
 0x436   : > { %2615 = vst [vmem:[%s5320_s4 + $0x110] sm:$0xff] %v2393_v41  ;;  %v2395_v2 = vpop.f32.mrb[67].mxu1 }
 0x437   : > { %2616 = vst [vmem:[%s5320_s4 + $0x118] sm:$0xff] %v2395_v2 }
 0x43b   : > { %v2399_v1 = vpop.f32.mrb[68].mxu1 }
 0x43c   : > { %2617 = vst [vmem:[%s5320_s4 + $0x120] sm:$0xff] %v2399_v1  ;;  %v2401_v8 = vpop.f32.mrb[69].mxu1 }
 0x43d   : > { %2618 = vst [vmem:[%s5320_s4 + $0x128] sm:$0xff] %v2401_v8  ;;  %v2403_v30 = vpop.f32.mrb[70].mxu1 }
 0x43e   : > { %2619 = vst [vmem:[%s5320_s4 + $0x130] sm:$0xff] %v2403_v30  ;;  %v2405_v32 = vpop.f32.mrb[71].mxu1 }
 0x43f   : > { %2620 = vst [vmem:[%s5320_s4 + $0x138] sm:$0xff] %v2405_v32 }
 0x443   : > { %v2409_v10 = vpop.f32.mrb[72].mxu1 }
 0x444   : > { %2621 = vst [vmem:[%s5320_s4 + $0x140] sm:$0xff] %v2409_v10  ;;  %v2411_v49 = vpop.f32.mrb[73].mxu1 }
 0x445   : > { %2622 = vst [vmem:[%s5320_s4 + $0x148] sm:$0xff] %v2411_v49  ;;  %v2413_v4 = vpop.f32.mrb[74].mxu1 }
 0x446   : > { %2623 = vst [vmem:[%s5320_s4 + $0x150] sm:$0xff] %v2413_v4  ;;  %v2415_v12 = vpop.f32.mrb[75].mxu1 }
 0x447   : > { %2624 = vst [vmem:[%s5320_s4 + $0x158] sm:$0xff] %v2415_v12 }
 0x44b   : > { %v2419_v62 = vpop.f32.mrb[76].mxu1 }
 0x44c   : > { %2625 = vst [vmem:[%s5320_s4 + $0x160] sm:$0xff] %v2419_v62  ;;  %v2421_v55 = vpop.f32.mrb[77].mxu1 }
 0x44d   : > { %2626 = vst [vmem:[%s5320_s4 + $0x168] sm:$0xff] %v2421_v55  ;;  %v2423_v63 = vpop.f32.mrb[78].mxu1 }
 0x44e   : > { %2627 = vst [vmem:[%s5320_s4 + $0x170] sm:$0xff] %v2423_v63  ;;  %v2425_v37 = vpop.f32.mrb[79].mxu1 }
 0x44f   : > { %2628 = vst [vmem:[%s5320_s4 + $0x178] sm:$0xff] %v2425_v37 }
 0x453   : > { %v2429_v46 = vpop.f32.mrb[80].mxu1 }
 0x454   : > { %2629 = vst [vmem:[%s5320_s4 + $0x180] sm:$0xff] %v2429_v46  ;;  %v2431_v23 = vpop.f32.mrb[81].mxu1 }
 0x455   : > { %2630 = vst [vmem:[%s5320_s4 + $0x188] sm:$0xff] %v2431_v23  ;;  %v2433_v15 = vpop.f32.mrb[82].mxu1 }
 0x456   : > { %2631 = vst [vmem:[%s5320_s4 + $0x190] sm:$0xff] %v2433_v15  ;;  %v2435_v27 = vpop.f32.mrb[83].mxu1 }
 0x457   : > { %2632 = vst [vmem:[%s5320_s4 + $0x198] sm:$0xff] %v2435_v27 }
 0x45b   : > { %v2439_v22 = vpop.f32.mrb[84].mxu1 }
 0x45c   : > { %2633 = vst [vmem:[%s5320_s4 + $0x1a0] sm:$0xff] %v2439_v22  ;;  %v2441_v39 = vpop.f32.mrb[85].mxu1 }
 0x45d   : > { %2634 = vst [vmem:[%s5320_s4 + $0x1a8] sm:$0xff] %v2441_v39  ;;  %v2443_v17 = vpop.f32.mrb[86].mxu1 }
 0x45e   : > { %2635 = vst [vmem:[%s5320_s4 + $0x1b0] sm:$0xff] %v2443_v17  ;;  %v2445_v36 = vpop.f32.mrb[87].mxu1 }
 0x45f   : > { %2636 = vst [vmem:[%s5320_s4 + $0x1b8] sm:$0xff] %v2445_v36 }
 0x463   : > { %v2449_v5 = vpop.f32.mrb[88].mxu1 }
 0x464   : > { %2637 = vst [vmem:[%s5320_s4 + $0x1c0] sm:$0xff] %v2449_v5  ;;  %v2451_v61 = vpop.f32.mrb[89].mxu1 }
 0x465   : > { %2638 = vst [vmem:[%s5320_s4 + $0x1c8] sm:$0xff] %v2451_v61  ;;  %v2453_v11 = vpop.f32.mrb[90].mxu1 }
 0x466   : > { %2639 = vst [vmem:[%s5320_s4 + $0x1d0] sm:$0xff] %v2453_v11  ;;  %v2455_v53 = vpop.f32.mrb[91].mxu1 }
 0x467   : > { %2640 = vst [vmem:[%s5320_s4 + $0x1d8] sm:$0xff] %v2455_v53 }
 0x46b   : > { %v2459_v6 = vpop.f32.mrb[92].mxu1 }
 0x46c   : > { %2641 = vst [vmem:[%s5320_s4 + $0x1e0] sm:$0xff] %v2459_v6  ;;  %v2461_v52 = vpop.f32.mrb[93].mxu1 }
 0x46d   : > { %2642 = vst [vmem:[%s5320_s4 + $0x1e8] sm:$0xff] %v2461_v52  ;;  %v2463_v56 = vpop.f32.mrb[94].mxu1 }
 0x46e   : > { %2643 = vst [vmem:[%s5320_s4 + $0x1f0] sm:$0xff] %v2463_v56  ;;  %v2465_v60 = vpop.f32.mrb[95].mxu1 }
 0x46f   : > { %2644 = vst [vmem:[%s5320_s4 + $0x1f8] sm:$0xff] %v2465_v60 }
 0x493   : > { %v2502_v31 = vpop.f32.mrb[64].mxu0 }
 0x494   : > { %2645 = vst [vmem:[%s5320_s4 + $0x200] sm:$0xff] %v2502_v31  ;;  %v2504_v20 = vpop.f32.mrb[65].mxu0 }
 0x495   : > { %2646 = vst [vmem:[%s5320_s4 + $0x208] sm:$0xff] %v2504_v20  ;;  %v2506_v50 = vpop.f32.mrb[66].mxu0 }
 0x496   : > { %2647 = vst [vmem:[%s5320_s4 + $0x210] sm:$0xff] %v2506_v50  ;;  %v2508_v21 = vpop.f32.mrb[67].mxu0 }
 0x497   : > { %2648 = vst [vmem:[%s5320_s4 + $0x218] sm:$0xff] %v2508_v21 }
 0x49c   : > { %v2542_v38 = vpop.f32.mrb[96].mxu1 }
 0x49d   : > { %2661 = vst [vmem:[%s5320_s4 + $0x280] sm:$0xff] %v2542_v38  ;;  %v2544_v40 = vpop.f32.mrb[97].mxu1 }
 0x49e   : > { %2662 = vst [vmem:[%s5320_s4 + $0x288] sm:$0xff] %v2544_v40  ;;  %v2546_v59 = vpop.f32.mrb[98].mxu1 }
 0x49f   : > { %2663 = vst [vmem:[%s5320_s4 + $0x290] sm:$0xff] %v2546_v59  ;;  %v2548_v3 = vpop.f32.mrb[99].mxu1 }
 0x4a0   : > { %2664 = vst [vmem:[%s5320_s4 + $0x298] sm:$0xff] %v2548_v3 }
 0x4a4   : > { %v2512_v13 = vpop.f32.mrb[68].mxu0 }
 0x4a5   : > { %2649 = vst [vmem:[%s5320_s4 + $0x220] sm:$0xff] %v2512_v13  ;;  %v2514_v0 = vpop.f32.mrb[69].mxu0 }
 0x4a6   : > { %2650 = vst [vmem:[%s5320_s4 + $0x228] sm:$0xff] %v2514_v0  ;;  %v2516_v14 = vpop.f32.mrb[70].mxu0 }
 0x4a7   : > { %2651 = vst [vmem:[%s5320_s4 + $0x230] sm:$0xff] %v2516_v14  ;;  %v2518_v33 = vpop.f32.mrb[71].mxu0 }
 0x4a8   : > { %2652 = vst [vmem:[%s5320_s4 + $0x238] sm:$0xff] %v2518_v33 }
 0x4ac   : > { %v2552_v44 = vpop.f32.mrb[100].mxu1 }
 0x4ad   : > { %2665 = vst [vmem:[%s5320_s4 + $0x2a0] sm:$0xff] %v2552_v44  ;;  %v2554_v43 = vpop.f32.mrb[101].mxu1 }
 0x4ae   : > { %2666 = vst [vmem:[%s5320_s4 + $0x2a8] sm:$0xff] %v2554_v43  ;;  %v2556_v18 = vpop.f32.mrb[102].mxu1 }
 0x4af   : > { %2667 = vst [vmem:[%s5320_s4 + $0x2b0] sm:$0xff] %v2556_v18  ;;  %v2558_v28 = vpop.f32.mrb[103].mxu1 }
 0x4b0   : > { %2668 = vst [vmem:[%s5320_s4 + $0x2b8] sm:$0xff] %v2558_v28 }
 0x4b4   : > { %v2522_v48 = vpop.f32.mrb[72].mxu0 }
 0x4b5   : > { %2653 = vst [vmem:[%s5320_s4 + $0x240] sm:$0xff] %v2522_v48  ;;  %v2524_v34 = vpop.f32.mrb[73].mxu0 }
 0x4b6   : > { %2654 = vst [vmem:[%s5320_s4 + $0x248] sm:$0xff] %v2524_v34  ;;  %v2526_v24 = vpop.f32.mrb[74].mxu0 }
 0x4b7   : > { %2655 = vst [vmem:[%s5320_s4 + $0x250] sm:$0xff] %v2526_v24  ;;  %v2528_v26 = vpop.f32.mrb[75].mxu0 }
 0x4b8   : > { %2656 = vst [vmem:[%s5320_s4 + $0x258] sm:$0xff] %v2528_v26 }
 0x4bc   : > { %v2562_v9 = vpop.f32.mrb[104].mxu1 }
 0x4bd   : > { %2669 = vst [vmem:[%s5320_s4 + $0x2c0] sm:$0xff] %v2562_v9  ;;  %v2564_v19 = vpop.f32.mrb[105].mxu1 }
 0x4be   : > { %2670 = vst [vmem:[%s5320_s4 + $0x2c8] sm:$0xff] %v2564_v19  ;;  %v2566_v57 = vpop.f32.mrb[106].mxu1 }
 0x4bf   : > { %2671 = vst [vmem:[%s5320_s4 + $0x2d0] sm:$0xff] %v2566_v57  ;;  %v2568_v16 = vpop.f32.mrb[107].mxu1 }
 0x4c0   : > { %2672 = vst [vmem:[%s5320_s4 + $0x2d8] sm:$0xff] %v2568_v16 }
 0x4c4   : > { %v2532_v42 = vpop.f32.mrb[76].mxu0 }
 0x4c5   : > { %2657 = vst [vmem:[%s5320_s4 + $0x260] sm:$0xff] %v2532_v42  ;;  %v2534_v58 = vpop.f32.mrb[77].mxu0 }
 0x4c6   : > { %2658 = vst [vmem:[%s5320_s4 + $0x268] sm:$0xff] %v2534_v58  ;;  %v2536_v7 = vpop.f32.mrb[78].mxu0 }
 0x4c7   : > { %2659 = vst [vmem:[%s5320_s4 + $0x270] sm:$0xff] %v2536_v7  ;;  %v2538_v25 = vpop.f32.mrb[79].mxu0 }
 0x4c8   : > { %2660 = vst [vmem:[%s5320_s4 + $0x278] sm:$0xff] %v2538_v25 }
 0x4cc   : > { %v2572_v47 = vpop.f32.mrb[108].mxu1 }
 0x4cd   : > { %2673 = vst [vmem:[%s5320_s4 + $0x2e0] sm:$0xff] %v2572_v47  ;;  %v2574_v29 = vpop.f32.mrb[109].mxu1 }
 0x4ce   : > { %2674 = vst [vmem:[%s5320_s4 + $0x2e8] sm:$0xff] %v2574_v29  ;;  %v2576_v51 = vpop.f32.mrb[110].mxu1 }
 0x4cf   : > { %2675 = vst [vmem:[%s5320_s4 + $0x2f0] sm:$0xff] %v2576_v51  ;;  %v2578_v35 = vpop.f32.mrb[111].mxu1 }
 0x4d0   : > { %2676 = vst [vmem:[%s5320_s4 + $0x2f8] sm:$0xff] %v2578_v35 }
 0x4d1   : > { %s2884_s29 = sshll.u32 %s3478_s18, 5  ;;  %s2885_s6 = smul.u32 192, %s3482_s19 }
 0x4d2   : > { %s2711_s26 = sshll.u32 %s5320_s4, 4  ;;  %s3505_s20 = smov 4096   ;;  %s2712_s26 = int_to_ptr.vmem [resolvable:$true] %s2711_s26 }
 0x4d3   : > { %s2692_s17 = sadd.s32 %s2885_s6, %s2884_s29  ;;  %p5871_p7 = scmp.ne.s32.totalorder %s5619_s11, 0 }
 0x4d4   : > { %s2875_s3 = sshll.u32 %s2692_s17, 7  ;;  %s5872_s8 = sld [smem:[#allocation91_spill]] }
 0x4d5   : > { %2938 = sst [smem:[#allocation12]] (%p5871_p7), %s3505_s20  ;;  %s3506_s15 = smov 8192  }
 0x4d6   : > { %2939 = sst [smem:[#allocation12 + $0x1]] (%p5871_p7), %s3506_s15  ;;  %s3507_s12 = smov 16  }
 0x4d7   : > { %2940 = sst [smem:[#allocation12 + $0x2]] (%p5871_p7), %s3507_s12  ;;  %s3508_s18 = smov 256  }
 0x4d8   : > { %2941 = sst [smem:[#allocation12 + $0x3]] (%p5871_p7), %s3508_s18  ;;  %s3509_s19 = smov [#allocation11]  }
 0x4d9   : > { %2942 = sst [smem:[#allocation12 + $0x4]] (%p5871_p7), %s3508_s18  ;;  %s3510_s24 = smov 0  }
 0x4da   : > { %s2694_s7 = scalar_lea.hbm %s5872_s8, %s2875_s3  ;;  %2943 = sst [smem:[#allocation12 + $0x5]] (%p5871_p7), %s3507_s12 }
 0x4db   : > { %2944 = dma.general (%p5871_p7), %s2712_s26, 12288, %s2694_s7, %s2678_s10, %s3509_s19, [#allocation12], %s3510_s24, 0  }
 0x4dc PF: > { %s5873_s25 = sld [smem:[#allocation17_spill]]  ;;  %s5874_s27 = sld [smem:[#allocation24_spill]] }
 0x4dd   : > { %p2950_p10 = scmp.ge.s32.totalorder %s3494_s22, 2 }
 0x4e2   : > { %s2739_s5 = sand.u32 1, %s5873_s25   ;;  %p5875_p1 = scmp.ne.s32.totalorder %s5874_s27, 0 }
 0x4e3   : > { %s2740_s9 = scalar_lea.sflag [#allocation4], %s2739_s5 }
 0x4e4   : > { %p2947_p3 = pnand %p2950_p10, %p5875_p1 }
 0x4e6   : > { %3449 = dma.done.wait (!%p2947_p3), %s2740_s9, 12288  }
 0x4e7   : > { %3451 = vsyncadd (!%p2947_p3), %s2740_s9, 4294955008  ;;  %s22_s22 = sadd.s32 1, %s3494_s22   ;;  %s5876_s23 = sld [smem:[#allocation22_spill]] }
 0x4e8   : > { %p19_p9 = scmp.ge.s32.totalorder %s22_s22, 6   ;;  %s5877_s11 = sld [smem:[#allocation18_spill]] }
 0x4e9   : > { %s5878_s17 = sld [smem:[#allocation23_spill]]  ;;  %s5879_s18 = sld [smem:[#allocation19_spill]] }
 0x4ea   : > { %s5880_s20 = sld [smem:[#allocation20_spill]]  ;;  %s5881_s4 = sld [smem:[#allocation21_spill]] }
 0x4eb   : > { %s5882_s12 = smov %s3458_s13  ;;  %s5883_s13 = smov %s3462_s14 }
 0x4ec   : > { %s5885_s15 = smov %s3470_s16  ;;  %s5887_s19 = smov %s3490_s21 }
 0x4ed   : > { %s5884_s14 = smov %s5876_s23  ;;  %21 = sbr.rel (!%p19_p9) target bundleno = 13 (0xd), region = 111 }
 0x4ee   : > { %s5886_s16 = smov %s5877_s11 }
 0x4f0   : > { %s5888_s21 = smov %s5881_s4 }
 0x4f4   :  { %2745 = vsyncpa [#allocation3], 1 }
 0x4f5   :  { %2747 = vsyncpa [#allocation3 + $0x1], 1 }
 0x4f6   :  { %2748 = vsyncpa [#allocation6], 1 }
 0x4f7   :  { %2750 = vsyncpa [#allocation6 + $0x1], 1 }
 0x4f8   :  { %2751 = vsyncpa [#allocation4], 1 }
 0x4f9   :  { %2753 = vsyncpa [#allocation4 + $0x1], 1 }

</bundles_post_ra>
